<compile_context>
chip_gen: v5e
topology: v5e:2x2
jax: 0.10.0
libtpu: 0.0.40
codegen_flags: <defaults>
</compile_context>

<pallas_src>
import functools

import numpy as np
import jax
import jax.numpy as jnp
from jax.experimental import pallas as pl
from jax.experimental.pallas import tpu as pltpu

_BF16 = jnp.bfloat16
_F32 = jnp.float32
_EPS = 1e-12


# -----------------------------------------------------------------------------
# Fused kernel: one grid step = one tile of query rows.  Per step it computes
#   - student features for its (bt, Ds) row tile
#   - teacher features for the whole (padded) batch (one small matmul; the
#     redundancy across steps is negligible and keeps the grid axis "parallel"
#     so v7x megacore can shard steps across both TensorCores)
#   - the (bt, Bp) logits row block, written lane-dense.
# -----------------------------------------------------------------------------
def _fused_kernel(scale_ref, x_ref, ws_ref, w1_ref, w2_ref, wtp_ref, out_ref,
                  *, bt):
    qi = pl.program_id(0)
    x_full = x_ref[...]                                  # (Bp, F) bf16, resident
    row0 = pl.multiple_of(qi * bt, bt)
    x_q = x_ref[pl.ds(row0, bt), :]                      # (bt, F) query rows

    # student: encoder Linear -> proj Linear -> ReLU -> proj Linear
    # (bf16 operands on the MXU, f32 accumulation)
    s = jnp.dot(x_q, ws_ref[...], preferred_element_type=_F32)
    s = jnp.dot(s.astype(_BF16), w1_ref[...], preferred_element_type=_F32)
    s = jnp.maximum(s, 0.0)
    s = jnp.dot(s.astype(_BF16), w2_ref[...], preferred_element_type=_F32)

    # teacher (frozen): encoder and teacher_projection pre-fused (wt @ tp)
    t = jnp.dot(x_full, wtp_ref[...], preferred_element_type=_F32)

    # L2 normalization in f32 with eps guard (padded zero rows stay finite);
    # fold exp(logit_scale) into the student features.
    s = s * jax.lax.rsqrt(jnp.maximum(jnp.sum(s * s, -1, keepdims=True), _EPS))
    t = t * jax.lax.rsqrt(jnp.maximum(jnp.sum(t * t, -1, keepdims=True), _EPS))
    s = s * scale_ref[0]

    # logits row block (bt, Bp) = s @ t.T, expressed as a dot_general
    # contracting the feature axis of both operands (no t.T materialized).
    out_ref[...] = jax.lax.dot_general(
        s, t,
        dimension_numbers=(((1,), (1,)), ((), ())),
        preferred_element_type=_F32)


def _pick_batch_tile(batch):
    """Chip-aware query-row tile size."""
    kind = jax.devices()[0].device_kind.lower()
    if "v6" in kind:
        return 256                       # 2x256^2 MXU, 1 TC: fewest grid steps
    if "v7" in kind:
        # 2x256^2 MXU but 2 TCs/chip: keep >=2 parallel grid steps.
        return 256 if batch > 256 else 128
    return 128                           # v5e (4x128^2 MXUs) and default


def prepare_weights(ws, w1, w2, wt, tp):
    """Hoisted weight prep: call once (teacher is frozen; student weights only
    change once per optimizer step), not on every forward call."""
    wtp = (wt.astype(_F32) @ tp.astype(_F32)).astype(_BF16)     # (F, Ds)
    return ws.astype(_BF16), w1.astype(_BF16), w2.astype(_BF16), wtp


@functools.partial(jax.jit, static_argnames=("scale_logits",))
def clip_distill_forward(x, ws_b, w1_b, w2_b, wtp_b, logit_scale,
                         *, scale_logits=True):
    B, F = x.shape
    Ds = ws_b.shape[1]

    bt = _pick_batch_tile(B)
    nq = pl.cdiv(B, bt)
    Bp = nq * bt

    x_b = x.astype(_BF16)                # cast once: half the x DMA bytes
    if Bp != B:
        x_b = jnp.pad(x_b, ((0, Bp - B), (0, 0)))

    exp_scale = (jnp.exp(logit_scale.astype(_F32)).reshape(1)
                 if scale_logits else jnp.ones((1,), _F32))

    # Advisory cost estimate so XLA schedules surrounding ops around the call.
    flops = int(2 * Bp * F * Ds          # student encoder
                + 4 * Bp * Ds * Ds       # two projection linears
                + 2 * nq * Bp * F * Ds   # teacher path (recomputed per step)
                + 2 * Bp * Bp * Ds)      # similarity logits
    bytes_accessed = int(Bp * F * 2                       # x (bf16)
                         + (2 * F * Ds + 2 * Ds * Ds) * 2  # resident bf16 weights
                         + Bp * Bp * 4)                    # logits out (f32)

    logits_padded = pl.pallas_call(
        functools.partial(_fused_kernel, bt=bt),
        out_shape=jax.ShapeDtypeStruct((Bp, Bp), _F32),
        grid_spec=pltpu.PrefetchScalarGridSpec(
            num_scalar_prefetch=1,                        # exp(logit_scale) -> SMEM
            grid=(nq,),
            in_specs=[
                pl.BlockSpec((Bp, F), lambda i, sc: (0, 0)),    # x: resident, shared
                pl.BlockSpec((F, Ds), lambda i, sc: (0, 0)),    # resident bf16 weights
                pl.BlockSpec((Ds, Ds), lambda i, sc: (0, 0)),
                pl.BlockSpec((Ds, Ds), lambda i, sc: (0, 0)),
                pl.BlockSpec((F, Ds), lambda i, sc: (0, 0)),    # fused wt @ teacher_proj
            ],
            out_specs=pl.BlockSpec((bt, Bp), lambda i, sc: (i, 0)),
        ),
        compiler_params=pltpu.CompilerParams(
            dimension_semantics=("parallel",),    # shard query tiles across TCs
            vmem_limit_bytes=32 * 1024 * 1024),
        cost_estimate=pl.CostEstimate(
            flops=flops, transcendentals=2 * Bp, bytes_accessed=bytes_accessed),
    )(exp_scale, x_b, ws_b, w1_b, w2_b, wtp_b)

    student_logits = logits_padded[:B, :B]
    # teacher_logits is just the transpose of the same data -> cheap wrapper
    # transpose (no duplicate in-kernel (B,B) writeback).
    teacher_logits = student_logits.T
    return teacher_logits, student_logits


# Plain-JAX reference with matching bf16-matmul / f32-accumulation numerics.
def reference_forward(x, ws, w1, w2, wt, tp, logit_scale, scale_logits=True):
    xb = x.astype(_BF16)
    wtp = (wt.astype(_F32) @ tp.astype(_F32)).astype(_BF16)
    s = jnp.dot(xb, ws.astype(_BF16), preferred_element_type=_F32)
    s = jnp.dot(s.astype(_BF16), w1.astype(_BF16), preferred_element_type=_F32)
    s = jnp.maximum(s, 0.0)
    s = jnp.dot(s.astype(_BF16), w2.astype(_BF16), preferred_element_type=_F32)
    t = jnp.dot(xb, wtp, preferred_element_type=_F32)
    s = s * jax.lax.rsqrt(jnp.maximum(jnp.sum(s * s, -1, keepdims=True), _EPS))
    t = t * jax.lax.rsqrt(jnp.maximum(jnp.sum(t * t, -1, keepdims=True), _EPS))
    if scale_logits:
        s = s * jnp.exp(logit_scale.astype(_F32)[0])
    s_logits = jnp.dot(s, t.T, preferred_element_type=_F32)
    return s_logits.T, s_logits


if __name__ == "__main__":
    # TODO(synk): arbitrary teacher/student nn.Modules are modeled as single
    # bias-free Linear encoders (the CLIPDistill head itself is fully fused).
    # batch=256 keeps every grid step MXU-filling and the logits lane-dense;
    # teacher_dimension != student_dimension exercises the random
    # teacher_projection buffer path.
    B, F, Ds, Dt = 256, 256, 256, 128

    key = jax.random.PRNGKey(0)
    kx, kws, kw1, kw2, kwt, ktp = jax.random.split(key, 6)

    x  = jax.random.normal(kx,  (B, F),  dtype=jnp.float32)
    ws = jax.random.normal(kws, (F, Ds), dtype=jnp.float32) * 0.05   # student encoder
    w1 = jax.random.normal(kw1, (Ds, Ds), dtype=jnp.float32) * 0.05  # projection linear 1
    w2 = jax.random.normal(kw2, (Ds, Ds), dtype=jnp.float32) * 0.05  # projection linear 2
    wt = jax.random.normal(kwt, (F, Dt), dtype=jnp.float32) * 0.05   # teacher encoder (frozen)
    tp = jax.random.normal(ktp, (Dt, Ds), dtype=jnp.float32)         # teacher_projection buffer

    logit_scale = jnp.full((1,), np.log(1.0 / 0.07), dtype=jnp.float32)

    # Hoisted weight prep (frozen teacher fusion + bf16 casts), done once.
    ws_b, w1_b, w2_b, wtp_b = prepare_weights(ws, w1, w2, wt, tp)

    teacher_logits, student_logits = clip_distill_forward(
        x, ws_b, w1_b, w2_b, wtp_b, logit_scale)
    jax.block_until_ready((teacher_logits, student_logits))

    ref_t, ref_s = reference_forward(x, ws, w1, w2, wt, tp, logit_scale)
    assert np.allclose(np.asarray(student_logits), np.asarray(ref_s),
                       atol=2e-2, rtol=2e-2), \
        float(np.max(np.abs(np.asarray(student_logits) - np.asarray(ref_s))))
    assert np.allclose(np.asarray(teacher_logits), np.asarray(ref_t),
                       atol=2e-2, rtol=2e-2)
    assert np.array_equal(np.asarray(teacher_logits),
                          np.asarray(student_logits).T)

    print("KERNEL_OK")
</pallas_src>

<mosaic_0001>
module attributes {stable_mosaic.version = 11 : i64} {
  func.func @_fused_kernel(%arg0: i32, %arg1: memref<1xf32, #tpu.memory_space<smem>>, %arg2: memref<256x256xbf16, #tpu.memory_space<vmem>>, %arg3: memref<256x256xbf16, #tpu.memory_space<vmem>>, %arg4: memref<256x256xbf16, #tpu.memory_space<vmem>>, %arg5: memref<256x256xbf16, #tpu.memory_space<vmem>>, %arg6: memref<256x256xbf16, #tpu.memory_space<vmem>>, %arg7: memref<128x256xf32, #tpu.memory_space<vmem>>) attributes {dimension_semantics = [#tpu.dimension_semantics<parallel>], iteration_bounds = array<i64: 2>, scalar_prefetch = 1 : i64, scratch_operands = 0 : i64, tpu.core_type = #tpu.core_type<tc>, window_params = [{pipeline_mode = #tpu.pipeline_mode<synchronous>, transform_indices = @transform_0, window_bounds = array<i64: 256, 256>}, {pipeline_mode = #tpu.pipeline_mode<synchronous>, transform_indices = @transform_1, window_bounds = array<i64: 256, 256>}, {pipeline_mode = #tpu.pipeline_mode<synchronous>, transform_indices = @transform_2, window_bounds = array<i64: 256, 256>}, {pipeline_mode = #tpu.pipeline_mode<synchronous>, transform_indices = @transform_3, window_bounds = array<i64: 256, 256>}, {pipeline_mode = #tpu.pipeline_mode<synchronous>, transform_indices = @transform_4, window_bounds = array<i64: 256, 256>}, {transform_indices = @transform_5, window_bounds = array<i64: 128, 256>}]} {
    %c0 = arith.constant 0 : index
    %c0_0 = arith.constant 0 : index
    %0 = vector.load %arg2[%c0, %c0_0] : memref<256x256xbf16, #tpu.memory_space<vmem>>, vector<256x256xbf16>
    %c128_i32 = arith.constant 128 : i32
    %1 = arith.muli %arg0, %c128_i32 : i32
    %2 = tpu.assume_multiple %1, 128 : i32
    %3 = arith.index_cast %2 : i32 to index
    %c0_1 = arith.constant 0 : index
    %4 = vector.load %arg2[%3, %c0_1] : memref<256x256xbf16, #tpu.memory_space<vmem>>, vector<128x256xbf16>
    %c0_2 = arith.constant 0 : index
    %c0_3 = arith.constant 0 : index
    %5 = vector.load %arg3[%c0_2, %c0_3] : memref<256x256xbf16, #tpu.memory_space<vmem>>, vector<256x256xbf16>
    %cst = arith.constant dense<0.000000e+00> : vector<128x256xf32>
    %6 = tpu.matmul %4, %5, %cst {dimension_numbers = #tpu.dot_dimension_numbers<[1], [0], [0], [1], [0, 0, 1, 1], [], []>} : vector<128x256xbf16>, vector<256x256xbf16>, vector<128x256xf32> -> vector<128x256xf32>
    %7 = arith.truncf %6 : vector<128x256xf32> to vector<128x256xbf16>
    %c0_4 = arith.constant 0 : index
    %c0_5 = arith.constant 0 : index
    %8 = vector.load %arg4[%c0_4, %c0_5] : memref<256x256xbf16, #tpu.memory_space<vmem>>, vector<256x256xbf16>
    %cst_6 = arith.constant dense<0.000000e+00> : vector<128x256xf32>
    %9 = tpu.matmul %7, %8, %cst_6 {dimension_numbers = #tpu.dot_dimension_numbers<[1], [0], [0], [1], [0, 0, 1, 1], [], []>} : vector<128x256xbf16>, vector<256x256xbf16>, vector<128x256xf32> -> vector<128x256xf32>
    %cst_7 = arith.constant 0.000000e+00 : f32
    %10 = vector.broadcast %cst_7 : f32 to vector<128x256xf32>
    %11 = arith.maximumf %9, %10 : vector<128x256xf32>
    %12 = arith.truncf %11 : vector<128x256xf32> to vector<128x256xbf16>
    %c0_8 = arith.constant 0 : index
    %c0_9 = arith.constant 0 : index
    %13 = vector.load %arg5[%c0_8, %c0_9] : memref<256x256xbf16, #tpu.memory_space<vmem>>, vector<256x256xbf16>
    %cst_10 = arith.constant dense<0.000000e+00> : vector<128x256xf32>
    %14 = tpu.matmul %12, %13, %cst_10 {dimension_numbers = #tpu.dot_dimension_numbers<[1], [0], [0], [1], [0, 0, 1, 1], [], []>} : vector<128x256xbf16>, vector<256x256xbf16>, vector<128x256xf32> -> vector<128x256xf32>
    %c0_11 = arith.constant 0 : index
    %c0_12 = arith.constant 0 : index
    %15 = vector.load %arg6[%c0_11, %c0_12] : memref<256x256xbf16, #tpu.memory_space<vmem>>, vector<256x256xbf16>
    %cst_13 = arith.constant dense<0.000000e+00> : vector<256x256xf32>
    %16 = tpu.matmul %0, %15, %cst_13 {dimension_numbers = #tpu.dot_dimension_numbers<[1], [0], [0], [1], [0, 0, 1, 1], [], []>} : vector<256x256xbf16>, vector<256x256xbf16>, vector<256x256xf32> -> vector<256x256xf32>
    %17 = arith.mulf %14, %14 : vector<128x256xf32>
    %cst_14 = arith.constant dense<0.000000e+00> : vector<128xf32>
    %18 = vector.multi_reduction <add>, %17, %cst_14 [1] : vector<128x256xf32> to vector<128xf32>
    %19 = vector.shape_cast %18 : vector<128xf32> to vector<128x1xf32>
    %cst_15 = arith.constant 9.99999996E-13 : f32
    %20 = vector.broadcast %cst_15 : f32 to vector<128x1xf32>
    %21 = arith.maximumf %19, %20 : vector<128x1xf32>
    %22 = math.rsqrt %21 : vector<128x1xf32>
    %23 = vector.broadcast %22 : vector<128x1xf32> to vector<128x256xf32>
    %24 = arith.mulf %14, %23 : vector<128x256xf32>
    %25 = arith.mulf %16, %16 : vector<256x256xf32>
    %cst_16 = arith.constant dense<0.000000e+00> : vector<256xf32>
    %26 = vector.multi_reduction <add>, %25, %cst_16 [1] : vector<256x256xf32> to vector<256xf32>
    %27 = vector.shape_cast %26 : vector<256xf32> to vector<256x1xf32>
    %cst_17 = arith.constant 9.99999996E-13 : f32
    %28 = vector.broadcast %cst_17 : f32 to vector<256x1xf32>
    %29 = arith.maximumf %27, %28 : vector<256x1xf32>
    %30 = math.rsqrt %29 : vector<256x1xf32>
    %31 = vector.broadcast %30 : vector<256x1xf32> to vector<256x256xf32>
    %32 = arith.mulf %16, %31 : vector<256x256xf32>
    %c0_18 = arith.constant 0 : index
    %33 = memref.load %arg1[%c0_18] : memref<1xf32, #tpu.memory_space<smem>>
    %34 = vector.broadcast %33 : f32 to vector<128x256xf32>
    %35 = arith.mulf %24, %34 : vector<128x256xf32>
    %cst_19 = arith.constant dense<0.000000e+00> : vector<128x256xf32>
    %36 = tpu.matmul %35, %32, %cst_19 {dimension_numbers = #tpu.dot_dimension_numbers<[1], [1], [0], [0], [0, 0, 1, 0], [], []>} : vector<128x256xf32>, vector<256x256xf32>, vector<128x256xf32> -> vector<128x256xf32>
    %c0_20 = arith.constant 0 : index
    %c0_21 = arith.constant 0 : index
    %37 = vector.load %arg7[%c0_20, %c0_21] : memref<128x256xf32, #tpu.memory_space<vmem>>, vector<128x256xf32>
    tpu.vector_store %arg7[%c0_20, %c0_21], %36 {strides = array<i32>} : memref<128x256xf32, #tpu.memory_space<vmem>>, vector<128x256xf32>,
    return
  }
  func.func @transform_0(%arg0: i32, %arg1: memref<1xf32, #tpu.memory_space<smem>>) -> (i32, i32) {
    %c0_i32 = arith.constant 0 : i32
    %c0_i32_0 = arith.constant 0 : i32
    %c0_i32_1 = arith.constant 0 : i32
    return %c0_i32, %c0_i32_0 : i32, i32
  }
  func.func @transform_1(%arg0: i32, %arg1: memref<1xf32, #tpu.memory_space<smem>>) -> (i32, i32) {
    %c0_i32 = arith.constant 0 : i32
    %c0_i32_0 = arith.constant 0 : i32
    %c0_i32_1 = arith.constant 0 : i32
    return %c0_i32, %c0_i32_0 : i32, i32
  }
  func.func @transform_2(%arg0: i32, %arg1: memref<1xf32, #tpu.memory_space<smem>>) -> (i32, i32) {
    %c0_i32 = arith.constant 0 : i32
    %c0_i32_0 = arith.constant 0 : i32
    %c0_i32_1 = arith.constant 0 : i32
    return %c0_i32, %c0_i32_0 : i32, i32
  }
  func.func @transform_3(%arg0: i32, %arg1: memref<1xf32, #tpu.memory_space<smem>>) -> (i32, i32) {
    %c0_i32 = arith.constant 0 : i32
    %c0_i32_0 = arith.constant 0 : i32
    %c0_i32_1 = arith.constant 0 : i32
    return %c0_i32, %c0_i32_0 : i32, i32
  }
  func.func @transform_4(%arg0: i32, %arg1: memref<1xf32, #tpu.memory_space<smem>>) -> (i32, i32) {
    %c0_i32 = arith.constant 0 : i32
    %c0_i32_0 = arith.constant 0 : i32
    %c0_i32_1 = arith.constant 0 : i32
    return %c0_i32, %c0_i32_0 : i32, i32
  }
  func.func @transform_5(%arg0: i32, %arg1: memref<1xf32, #tpu.memory_space<smem>>) -> (i32, i32) {
    %c0_i32 = arith.constant 0 : i32
    %c0_i32_0 = arith.constant 0 : i32
    return %arg0, %c0_i32 : i32, i32
  }
}

</mosaic_0001>

<bundles_post_ra>
// kernel: clip_distill_forward.1
= control target key start
LH: loop header
LB: loop body
LE: loop exit
PB: predicated region body
PF: predicated region fallthrough
CT: control target
= control target key end

     0   :  { %s6795_s0 = inlined_call_operand.<no memory space> [shape: f32[1], index: 0, kind: input, shape index: {}]   ;;  %s6796_s1 = inlined_call_operand.vmem [shape: bf16[256,256], index: 1, kind: input, shape index: {}]   ;;  %s6797_s2 = inlined_call_operand.vmem [shape: bf16[256,256], index: 2, kind: input, shape index: {}]   ;;  %s6798_s3 = inlined_call_operand.vmem [shape: bf16[256,256], index: 3, kind: input, shape index: {}]   ;;  %s6799_s4 = inlined_call_operand.vmem [shape: bf16[256,256], index: 4, kind: input, shape index: {}]   ;;  %s6800_s5 = inlined_call_operand.hbm [shape: bf16[256,256], index: 5, kind: input, shape index: {}]   ;;  %s6801_s6 = inlined_call_operand.vmem [shape: f32[256,256], index: 6, kind: output, shape index: {}]  }
   0x1   :  { %11 = sst [smem:[#allocation3]] %s6795_s0 }
   0x2   :  { %12 = vsyncpa [#allocation5], 0  ;;  %s4643_s23 = smov 0  }
   0x3 LB: > { %s177_s26 = sshll.u32 %s6800_s5, 4  ;;  %s4652_s27 = sadd.s32 4294967295, %s4600_s23   ;;  %s4600_s23 = sphi %s4643_s23, %s18_s23   ;;  %s178_s26 = int_to_ptr.hbm [resolvable:$true] %s177_s26 }
   0x4   : > { %p3549_p0 = scmp.ge.s32.totalorder %s4600_s23, 1  ;;  %p154_p1 = scmp.lt.s32.totalorder %s4600_s23, 3 }
   0x5   : > { %p4451_p2 = scmp.eq.s32.totalorder %s4652_s27, 0  ;;  %s4602_s0 = smov [#allocation4]  }
   0x6   : > { %p155_p3 = pnand %p3549_p0, %p154_p1  ;;  %s179_s28 = sshll.u32 %s4602_s0, 4  ;;  %s180_s28 = int_to_ptr.vmem [resolvable:$true] %s179_s28 }
   0x7   : > { %s4603_s29 = smov 128   ;;  %s4604_s30 = smov 8  }
   0x8   : > { %p4447_p4 = pneg %p155_p3  ;;  %195 = sbr.rel (%p155_p3) target bundleno = 1318 (0x526), region = 40 }
   0xa   : > { %p4448_p5 = pnand %p4451_p2, %p4447_p4 }
   0xc   : > { %4450 = dma.hbm_to_vmem [thread:$0]  (!%p4448_p5), %s178_s26, 4096, %s180_s28, [#allocation5], %s4603_s29, %s4603_s29, %s4604_s30  }
   0xd   : > { %4595 = dma.done.wait (%p4451_p2), [#allocation5], 4096  }
   0xe   : > { %4597 = vsyncadd (%p4451_p2), [#allocation5], 4294963200  ;;  %v3681_v0 = vld [vmem:[%s6797_s2 + $0x70] sm:$0xf]  ;;  %v4330_v1 = vld [vmem:[%s6797_s2 + $0x74] sm:$0xf0] }
   0xf   : > { %v3745_v2 = vld [vmem:[%s6797_s2 + $0xf0] sm:$0xf]  ;;  %v3682_v3 = vor.u32 %v4330_v1, %v3681_v0  ;;  %v4346_v4 = vld [vmem:[%s6797_s2 + $0xf4] sm:$0xf0]  ;;  %v4329_v5 = vld [vmem:[%s6797_s2 + $0x74] sm:$0xf] }
  0x10   : > { %v3683_v6 = vld [vmem:[%s6797_s2 + $0x78] sm:$0xf0]  ;;  %v3746_v7 = vor.u32 %v4346_v4, %v3745_v2  ;;  %v4345_v9 = vld [vmem:[%s6797_s2 + $0xf4] sm:$0xf]  ;;  %v3673_v11 = vld [vmem:[%s6797_s2 + $0x60] sm:$0xf] }
  0x11   : > { %v3686_v8 = vor.u32 %v4329_v5, %v3683_v6  ;;  %v3747_v10 = vld [vmem:[%s6797_s2 + $0xf8] sm:$0xf0]  ;;  %553 = vmatpush.bf16.msra.mxu0 %v3682_v3  ;;  %v4328_v13 = vld [vmem:[%s6797_s2 + $0x64] sm:$0xf0]  ;;  %v3737_v14 = vld [vmem:[%s6797_s2 + $0xe0] sm:$0xf] }
  0x12   : > { %v3750_v12 = vor.u32 %v4345_v9, %v3747_v10  ;;  %v4344_v15 = vld [vmem:[%s6797_s2 + $0xe4] sm:$0xf0]  ;;  %602 = vmatpush.bf16.msra.mxu1 %v3746_v7  ;;  %v3674_v16 = vor.u32 %v4328_v13, %v3673_v11  ;;  %v4327_v18 = vld [vmem:[%s6797_s2 + $0x64] sm:$0xf]  ;;  %v3675_v19 = vld [vmem:[%s6797_s2 + $0x68] sm:$0xf0] }
  0x13   : > { %651 = vmatpush.bf16.msra.mxu2 %v3686_v8  ;;  %v3738_v17 = vor.u32 %v4344_v15, %v3737_v14  ;;  %v4343_v20 = vld [vmem:[%s6797_s2 + $0xe4] sm:$0xf]  ;;  %v3678_v21 = vor.u32 %v4327_v18, %v3675_v19  ;;  %v3739_v22 = vld [vmem:[%s6797_s2 + $0xe8] sm:$0xf0]  ;;  %v3665_v23 = vld [vmem:[%s6797_s2 + $0x50] sm:$0xf] }
  0x14   : > { %700 = vmatpush.bf16.msra.mxu3 %v3750_v12  ;;  %v4326_v24 = vld [vmem:[%s6797_s2 + $0x54] sm:$0xf0]  ;;  %v3742_v25 = vor.u32 %v4343_v20, %v3739_v22  ;;  %v3729_v26 = vld [vmem:[%s6797_s2 + $0xd0] sm:$0xf]  ;;  %v4325_v28 = vld [vmem:[%s6797_s2 + $0x54] sm:$0xf] }
  0x15   : > { %v4342_v27 = vld [vmem:[%s6797_s2 + $0xd4] sm:$0xf0]  ;;  %554 = vmatpush.bf16.msra.mxu0 %v3674_v16  ;;  %v3666_v29 = vor.u32 %v4326_v24, %v3665_v23  ;;  %v3667_v30 = vld [vmem:[%s6797_s2 + $0x58] sm:$0xf0]  ;;  %v4341_v31 = vld [vmem:[%s6797_s2 + $0xd4] sm:$0xf] }
  0x16   : > { %v3731_v32 = vld [vmem:[%s6797_s2 + $0xd8] sm:$0xf0]  ;;  %603 = vmatpush.bf16.msra.mxu1 %v3738_v17  ;;  %v3730_v33 = vor.u32 %v4342_v27, %v3729_v26  ;;  %v3670_v34 = vor.u32 %v4325_v28, %v3667_v30  ;;  %v3657_v35 = vld [vmem:[%s6797_s2 + $0x40] sm:$0xf]  ;;  %v4324_v36 = vld [vmem:[%s6797_s2 + $0x44] sm:$0xf0] }
  0x17   : > { %652 = vmatpush.bf16.msra.mxu2 %v3678_v21  ;;  %v3721_v37 = vld [vmem:[%s6797_s2 + $0xc0] sm:$0xf]  ;;  %v3734_v38 = vor.u32 %v4341_v31, %v3731_v32  ;;  %v4340_v39 = vld [vmem:[%s6797_s2 + $0xc4] sm:$0xf0]  ;;  %v4323_v40 = vld [vmem:[%s6797_s2 + $0x44] sm:$0xf]  ;;  %v3658_v44 = vor.u32 %v4324_v36, %v3657_v35 }
  0x18   : > { %701 = vmatpush.bf16.msra.mxu3 %v3742_v25  ;;  %v3659_v41 = vld [vmem:[%s6797_s2 + $0x48] sm:$0xf0]  ;;  %v4339_v42 = vld [vmem:[%s6797_s2 + $0xc4] sm:$0xf]  ;;  %v3722_v45 = vor.u32 %v4340_v39, %v3721_v37  ;;  %v3649_v47 = vld [vmem:[%s6797_s2 + $0x30] sm:$0xf] }
  0x19   : > { %v3723_v43 = vld [vmem:[%s6797_s2 + $0xc8] sm:$0xf0]  ;;  %555 = vmatpush.bf16.msra.mxu0 %v3666_v29  ;;  %v3662_v46 = vor.u32 %v4323_v40, %v3659_v41  ;;  %v4322_v48 = vld [vmem:[%s6797_s2 + $0x34] sm:$0xf0]  ;;  %v3713_v49 = vld [vmem:[%s6797_s2 + $0xb0] sm:$0xf] }
  0x1a   : > { %604 = vmatpush.bf16.msra.mxu1 %v3730_v33  ;;  %v3726_v50 = vor.u32 %v4339_v42, %v3723_v43  ;;  %v4338_v51 = vld [vmem:[%s6797_s2 + $0xb4] sm:$0xf0]  ;;  %v4321_v52 = vld [vmem:[%s6797_s2 + $0x34] sm:$0xf]  ;;  %v3651_v53 = vld [vmem:[%s6797_s2 + $0x38] sm:$0xf0]  ;;  %v3650_v56 = vor.u32 %v4322_v48, %v3649_v47 }
  0x1b   : > { %653 = vmatpush.bf16.msra.mxu2 %v3670_v34  ;;  %v4337_v54 = vld [vmem:[%s6797_s2 + $0xb4] sm:$0xf]  ;;  %v3715_v55 = vld [vmem:[%s6797_s2 + $0xb8] sm:$0xf0]  ;;  %v3714_v57 = vor.u32 %v4338_v51, %v3713_v49  ;;  %v3654_v58 = vor.u32 %v4321_v52, %v3651_v53  ;;  %v3641_v59 = vld [vmem:[%s6797_s2 + $0x20] sm:$0xf] }
  0x1c   : > { %702 = vmatpush.bf16.msra.mxu3 %v3734_v38  ;;  %v4320_v60 = vld [vmem:[%s6797_s2 + $0x24] sm:$0xf0]  ;;  %v3705_v61 = vld [vmem:[%s6797_s2 + $0xa0] sm:$0xf]  ;;  %v3718_v62 = vor.u32 %v4337_v54, %v3715_v55  ;;  %v4319_v0 = vld [vmem:[%s6797_s2 + $0x24] sm:$0xf] }
  0x1d   : > { %556 = vmatpush.bf16.msra.mxu0 %v3658_v44  ;;  %v4336_v63 = vld [vmem:[%s6797_s2 + $0xa4] sm:$0xf0]  ;;  %v3643_v1 = vld [vmem:[%s6797_s2 + $0x28] sm:$0xf0]  ;;  %v4335_v2 = vld [vmem:[%s6797_s2 + $0xa4] sm:$0xf]  ;;  %v3642_v4 = vor.u32 %v4320_v60, %v3641_v59 }
  0x1e   : > { %605 = vmatpush.bf16.msra.mxu1 %v3722_v45  ;;  %v3707_v3 = vld [vmem:[%s6797_s2 + $0xa8] sm:$0xf0]  ;;  %s3556_s11 = sshll.u32 %s4652_s27, 7  ;;  %v3706_v5 = vor.u32 %v4336_v63, %v3705_v61  ;;  %v3646_v6 = vor.u32 %v4319_v0, %v3643_v1  ;;  %v3633_v7 = vld [vmem:[%s6797_s2 + $0x10] sm:$0xf]  ;;  %s6507_s22 = sld [smem:[#allocation3]] }
  0x1f   : > { %654 = vmatpush.bf16.msra.mxu2 %v3662_v46  ;;  %v4318_v8 = vld [vmem:[%s6797_s2 + $0x14] sm:$0xf0]  ;;  %v3697_v9 = vld [vmem:[%s6797_s2 + $0x90] sm:$0xf]  ;;  %v3710_v10 = vor.u32 %v4335_v2, %v3707_v3  ;;  %v4317_v12 = vld [vmem:[%s6797_s2 + $0x14] sm:$0xf]  ;;  %s4838_s14 = scalar_lea.vmem %s6796_s1, %s3556_s11 }
  0x20   : > { %703 = vmatpush.bf16.msra.mxu3 %v3726_v50  ;;  %v4334_v11 = vld [vmem:[%s6797_s2 + $0x94] sm:$0xf0]  ;;  %v3635_v13 = vld [vmem:[%s6797_s2 + $0x18] sm:$0xf0]  ;;  %v4333_v14 = vld [vmem:[%s6797_s2 + $0x94] sm:$0xf]  ;;  %v3634_v16 = vor.u32 %v4318_v8, %v3633_v7 }
  0x21   : > { %557 = vmatpush.bf16.msra.mxu0 %v3650_v56  ;;  %v3699_v15 = vld [vmem:[%s6797_s2 + $0x98] sm:$0xf0]  ;;  %v3698_v17 = vor.u32 %v4334_v11, %v3697_v9  ;;  %v3638_v18 = vor.u32 %v4317_v12, %v3635_v13  ;;  %v3625_v19 = vld [vmem:[%s6797_s2] sm:$0xf]  ;;  %v4316_v20 = vld [vmem:[%s6797_s2 + $0x4] sm:$0xf0] }
  0x22   : > { %606 = vmatpush.bf16.msra.mxu1 %v3714_v57  ;;  %v3689_v21 = vld [vmem:[%s6797_s2 + $0x80] sm:$0xf]  ;;  %v3702_v22 = vor.u32 %v4333_v14, %v3699_v15  ;;  %v4332_v23 = vld [vmem:[%s6797_s2 + $0x84] sm:$0xf0]  ;;  %v4315_v24 = vld [vmem:[%s6797_s2 + $0x4] sm:$0xf]  ;;  %v3626_v28 = vor.u32 %v4316_v20, %v3625_v19 }
  0x23   : > { %655 = vmatpush.bf16.msra.mxu2 %v3654_v58  ;;  %v3627_v25 = vld [vmem:[%s6797_s2 + $0x8] sm:$0xf0]  ;;  %v4331_v26 = vld [vmem:[%s6797_s2 + $0x84] sm:$0xf]  ;;  %v3561_v29 = vld [vmem:[%s4838_s14] sm:$0xf]  ;;  %v3690_v31 = vor.u32 %v4332_v23, %v3689_v21 }
  0x24   : > { %704 = vmatpush.bf16.msra.mxu3 %v3718_v62  ;;  %v3691_v27 = vld [vmem:[%s6797_s2 + $0x88] sm:$0xf0]  ;;  %v4300_v30 = vld [vmem:[%s4838_s14 + $0x4] sm:$0xf0]  ;;  %v3630_v32 = vor.u32 %v4315_v24, %v3627_v25  ;;  %v4299_v33 = vld [vmem:[%s4838_s14 + $0x4] sm:$0xf] }
  0x25   : > { %558 = vmatpush.bf16.msra.mxu0 %v3642_v4  ;;  %v3563_v34 = vld [vmem:[%s4838_s14 + $0x8] sm:$0xf0]  ;;  %v3694_v35 = vor.u32 %v4331_v26, %v3691_v27  ;;  %v3562_v36 = vor.u32 %v4300_v30, %v3561_v29  ;;  %v3569_v38 = vld [vmem:[%s4838_s14 + $0x10] sm:$0xf]  ;;  %v4302_v39 = vld [vmem:[%s4838_s14 + $0x14] sm:$0xf0] }
  0x26   : > { %607 = vmatpush.bf16.msra.mxu1 %v3706_v5  ;;  %v3566_v37 = vor.u32 %v4299_v33, %v3563_v34  ;;  %v4301_v40 = vld [vmem:[%s4838_s14 + $0x14] sm:$0xf]  ;;  %v3571_v41 = vld [vmem:[%s4838_s14 + $0x18] sm:$0xf0]  ;;  %v3570_v42 = vor.u32 %v4302_v39, %v3569_v38  ;;  %v3577_v44 = vld [vmem:[%s4838_s14 + $0x20] sm:$0xf] }
  0x27   : > { %656 = vmatpush.bf16.msra.mxu2 %v3646_v6  ;;  %v3574_v43 = vor.u32 %v4301_v40, %v3571_v41  ;;  %v4304_v45 = vld [vmem:[%s4838_s14 + $0x24] sm:$0xf0]  ;;  %v4303_v46 = vld [vmem:[%s4838_s14 + $0x24] sm:$0xf]  ;;  %v3579_v47 = vld [vmem:[%s4838_s14 + $0x28] sm:$0xf0] }
  0x28   : > { %705 = vmatpush.bf16.msra.mxu3 %v3710_v10  ;;  %v3578_v48 = vor.u32 %v4304_v45, %v3577_v44  ;;  %v3582_v49 = vor.u32 %v4303_v46, %v3579_v47  ;;  %v3585_v50 = vld [vmem:[%s4838_s14 + $0x30] sm:$0xf]  ;;  %v4306_v51 = vld [vmem:[%s4838_s14 + $0x34] sm:$0xf0]  ;;  %v4305_v52 = vld [vmem:[%s4838_s14 + $0x34] sm:$0xf] }
  0x29   : > { %559 = vmatpush.bf16.msra.mxu0 %v3634_v16  ;;  %v3587_v53 = vld [vmem:[%s4838_s14 + $0x38] sm:$0xf0]  ;;  %v3586_v54 = vor.u32 %v4306_v51, %v3585_v50  ;;  %v3593_v56 = vld [vmem:[%s4838_s14 + $0x40] sm:$0xf]  ;;  %v4308_v57 = vld [vmem:[%s4838_s14 + $0x44] sm:$0xf0] }
  0x2a   : > { %608 = vmatpush.bf16.msra.mxu1 %v3698_v17  ;;  %v3590_v55 = vor.u32 %v4305_v52, %v3587_v53  ;;  %v4307_v58 = vld [vmem:[%s4838_s14 + $0x44] sm:$0xf]  ;;  %v3595_v59 = vld [vmem:[%s4838_s14 + $0x48] sm:$0xf0]  ;;  %v3594_v60 = vor.u32 %v4308_v57, %v3593_v56  ;;  %v3809_v62 = vld [vmem:[%s6798_s3 + $0x70] sm:$0xf] }
  0x2b   : > { %657 = vmatpush.bf16.msra.mxu2 %v3638_v18  ;;  %v3598_v61 = vor.u32 %v4307_v58, %v3595_v59  ;;  %v4362_v63 = vld [vmem:[%s6798_s3 + $0x74] sm:$0xf0]  ;;  %v4361_v0 = vld [vmem:[%s6798_s3 + $0x74] sm:$0xf]  ;;  %v3811_v2 = vld [vmem:[%s6798_s3 + $0x78] sm:$0xf0] }
  0x2c   : > { %706 = vmatpush.bf16.msra.mxu3 %v3702_v22  ;;  %v3810_v1 = vor.u32 %v4362_v63, %v3809_v62  ;;  %v3801_v3 = vld [vmem:[%s6798_s3 + $0x60] sm:$0xf]  ;;  %v4360_v4 = vld [vmem:[%s6798_s3 + $0x64] sm:$0xf0]  ;;  %v3814_v5 = vor.u32 %v4361_v0, %v3811_v2  ;;  %v4359_v6 = vld [vmem:[%s6798_s3 + $0x64] sm:$0xf] }
  0x2d   : > { %560 = vmatpush.bf16.msra.mxu0 %v3626_v28  ;;  %v3803_v7 = vld [vmem:[%s6798_s3 + $0x68] sm:$0xf0]  ;;  %v3802_v8 = vor.u32 %v4360_v4, %v3801_v3  ;;  %v3601_v10 = vld [vmem:[%s4838_s14 + $0x50] sm:$0xf]  ;;  %v4310_v11 = vld [vmem:[%s4838_s14 + $0x54] sm:$0xf0] }
  0x2e   : > { %609 = vmatpush.bf16.msra.mxu1 %v3690_v31  ;;  %v3806_v9 = vor.u32 %v4359_v6, %v3803_v7  ;;  %v4309_v12 = vld [vmem:[%s4838_s14 + $0x54] sm:$0xf]  ;;  %v3603_v13 = vld [vmem:[%s4838_s14 + $0x58] sm:$0xf0]  ;;  %v3602_v14 = vor.u32 %v4310_v11, %v3601_v10  ;;  %v3873_v16 = vld [vmem:[%s6798_s3 + $0xf0] sm:$0xf] }
  0x2f   : > { %658 = vmatpush.bf16.msra.mxu2 %v3630_v32  ;;  %v3606_v15 = vor.u32 %v4309_v12, %v3603_v13  ;;  %v4378_v17 = vld [vmem:[%s6798_s3 + $0xf4] sm:$0xf0]  ;;  %v4377_v18 = vld [vmem:[%s6798_s3 + $0xf4] sm:$0xf]  ;;  %v3875_v20 = vld [vmem:[%s6798_s3 + $0xf8] sm:$0xf0] }
  0x30   : > { %707 = vmatpush.bf16.msra.mxu3 %v3694_v35  ;;  %561 = vmatmul.bf16.vlgmr.msra.gmra.mxu0 %v3562_v36  ;;  %v3874_v19 = vor.u32 %v4378_v17, %v3873_v16  ;;  %v3878_v21 = vor.u32 %v4377_v18, %v3875_v20  ;;  %v3793_v22 = vld [vmem:[%s6798_s3 + $0x50] sm:$0xf]  ;;  %v4358_v23 = vld [vmem:[%s6798_s3 + $0x54] sm:$0xf0]  ;;  %v4357_v24 = vld [vmem:[%s6798_s3 + $0x54] sm:$0xf] }
  0x31   : > { %610 = vmatmul.bf16.vlgmr.msra.gmra.mxu1 %v3566_v37  ;;  %957 = vmatpush.bf16.msrb.mxu0 %v3810_v1  ;;  %v3794_v25 = vor.u32 %v4358_v23, %v3793_v22  ;;  %v3795_v26 = vld [vmem:[%s6798_s3 + $0x58] sm:$0xf0]  ;;  %v3865_v27 = vld [vmem:[%s6798_s3 + $0xe0] sm:$0xf]  ;;  %v4376_v28 = vld [vmem:[%s6798_s3 + $0xe4] sm:$0xf0] }
  0x32   : > { %659 = vmatmul.bf16.vlgmr.msra.gmra.mxu2 %v3562_v36  ;;  %1006 = vmatpush.bf16.msrb.mxu1 %v3874_v19  ;;  %v3798_v29 = vor.u32 %v4357_v24, %v3795_v26  ;;  %v3866_v30 = vor.u32 %v4376_v28, %v3865_v27  ;;  %v4375_v31 = vld [vmem:[%s6798_s3 + $0xe4] sm:$0xf]  ;;  %v3867_v32 = vld [vmem:[%s6798_s3 + $0xe8] sm:$0xf0]  ;;  %v3785_v33 = vld [vmem:[%s6798_s3 + $0x40] sm:$0xf] }
  0x33   : > { %708 = vmatmul.bf16.vlgmr.msra.gmra.mxu3 %v3566_v37  ;;  %1055 = vmatpush.bf16.msrb.mxu2 %v3814_v5  ;;  %v3870_v34 = vor.u32 %v4375_v31, %v3867_v32  ;;  %v4356_v35 = vld [vmem:[%s6798_s3 + $0x44] sm:$0xf0]  ;;  %v4355_v36 = vld [vmem:[%s6798_s3 + $0x44] sm:$0xf]  ;;  %v3787_v37 = vld [vmem:[%s6798_s3 + $0x48] sm:$0xf0] }
  0x34   : > { %1104 = vmatpush.bf16.msrb.mxu3 %v3878_v21  ;;  %v3786_v38 = vor.u32 %v4356_v35, %v3785_v33  ;;  %v3790_v39 = vor.u32 %v4355_v36, %v3787_v37  ;;  %v3857_v40 = vld [vmem:[%s6798_s3 + $0xd0] sm:$0xf]  ;;  %v4374_v41 = vld [vmem:[%s6798_s3 + $0xd4] sm:$0xf0]  ;;  %v3859_v44 = vld [vmem:[%s6798_s3 + $0xd8] sm:$0xf0] }
  0x35   : > { %958 = vmatpush.bf16.msrb.mxu0 %v3802_v8  ;;  %v3777_v45 = vld [vmem:[%s6798_s3 + $0x30] sm:$0xf]  ;;  %v4354_v46 = vld [vmem:[%s6798_s3 + $0x34] sm:$0xf0]  ;;  %v3609_v50 = vld [vmem:[%s4838_s14 + $0x60] sm:$0xf] }
  0x36   : > { %1007 = vmatpush.bf16.msrb.mxu1 %v3866_v30  ;;  %v4312_v51 = vld [vmem:[%s4838_s14 + $0x64] sm:$0xf0]  ;;  %v3778_v52 = vor.u32 %v4354_v46, %v3777_v45  ;;  %v4311_v53 = vld [vmem:[%s4838_s14 + $0x64] sm:$0xf]  ;;  %v3849_v57 = vld [vmem:[%s6798_s3 + $0xc0] sm:$0xf] }
  0x37   : > { %1056 = vmatpush.bf16.msrb.mxu2 %v3806_v9  ;;  %v3610_v56 = vor.u32 %v4312_v51, %v3609_v50  ;;  %v4372_v58 = vld [vmem:[%s6798_s3 + $0xc4] sm:$0xf0]  ;;  %v4371_v59 = vld [vmem:[%s6798_s3 + $0xc4] sm:$0xf]  ;;  %v3851_v62 = vld [vmem:[%s6798_s3 + $0xc8] sm:$0xf0] }
  0x38   : > { %1105 = vmatpush.bf16.msrb.mxu3 %v3870_v34  ;;  %v3854_v63 = vor.u32 %v4371_v59, %v3851_v62  ;;  %v3769_v0 = vld [vmem:[%s6798_s3 + $0x20] sm:$0xf]  ;;  %v4352_v1 = vld [vmem:[%s6798_s3 + $0x24] sm:$0xf0]  ;;  %v4351_v2 = vld [vmem:[%s6798_s3 + $0x24] sm:$0xf] }
  0x39   : > { %959 = vmatpush.bf16.msrb.mxu0 %v3794_v25  ;;  %v3770_v3 = vor.u32 %v4352_v1, %v3769_v0  ;;  %v3771_v4 = vld [vmem:[%s6798_s3 + $0x28] sm:$0xf0]  ;;  %v3841_v5 = vld [vmem:[%s6798_s3 + $0xb0] sm:$0xf]  ;;  %v4370_v6 = vld [vmem:[%s6798_s3 + $0xb4] sm:$0xf0] }
  0x3a   : > { %v3774_v7 = vor.u32 %v4351_v2, %v3771_v4  ;;  %v3842_v8 = vor.u32 %v4370_v6, %v3841_v5  ;;  %v4369_v9 = vld [vmem:[%s6798_s3 + $0xb4] sm:$0xf]  ;;  %v3843_v10 = vld [vmem:[%s6798_s3 + $0xb8] sm:$0xf0]  ;;  %v3761_v12 = vld [vmem:[%s6798_s3 + $0x10] sm:$0xf] }
  0x3b   : > { %1057 = vmatpush.bf16.msrb.mxu2 %v3798_v29  ;;  %v3846_v11 = vor.u32 %v4369_v9, %v3843_v10  ;;  %v4350_v13 = vld [vmem:[%s6798_s3 + $0x14] sm:$0xf0]  ;;  %v3763_v16 = vld [vmem:[%s6798_s3 + $0x18] sm:$0xf0]  ;;  %v3833_v18 = vld [vmem:[%s6798_s3 + $0xa0] sm:$0xf] }
  0x3c   : > { %v4368_v19 = vld [vmem:[%s6798_s3 + $0xa4] sm:$0xf0]  ;;  %v4367_v20 = vld [vmem:[%s6798_s3 + $0xa4] sm:$0xf]  ;;  %v3835_v22 = vld [vmem:[%s6798_s3 + $0xa8] sm:$0xf0] }
  0x3d   : > { %960 = vmatpush.bf16.msrb.mxu0 %v3786_v38  ;;  %v3834_v21 = vor.u32 %v4368_v19, %v3833_v18  ;;  %v3838_v23 = vor.u32 %v4367_v20, %v3835_v22  ;;  %v3753_v24 = vld [vmem:[%s6798_s3] sm:$0xf]  ;;  %v4348_v25 = vld [vmem:[%s6798_s3 + $0x4] sm:$0xf0]  ;;  %v4347_v26 = vld [vmem:[%s6798_s3 + $0x4] sm:$0xf] }
  0x3e   : > { %v3754_v27 = vor.u32 %v4348_v25, %v3753_v24  ;;  %v3755_v28 = vld [vmem:[%s6798_s3 + $0x8] sm:$0xf0]  ;;  %v3825_v30 = vld [vmem:[%s6798_s3 + $0x90] sm:$0xf]  ;;  %v4366_v31 = vld [vmem:[%s6798_s3 + $0x94] sm:$0xf0] }
  0x3f   : > { %1058 = vmatpush.bf16.msrb.mxu2 %v3790_v39  ;;  %v3758_v29 = vor.u32 %v4347_v26, %v3755_v28  ;;  %v4365_v32 = vld [vmem:[%s6798_s3 + $0x94] sm:$0xf]  ;;  %v3617_v33 = vld [vmem:[%s4838_s14 + $0x70] sm:$0xf]  ;;  %v4314_v34 = vld [vmem:[%s4838_s14 + $0x74] sm:$0xf0]  ;;  %v3826_v35 = vor.u32 %v4366_v31, %v3825_v30 }
  0x40   : > { %566 = vmatmul.bf16.gmra.mxu0 %v3570_v42  ;;  %v3827_v36 = vld [vmem:[%s6798_s3 + $0x98] sm:$0xf0]  ;;  %v4313_v37 = vld [vmem:[%s4838_s14 + $0x74] sm:$0xf]  ;;  %v3819_v46 = vld [vmem:[%s6798_s3 + $0x88] sm:$0xf0] }
  0x41   : > { %615 = vmatmul.bf16.gmra.mxu1 %v3574_v43  ;;  %961 = vmatpush.bf16.msrb.mxu0 %v3778_v52  ;;  %v3619_v38 = vld [vmem:[%s4838_s14 + $0x78] sm:$0xf0]  ;;  %v3830_v39 = vor.u32 %v4365_v32, %v3827_v36  ;;  %s3553_s24 = sshll.u32 %s4652_s27, 4 }
  0x42   : > { %664 = vmatmul.bf16.gmra.mxu2 %v3570_v42  ;;  %v4373_v42 = vld [vmem:[%s6798_s3 + $0xd4] sm:$0xf]  ;;  %p221_p6 = scmp.lt.s32.totalorder %s3553_s24, 31 }
  0x43   : > { %713 = vmatmul.bf16.gmra.mxu3 %v3574_v43  ;;  %v3858_v43 = vor.u32 %v4374_v41, %v3857_v40  ;;  %v3862_v47 = vor.u32 %v4373_v42, %v3859_v44  ;;  %v3618_v40 = vor.u32 %v4314_v34, %v3617_v33  ;;  %v3817_v41 = vld [vmem:[%s6798_s3 + $0x80] sm:$0xf]  ;;  %v4364_v42 = vld [vmem:[%s6798_s3 + $0x84] sm:$0xf0]  ;;  %v3622_v44 = vor.u32 %v4313_v37, %v3619_v38 }
  0x44   : > { %v3818_v45 = vor.u32 %v4364_v42, %v3817_v41  ;;  %s7091_s24 = smov (!%p221_p6, %s3553_s24), 31 }
  0x45   : > { %1008 = vmatpush.bf16.msrb.mxu1 %v3858_v43  ;;  %1106 = vmatpush.bf16.msrb.mxu3 %v3862_v47  ;;  %v4363_v43 = vld [vmem:[%s6798_s3 + $0x84] sm:$0xf]  ;;  %s4265_s25 = sshll.u32 %s7091_s24, 4 }
  0x46   : > { %962 = vmatpush.bf16.msrb.mxu0 %v3770_v3  ;;  %v3822_v47 = vor.u32 %v4363_v43, %v3819_v46  ;;  %s6758_s28 = scalar_lea.vmem %s6801_s6, %s4265_s25 }
  0x49   : > { %1107 = vmatpush.bf16.msrb.mxu3 %v3854_v63 }
  0x4d   : > { %1108 = vmatpush.bf16.msrb.mxu3 %v3846_v11 }
  0x50   : > { %571 = vmatmul.bf16.gmra.mxu0 %v3578_v48 }
  0x51   : > { %620 = vmatmul.bf16.gmra.mxu1 %v3582_v49  ;;  %1109 = vmatpush.bf16.msrb.mxu3 %v3838_v23 }
  0x52   : > { %669 = vmatmul.bf16.gmra.mxu2 %v3578_v48  ;;  %v4353_v48 = vld [vmem:[%s6798_s3 + $0x34] sm:$0xf] }
  0x53   : > { %718 = vmatmul.bf16.gmra.mxu3 %v3582_v49  ;;  %v3779_v49 = vld [vmem:[%s6798_s3 + $0x38] sm:$0xf0] }
  0x55   : > { %1110 = vmatpush.bf16.msrb.mxu3 %v3830_v39 }
  0x59   : > { %1111 = vmatpush.bf16.msrb.mxu3 %v3822_v47 }
  0x60   : > { %576 = vmatmul.bf16.gmra.mxu0 %v3586_v54 }
  0x61   : > { %625 = vmatmul.bf16.gmra.mxu1 %v3590_v55 }
  0x62   : > { %674 = vmatmul.bf16.gmra.mxu2 %v3586_v54  ;;  %v3611_v54 = vld [vmem:[%s4838_s14 + $0x68] sm:$0xf0] }
  0x63   : > { %723 = vmatmul.bf16.gmra.mxu3 %v3590_v55  ;;  %v3782_v55 = vor.u32 %v4353_v48, %v3779_v49 }
  0x65   : > { %1059 = vmatpush.bf16.msrb.mxu2 %v3782_v55 }
  0x69   : > { %1060 = vmatpush.bf16.msrb.mxu2 %v3774_v7 }
  0x70   : > { %581 = vmatmul.bf16.gmra.mxu0 %v3594_v60 }
  0x71   : > { %630 = vmatmul.bf16.gmra.mxu1 %v3598_v61 }
  0x72   : > { %679 = vmatmul.bf16.gmra.mxu2 %v3594_v60  ;;  %v3614_v60 = vor.u32 %v4311_v53, %v3611_v54 }
  0x73   : > { %728 = vmatmul.bf16.gmra.mxu3 %v3598_v61  ;;  %v3850_v61 = vor.u32 %v4372_v58, %v3849_v57 }
  0x75   : > { %1009 = vmatpush.bf16.msrb.mxu1 %v3850_v61 }
  0x79   : > { %1010 = vmatpush.bf16.msrb.mxu1 %v3842_v8 }
  0x7d   : > { %1011 = vmatpush.bf16.msrb.mxu1 %v3834_v21 }
  0x80   : > { %586 = vmatmul.bf16.gmra.mxu0 %v3602_v14 }
  0x81   : > { %635 = vmatmul.bf16.gmra.mxu1 %v3606_v15 }
  0x82   : > { %684 = vmatmul.bf16.gmra.mxu2 %v3602_v14  ;;  %v4349_v14 = vld [vmem:[%s6798_s3 + $0x14] sm:$0xf]  ;;  %1012 = vmatpush.bf16.msrb.mxu1 %v3826_v35 }
  0x83   : > { %733 = vmatmul.bf16.gmra.mxu3 %v3606_v15  ;;  %v3762_v15 = vor.u32 %v4350_v13, %v3761_v12  ;;  %v3766_v17 = vor.u32 %v4349_v14, %v3763_v16 }
  0x85   : > { %963 = vmatpush.bf16.msrb.mxu0 %v3762_v15  ;;  %1061 = vmatpush.bf16.msrb.mxu2 %v3766_v17 }
  0x86   : > { %1013 = vmatpush.bf16.msrb.mxu1 %v3818_v45 }
  0x89   : > { %964 = vmatpush.bf16.msrb.mxu0 %v3754_v27  ;;  %1062 = vmatpush.bf16.msrb.mxu2 %v3758_v29 }
  0x90   : > { %591 = vmatmul.bf16.gmra.mxu0 %v3610_v56 }
  0x91   : > { %640 = vmatmul.bf16.gmra.mxu1 %v3614_v60 }
  0x92   : > { %689 = vmatmul.bf16.gmra.mxu2 %v3610_v56 }
  0x93   : > { %738 = vmatmul.bf16.gmra.mxu3 %v3614_v60 }
  0xa0   : > { %596 = vmatmul.bf16.gmra.mxu0 %v3618_v40 }
  0xa1   : > { %645 = vmatmul.bf16.gmra.mxu1 %v3622_v44 }
  0xa2   : > { %694 = vmatmul.bf16.gmra.mxu2 %v3618_v40 }
  0xa3   : > { %743 = vmatmul.bf16.gmra.mxu3 %v3622_v44 }
  0xad   : > { %v562_v48 = vpop.f32.mrf.mxu0 }
  0xae   : > { %v611_v49 = vpop.f32.mrf.mxu1 }
  0xaf   : > { %v612_v54 = vadd.f32 %v611_v49, %v562_v48 }
  0xb5   : > { %v660_v50 = vpop.f32.mrf.mxu2  ;;  %v564_v52 = vpop.f32.mrf.mxu0 }
  0xb6   : > { %v709_v51 = vpop.f32.mrf.mxu3  ;;  %v613_v53 = vpop.f32.mrf.mxu1 }
  0xb7   : > { %v614_v55 = vadd.f32 %v613_v53, %v564_v52  ;;  %v710_v60 = vadd.f32 %v709_v51, %v660_v50 }
  0xb9   : > { %v749_v56 = vpack.c.bf16 %v614_v55, %v612_v54 }
  0xbb   : > { %965 = vmatmul.bf16.vlgmr.msrb.gmra.mxu0 %v749_v56  ;;  %1063 = vmatmul.bf16.vlgmr.msrb.gmra.mxu2 %v749_v56 }
  0xbd   : > { %v662_v57 = vpop.f32.mrf.mxu2  ;;  %v567_v59 = vpop.f32.mrf.mxu0 }
  0xbe   : > { %v711_v58 = vpop.f32.mrf.mxu3  ;;  %v616_v62 = vpop.f32.mrf.mxu1 }
  0xbf   : > { %v712_v61 = vadd.f32 %v711_v58, %v662_v57  ;;  %v617_v4 = vadd.f32 %v616_v62, %v567_v59 }
  0xc1   : > { %v750_v63 = vpack.c.bf16 %v712_v61, %v710_v60 }
  0xc3   : > { %1014 = vmatmul.bf16.vlgmr.msrb.gmra.mxu1 %v750_v63  ;;  %1112 = vmatmul.bf16.vlgmr.msrb.gmra.mxu3 %v750_v63 }
  0xc5   : > { %v665_v0 = vpop.f32.mrf.mxu2  ;;  %v569_v2 = vpop.f32.mrf.mxu0 }
  0xc6   : > { %v714_v1 = vpop.f32.mrf.mxu3  ;;  %v618_v3 = vpop.f32.mrf.mxu1 }
  0xc7   : > { %v619_v5 = vadd.f32 %v618_v3, %v569_v2  ;;  %v715_v10 = vadd.f32 %v714_v1, %v665_v0  ;;  %v3937_v0 = vld [vmem:[%s6799_s4 + $0x70] sm:$0xf]  ;;  %v4394_v1 = vld [vmem:[%s6799_s4 + $0x74] sm:$0xf0]  ;;  %v4393_v2 = vld [vmem:[%s6799_s4 + $0x74] sm:$0xf] }
  0xc9   : > { %v751_v6 = vpack.c.bf16 %v619_v5, %v617_v4  ;;  %v3938_v5 = vor.u32 %v4394_v1, %v3937_v0 }
  0xcb   : > { %970 = vmatmul.bf16.gmra.mxu0 %v751_v6  ;;  %1068 = vmatmul.bf16.gmra.mxu2 %v751_v6  ;;  %v3939_v6 = vld [vmem:[%s6799_s4 + $0x78] sm:$0xf0] }
  0xcc   : > { %1393 = vmatpush.bf16.msra.mxu0 %v3938_v5  ;;  %v4403_v5 = vld [vmem:[%s6799_s4 + $0xc4] sm:$0xf] }
  0xcd   : > { %v667_v7 = vpop.f32.mrf.mxu2  ;;  %v572_v9 = vpop.f32.mrf.mxu0 }
  0xce   : > { %v716_v8 = vpop.f32.mrf.mxu3  ;;  %v621_v12 = vpop.f32.mrf.mxu1 }
  0xcf   : > { %v717_v11 = vadd.f32 %v716_v8, %v667_v7  ;;  %v622_v18 = vadd.f32 %v621_v12, %v572_v9  ;;  %v3929_v12 = vld [vmem:[%s6799_s4 + $0x60] sm:$0xf] }
  0xd1   : > { %v752_v13 = vpack.c.bf16 %v717_v11, %v715_v10  ;;  %v3942_v10 = vor.u32 %v4393_v2, %v3939_v6 }
  0xd3   : > { %1019 = vmatmul.bf16.gmra.mxu1 %v752_v13  ;;  %1117 = vmatmul.bf16.gmra.mxu3 %v752_v13  ;;  %v4392_v13 = vld [vmem:[%s6799_s4 + $0x64] sm:$0xf0] }
  0xd4   : > { %1491 = vmatpush.bf16.msra.mxu2 %v3942_v10  ;;  %v3897_v10 = vld [vmem:[%s6799_s4 + $0x20] sm:$0xf] }
  0xd5   : > { %v670_v14 = vpop.f32.mrf.mxu2  ;;  %v574_v16 = vpop.f32.mrf.mxu0 }
  0xd6   : > { %v719_v15 = vpop.f32.mrf.mxu3  ;;  %v623_v17 = vpop.f32.mrf.mxu1 }
  0xd7   : > { %v624_v19 = vadd.f32 %v623_v17, %v574_v16  ;;  %v720_v24 = vadd.f32 %v719_v15, %v670_v14  ;;  %v4391_v14 = vld [vmem:[%s6799_s4 + $0x64] sm:$0xf]  ;;  %v3930_v15 = vor.u32 %v4392_v13, %v3929_v12  ;;  %v3931_v16 = vld [vmem:[%s6799_s4 + $0x68] sm:$0xf0] }
  0xd8   : > { %v3934_v17 = vor.u32 %v4391_v14, %v3931_v16  ;;  %v4383_v12 = vld [vmem:[%s6799_s4 + $0x24] sm:$0xf]  ;;  %v3899_v14 = vld [vmem:[%s6799_s4 + $0x28] sm:$0xf0]  ;;  %v3969_v16 = vld [vmem:[%s6799_s4 + $0xb0] sm:$0xf] }
  0xd9   : > { %v753_v20 = vpack.c.bf16 %v624_v19, %v622_v18  ;;  %v4001_v18 = vld [vmem:[%s6799_s4 + $0xf0] sm:$0xf]  ;;  %v4410_v19 = vld [vmem:[%s6799_s4 + $0xf4] sm:$0xf0]  ;;  %1394 = vmatpush.bf16.msra.mxu0 %v3930_v15  ;;  %v3902_v15 = vor.u32 %v4383_v12, %v3899_v14 }
  0xda   : > { %1492 = vmatpush.bf16.msra.mxu2 %v3934_v17  ;;  %v4402_v17 = vld [vmem:[%s6799_s4 + $0xb4] sm:$0xf0] }
  0xdb   : > { %975 = vmatmul.bf16.gmra.mxu0 %v753_v20  ;;  %1073 = vmatmul.bf16.gmra.mxu2 %v753_v20  ;;  %v4409_v20 = vld [vmem:[%s6799_s4 + $0xf4] sm:$0xf] }
  0xdd   : > { %v672_v21 = vpop.f32.mrf.mxu2  ;;  %v577_v23 = vpop.f32.mrf.mxu0 }
  0xde   : > { %v721_v22 = vpop.f32.mrf.mxu3  ;;  %v626_v26 = vpop.f32.mrf.mxu1 }
  0xdf   : > { %v722_v25 = vadd.f32 %v721_v22, %v672_v21  ;;  %v627_v32 = vadd.f32 %v626_v26, %v577_v23  ;;  %v4002_v21 = vor.u32 %v4410_v19, %v4001_v18  ;;  %v4003_v22 = vld [vmem:[%s6799_s4 + $0xf8] sm:$0xf0]  ;;  %v3921_v23 = vld [vmem:[%s6799_s4 + $0x50] sm:$0xf]  ;;  %v4401_v18 = vld [vmem:[%s6799_s4 + $0xb4] sm:$0xf]  ;;  %v3970_v19 = vor.u32 %v4402_v17, %v3969_v16 }
  0xe0   : > { %v4006_v26 = vor.u32 %v4409_v20, %v4003_v22  ;;  %v3971_v20 = vld [vmem:[%s6799_s4 + $0xb8] sm:$0xf0] }
  0xe1   : > { %v754_v27 = vpack.c.bf16 %v722_v25, %v720_v24  ;;  %v4390_v24 = vld [vmem:[%s6799_s4 + $0x54] sm:$0xf0]  ;;  %1442 = vmatpush.bf16.msra.mxu1 %v4002_v21  ;;  %v3974_v22 = vor.u32 %v4401_v18, %v3971_v20 }
  0xe2   : > { %1540 = vmatpush.bf16.msra.mxu3 %v4006_v26 }
  0xe3   : > { %1024 = vmatmul.bf16.gmra.mxu1 %v754_v27  ;;  %1122 = vmatmul.bf16.gmra.mxu3 %v754_v27  ;;  %v3922_v27 = vor.u32 %v4390_v24, %v3921_v23  ;;  %v3889_v23 = vld [vmem:[%s6799_s4 + $0x10] sm:$0xf]  ;;  %v4382_v24 = vld [vmem:[%s6799_s4 + $0x14] sm:$0xf0] }
  0xe5   : > { %v675_v28 = vpop.f32.mrf.mxu2  ;;  %v579_v30 = vpop.f32.mrf.mxu0  ;;  %1395 = vmatpush.bf16.msra.mxu0 %v3922_v27 }
  0xe6   : > { %v724_v29 = vpop.f32.mrf.mxu3  ;;  %v628_v31 = vpop.f32.mrf.mxu1 }
  0xe7   : > { %v629_v33 = vadd.f32 %v628_v31, %v579_v30  ;;  %v725_v38 = vadd.f32 %v724_v29, %v675_v28  ;;  %v4389_v28 = vld [vmem:[%s6799_s4 + $0x54] sm:$0xf]  ;;  %v3923_v29 = vld [vmem:[%s6799_s4 + $0x58] sm:$0xf0] }
  0xe9   : > { %v755_v34 = vpack.c.bf16 %v629_v33, %v627_v32  ;;  %v3926_v32 = vor.u32 %v4389_v28, %v3923_v29  ;;  %v3890_v28 = vor.u32 %v4382_v24, %v3889_v23  ;;  %v3891_v29 = vld [vmem:[%s6799_s4 + $0x18] sm:$0xf0] }
  0xeb   : > { %980 = vmatmul.bf16.gmra.mxu0 %v755_v34  ;;  %1078 = vmatmul.bf16.gmra.mxu2 %v755_v34  ;;  %v3993_v34 = vld [vmem:[%s6799_s4 + $0xe0] sm:$0xf] }
  0xec   : > { %1493 = vmatpush.bf16.msra.mxu2 %v3926_v32  ;;  %v3961_v32 = vld [vmem:[%s6799_s4 + $0xa0] sm:$0xf] }
  0xed   : > { %v677_v35 = vpop.f32.mrf.mxu2  ;;  %v582_v37 = vpop.f32.mrf.mxu0 }
  0xee   : > { %v726_v36 = vpop.f32.mrf.mxu3  ;;  %v631_v40 = vpop.f32.mrf.mxu1 }
  0xef   : > { %v727_v39 = vadd.f32 %v726_v36, %v677_v35  ;;  %v632_v46 = vadd.f32 %v631_v40, %v582_v37  ;;  %v4408_v35 = vld [vmem:[%s6799_s4 + $0xe4] sm:$0xf0]  ;;  %v4407_v36 = vld [vmem:[%s6799_s4 + $0xe4] sm:$0xf]  ;;  %v3995_v40 = vld [vmem:[%s6799_s4 + $0xe8] sm:$0xf0] }
  0xf1   : > { %v756_v41 = vpack.c.bf16 %v727_v39, %v725_v38  ;;  %v3994_v39 = vor.u32 %v4408_v35, %v3993_v34  ;;  %v4399_v34 = vld [vmem:[%s6799_s4 + $0xa4] sm:$0xf] }
  0xf3   : > { %1029 = vmatmul.bf16.gmra.mxu1 %v756_v41  ;;  %1127 = vmatmul.bf16.gmra.mxu3 %v756_v41  ;;  %v3998_v41 = vor.u32 %v4407_v36, %v3995_v40  ;;  %v3881_v40 = vld [vmem:[%s6799_s4] sm:$0xf] }
  0xf4   : > { %1443 = vmatpush.bf16.msra.mxu1 %v3994_v39 }
  0xf5   : > { %v680_v42 = vpop.f32.mrf.mxu2  ;;  %v584_v44 = vpop.f32.mrf.mxu0  ;;  %1541 = vmatpush.bf16.msra.mxu3 %v3998_v41  ;;  %v4380_v41 = vld [vmem:[%s6799_s4 + $0x4] sm:$0xf0] }
  0xf6   : > { %v729_v43 = vpop.f32.mrf.mxu3  ;;  %v633_v45 = vpop.f32.mrf.mxu1 }
  0xf7   : > { %v634_v47 = vadd.f32 %v633_v45, %v584_v44  ;;  %v730_v52 = vadd.f32 %v729_v43, %v680_v42  ;;  %v3913_v42 = vld [vmem:[%s6799_s4 + $0x40] sm:$0xf]  ;;  %v4388_v43 = vld [vmem:[%s6799_s4 + $0x44] sm:$0xf0]  ;;  %v4387_v44 = vld [vmem:[%s6799_s4 + $0x44] sm:$0xf] }
  0xf9   : > { %v757_v48 = vpack.c.bf16 %v634_v47, %v632_v46  ;;  %v3914_v46 = vor.u32 %v4388_v43, %v3913_v42  ;;  %v3915_v47 = vld [vmem:[%s6799_s4 + $0x48] sm:$0xf0]  ;;  %v4379_v42 = vld [vmem:[%s6799_s4 + $0x4] sm:$0xf] }
  0xfb   : > { %985 = vmatmul.bf16.gmra.mxu0 %v757_v48  ;;  %1083 = vmatmul.bf16.gmra.mxu2 %v757_v48  ;;  %v3985_v48 = vld [vmem:[%s6799_s4 + $0xd0] sm:$0xf] }
  0xfc   : > { %1396 = vmatpush.bf16.msra.mxu0 %v3914_v46 }
  0xfd   : > { %v682_v49 = vpop.f32.mrf.mxu2  ;;  %v587_v51 = vpop.f32.mrf.mxu0 }
  0xfe   : > { %v731_v50 = vpop.f32.mrf.mxu3  ;;  %v636_v54 = vpop.f32.mrf.mxu1 }
  0xff   : > { %v732_v53 = vadd.f32 %v731_v50, %v682_v49  ;;  %v637_v60 = vadd.f32 %v636_v54, %v587_v51  ;;  %v4406_v49 = vld [vmem:[%s6799_s4 + $0xd4] sm:$0xf0]  ;;  %v3918_v50 = vor.u32 %v4387_v44, %v3915_v47  ;;  %v3882_v44 = vor.u32 %v4380_v41, %v3881_v40  ;;  %v3953_v47 = vld [vmem:[%s6799_s4 + $0x90] sm:$0xf] }
 0x100   : > { %v3986_v51 = vor.u32 %v4406_v49, %v3985_v48  ;;  %v4398_v48 = vld [vmem:[%s6799_s4 + $0x94] sm:$0xf0]  ;;  %v4397_v49 = vld [vmem:[%s6799_s4 + $0x94] sm:$0xf] }
 0x101   : > { %v758_v55 = vpack.c.bf16 %v732_v53, %v730_v52  ;;  %v4405_v52 = vld [vmem:[%s6799_s4 + $0xd4] sm:$0xf]  ;;  %v3987_v53 = vld [vmem:[%s6799_s4 + $0xd8] sm:$0xf0]  ;;  %1494 = vmatpush.bf16.msra.mxu2 %v3918_v50  ;;  %v3954_v50 = vor.u32 %v4398_v48, %v3953_v47 }
 0x102   : > { %v3990_v54 = vor.u32 %v4405_v52, %v3987_v53  ;;  %1444 = vmatpush.bf16.msra.mxu1 %v3986_v51  ;;  %v3955_v51 = vld [vmem:[%s6799_s4 + $0x98] sm:$0xf0] }
 0x103   : > { %1034 = vmatmul.bf16.gmra.mxu1 %v758_v55  ;;  %1132 = vmatmul.bf16.gmra.mxu3 %v758_v55  ;;  %v3958_v53 = vor.u32 %v4397_v49, %v3955_v51 }
 0x104   : > { %1542 = vmatpush.bf16.msra.mxu3 %v3990_v54 }
 0x105   : > { %v685_v56 = vpop.f32.mrf.mxu2  ;;  %v589_v58 = vpop.f32.mrf.mxu0 }
 0x106   : > { %v734_v57 = vpop.f32.mrf.mxu3  ;;  %v638_v59 = vpop.f32.mrf.mxu1 }
 0x107   : > { %v639_v61 = vadd.f32 %v638_v59, %v589_v58  ;;  %v735_v7 = vadd.f32 %v734_v57, %v685_v56  ;;  %v3905_v56 = vld [vmem:[%s6799_s4 + $0x30] sm:$0xf]  ;;  %v4386_v57 = vld [vmem:[%s6799_s4 + $0x34] sm:$0xf0]  ;;  %v4385_v58 = vld [vmem:[%s6799_s4 + $0x34] sm:$0xf] }
 0x109   : > { %v759_v62 = vpack.c.bf16 %v639_v61, %v637_v60  ;;  %v3906_v61 = vor.u32 %v4386_v57, %v3905_v56  ;;  %v3945_v57 = vld [vmem:[%s6799_s4 + $0x80] sm:$0xf] }
 0x10b   : > { %990 = vmatmul.bf16.gmra.mxu0 %v759_v62  ;;  %1088 = vmatmul.bf16.gmra.mxu2 %v759_v62  ;;  %v3907_v62 = vld [vmem:[%s6799_s4 + $0x38] sm:$0xf0] }
 0x10c   : > { %v3910_v2 = vor.u32 %v4385_v58, %v3907_v62  ;;  %1397 = vmatpush.bf16.msra.mxu0 %v3906_v61  ;;  %v4396_v58 = vld [vmem:[%s6799_s4 + $0x84] sm:$0xf0]  ;;  %v3947_v61 = vld [vmem:[%s6799_s4 + $0x88] sm:$0xf0] }
 0x10d   : > { %v687_v63 = vpop.f32.mrf.mxu2  ;;  %v592_v4 = vpop.f32.mrf.mxu0 }
 0x10e   : > { %v736_v3 = vpop.f32.mrf.mxu3  ;;  %v641_v9 = vpop.f32.mrf.mxu1  ;;  %1495 = vmatpush.bf16.msra.mxu2 %v3910_v2 }
 0x10f   : > { %v737_v8 = vadd.f32 %v736_v3, %v687_v63  ;;  %v642_v37 = vadd.f32 %v641_v9, %v592_v4  ;;  %v3977_v3 = vld [vmem:[%s6799_s4 + $0xc0] sm:$0xf]  ;;  %v4404_v4 = vld [vmem:[%s6799_s4 + $0xc4] sm:$0xf0] }
 0x110   : > { %v3978_v6 = vor.u32 %v4404_v4, %v3977_v3 }
 0x111   : > { %v760_v11 = vpack.c.bf16 %v737_v8, %v735_v7  ;;  %v3979_v7 = vld [vmem:[%s6799_s4 + $0xc8] sm:$0xf0] }
 0x112   : > { %v3982_v9 = vor.u32 %v4403_v5, %v3979_v7  ;;  %1445 = vmatpush.bf16.msra.mxu1 %v3978_v6  ;;  %1496 = vmatpush.bf16.msra.mxu2 %v3902_v15 }
 0x113   : > { %1039 = vmatmul.bf16.gmra.mxu1 %v760_v11  ;;  %1137 = vmatmul.bf16.gmra.mxu3 %v760_v11  ;;  %v4384_v11 = vld [vmem:[%s6799_s4 + $0x24] sm:$0xf0] }
 0x114   : > { %v3898_v13 = vor.u32 %v4384_v11, %v3897_v10  ;;  %1543 = vmatpush.bf16.msra.mxu3 %v3982_v9 }
 0x115   : > { %v690_v25 = vpop.f32.mrf.mxu2  ;;  %v594_v31 = vpop.f32.mrf.mxu0 }
 0x116   : > { %v739_v30 = vpop.f32.mrf.mxu3  ;;  %v643_v33 = vpop.f32.mrf.mxu1  ;;  %1398 = vmatpush.bf16.msra.mxu0 %v3898_v13  ;;  %1446 = vmatpush.bf16.msra.mxu1 %v3970_v19 }
 0x117   : > { %v644_v38 = vadd.f32 %v643_v33, %v594_v31  ;;  %v740_v63 = vadd.f32 %v739_v30, %v690_v25  ;;  %v4381_v25 = vld [vmem:[%s6799_s4 + $0x14] sm:$0xf]  ;;  %v4400_v33 = vld [vmem:[%s6799_s4 + $0xa4] sm:$0xf0] }
 0x118   : > { %v3894_v31 = vor.u32 %v4381_v25, %v3891_v29  ;;  %1544 = vmatpush.bf16.msra.mxu3 %v3974_v22 }
 0x119   : > { %v761_v45 = vpack.c.bf16 %v644_v38, %v642_v37  ;;  %v3962_v37 = vor.u32 %v4400_v33, %v3961_v32  ;;  %v3963_v38 = vld [vmem:[%s6799_s4 + $0xa8] sm:$0xf0] }
 0x11a   : > { %1399 = vmatpush.bf16.msra.mxu0 %v3890_v28  ;;  %1497 = vmatpush.bf16.msra.mxu2 %v3894_v31  ;;  %v3966_v39 = vor.u32 %v4399_v34, %v3963_v38 }
 0x11b   : > { %995 = vmatmul.bf16.gmra.mxu0 %v761_v45  ;;  %1093 = vmatmul.bf16.gmra.mxu2 %v761_v45  ;;  %v3883_v45 = vld [vmem:[%s6799_s4 + $0x8] sm:$0xf0] }
 0x11c   : > { %1447 = vmatpush.bf16.msra.mxu1 %v3962_v37  ;;  %v3886_v46 = vor.u32 %v4379_v42, %v3883_v45  ;;  %1545 = vmatpush.bf16.msra.mxu3 %v3966_v39 }
 0x11d   : > { %v692_v55 = vpop.f32.mrf.mxu2  ;;  %v597_v60 = vpop.f32.mrf.mxu0 }
 0x11e   : > { %v741_v59 = vpop.f32.mrf.mxu3  ;;  %v646_v1 = vpop.f32.mrf.mxu1  ;;  %1400 = vmatpush.bf16.msra.mxu0 %v3882_v44  ;;  %1498 = vmatpush.bf16.msra.mxu2 %v3886_v46 }
 0x11f   : > { %v742_v0 = vadd.f32 %v741_v59, %v692_v55  ;;  %v647_v35 = vadd.f32 %v646_v1, %v597_v60  ;;  %v4395_v59 = vld [vmem:[%s6799_s4 + $0x84] sm:$0xf]  ;;  %v3946_v60 = vor.u32 %v4396_v58, %v3945_v57 }
 0x120   : > { %1448 = vmatpush.bf16.msra.mxu1 %v3954_v50  ;;  %1546 = vmatpush.bf16.msra.mxu3 %v3958_v53 }
 0x121   : > { %v762_v8 = vpack.c.bf16 %v742_v0, %v740_v63  ;;  %v3950_v63 = vor.u32 %v4395_v59, %v3947_v61 }
 0x123   : > { %1044 = vmatmul.bf16.gmra.mxu1 %v762_v8  ;;  %1142 = vmatmul.bf16.gmra.mxu3 %v762_v8 }
 0x124   : > { %1449 = vmatpush.bf16.msra.mxu1 %v3946_v60  ;;  %1547 = vmatpush.bf16.msra.mxu3 %v3950_v63 }
 0x125   : > { %v695_v21 = vpop.f32.mrf.mxu2  ;;  %v599_v27 = vpop.f32.mrf.mxu0 }
 0x126   : > { %v744_v26 = vpop.f32.mrf.mxu3  ;;  %v648_v30 = vpop.f32.mrf.mxu1 }
 0x127   : > { %v649_v36 = vadd.f32 %v648_v30, %v599_v27  ;;  %v745_v55 = vadd.f32 %v744_v26, %v695_v21 }
 0x129   : > { %v763_v43 = vpack.c.bf16 %v649_v36, %v647_v35 }
 0x12b   : > { %1000 = vmatmul.bf16.gmra.mxu0 %v763_v43  ;;  %1098 = vmatmul.bf16.gmra.mxu2 %v763_v43 }
 0x12d   : > { %v697_v52 = vpop.f32.mrf.mxu2 }
 0x12e   : > { %v746_v54 = vpop.f32.mrf.mxu3 }
 0x12f   : > { %v747_v56 = vadd.f32 %v746_v54, %v697_v52 }
 0x131   : > { %v764_v62 = vpack.c.bf16 %v747_v56, %v745_v55 }
 0x133   : > { %1049 = vmatmul.bf16.gmra.mxu1 %v764_v62  ;;  %1147 = vmatmul.bf16.gmra.mxu3 %v764_v62 }
 0x138   : > { %v966_v0 = vpop.f32.mrf.mxu0 }
 0x13e   : > { %v1064_v1 = vpop.f32.mrf.mxu2 }
 0x140   : > { %v1015_v2 = vpop.f32.mrf.mxu1  ;;  %v968_v3 = vpop.f32.mrf.mxu0 }
 0x141   : > { %v1016_v5 = vadd.f32 %v1015_v2, %v966_v0 }
 0x143   : > { %v1153_v10 = vmax.f32 %v1016_v5, 0.0 }
 0x146   : > { %v1113_v4 = vpop.f32.mrf.mxu3  ;;  %v1066_v6 = vpop.f32.mrf.mxu2 }
 0x147   : > { %v1114_v12 = vadd.f32 %v1113_v4, %v1064_v1 }
 0x148   : > { %v1017_v7 = vpop.f32.mrf.mxu1  ;;  %v971_v9 = vpop.f32.mrf.mxu0 }
 0x149   : > { %v1018_v8 = vadd.f32 %v1017_v7, %v968_v3  ;;  %v1154_v18 = vmax.f32 %v1114_v12, 0.0 }
 0x14b   : > { %v1155_v11 = vmax.f32 %v1018_v8, 0.0 }
 0x14d   : > { %v1185_v13 = vpack.c.bf16 %v1155_v11, %v1153_v10 }
 0x14e   : > { %v1115_v14 = vpop.f32.mrf.mxu3  ;;  %v1069_v16 = vpop.f32.mrf.mxu2 }
 0x14f   : > { %v1116_v15 = vadd.f32 %v1115_v14, %v1066_v6  ;;  %1401 = vmatmul.bf16.vlgmr.msra.gmra.mxu0 %v1185_v13  ;;  %1499 = vmatmul.bf16.vlgmr.msra.gmra.mxu2 %v1185_v13 }
 0x150   : > { %v1020_v17 = vpop.f32.mrf.mxu1  ;;  %v973_v20 = vpop.f32.mrf.mxu0 }
 0x151   : > { %v1156_v19 = vmax.f32 %v1116_v15, 0.0  ;;  %v1021_v23 = vadd.f32 %v1020_v17, %v971_v9 }
 0x153   : > { %v1186_v21 = vpack.c.bf16 %v1156_v19, %v1154_v18  ;;  %v1157_v28 = vmax.f32 %v1021_v23, 0.0  ;;  %v4195_v23 = vld [vmem:[#allocation4 + $0x78] sm:$0xf0] }
 0x155   : > { %1450 = vmatmul.bf16.vlgmr.msra.gmra.mxu1 %v1186_v21  ;;  %1548 = vmatmul.bf16.vlgmr.msra.gmra.mxu3 %v1186_v21 }
 0x156   : > { %v1118_v22 = vpop.f32.mrf.mxu3  ;;  %v1071_v24 = vpop.f32.mrf.mxu2 }
 0x157   : > { %v1119_v30 = vadd.f32 %v1118_v22, %v1069_v16  ;;  %v4425_v22 = vld [vmem:[#allocation4 + $0x74] sm:$0xf] }
 0x158   : > { %v1022_v25 = vpop.f32.mrf.mxu1  ;;  %v976_v27 = vpop.f32.mrf.mxu0 }
 0x159   : > { %v1023_v26 = vadd.f32 %v1022_v25, %v973_v20  ;;  %v1158_v36 = vmax.f32 %v1119_v30, 0.0  ;;  %v4198_v25 = vor.u32 %v4425_v22, %v4195_v23  ;;  %v4233_v23 = vld [vmem:[#allocation4 + $0xc0] sm:$0xf] }
 0x15b   : > { %v1159_v29 = vmax.f32 %v1023_v26, 0.0  ;;  %2119 = vmatpush.bf16.msrb.mxu2 %v4198_v25  ;;  %v4435_v25 = vld [vmem:[#allocation4 + $0xc4] sm:$0xf] }
 0x15d   : > { %v1187_v31 = vpack.c.bf16 %v1159_v29, %v1157_v28 }
 0x15e   : > { %v1120_v32 = vpop.f32.mrf.mxu3  ;;  %v1074_v34 = vpop.f32.mrf.mxu2 }
 0x15f   : > { %v1121_v33 = vadd.f32 %v1120_v32, %v1071_v24  ;;  %1406 = vmatmul.bf16.gmra.mxu0 %v1187_v31  ;;  %1504 = vmatmul.bf16.gmra.mxu2 %v1187_v31  ;;  %v4193_v32 = vld [vmem:[#allocation4 + $0x70] sm:$0xf] }
 0x160   : > { %v1025_v35 = vpop.f32.mrf.mxu1  ;;  %v978_v38 = vpop.f32.mrf.mxu0 }
 0x161   : > { %v1160_v37 = vmax.f32 %v1121_v33, 0.0  ;;  %v1026_v41 = vadd.f32 %v1025_v35, %v976_v27  ;;  %v4426_v33 = vld [vmem:[#allocation4 + $0x74] sm:$0xf0]  ;;  %v4423_v35 = vld [vmem:[#allocation4 + $0x64] sm:$0xf] }
 0x163   : > { %v1188_v39 = vpack.c.bf16 %v1160_v37, %v1158_v36  ;;  %v1161_v46 = vmax.f32 %v1026_v41, 0.0  ;;  %v4187_v36 = vld [vmem:[#allocation4 + $0x68] sm:$0xf0] }
 0x165   : > { %1455 = vmatmul.bf16.gmra.mxu1 %v1188_v39  ;;  %1553 = vmatmul.bf16.gmra.mxu3 %v1188_v39  ;;  %v4257_v39 = vld [vmem:[#allocation4 + $0xf0] sm:$0xf] }
 0x166   : > { %v1123_v40 = vpop.f32.mrf.mxu3  ;;  %v1076_v42 = vpop.f32.mrf.mxu2 }
 0x167   : > { %v1124_v48 = vadd.f32 %v1123_v40, %v1074_v34  ;;  %v4194_v34 = vor.u32 %v4426_v33, %v4193_v32  ;;  %v4442_v40 = vld [vmem:[#allocation4 + $0xf4] sm:$0xf0]  ;;  %v4161_v33 = vld [vmem:[#allocation4 + $0x30] sm:$0xf] }
 0x168   : > { %v1027_v43 = vpop.f32.mrf.mxu1  ;;  %v981_v45 = vpop.f32.mrf.mxu0  ;;  %v4258_v41 = vor.u32 %v4442_v40, %v4257_v39  ;;  %v4225_v40 = vld [vmem:[#allocation4 + $0xb0] sm:$0xf] }
 0x169   : > { %v1028_v44 = vadd.f32 %v1027_v43, %v978_v38  ;;  %v1162_v54 = vmax.f32 %v1124_v48, 0.0  ;;  %v4190_v38 = vor.u32 %v4423_v35, %v4187_v36  ;;  %1941 = vmatpush.bf16.msrb.mxu0 %v4194_v34  ;;  %v4259_v43 = vld [vmem:[#allocation4 + $0xf8] sm:$0xf0]  ;;  %v4418_v34 = vld [vmem:[#allocation4 + $0x34] sm:$0xf0] }
 0x16a   : > { %2030 = vmatpush.bf16.msrb.mxu1 %v4258_v41  ;;  %v4162_v35 = vor.u32 %v4418_v34, %v4161_v33  ;;  %v4415_v36 = vld [vmem:[#allocation4 + $0x24] sm:$0xf]  ;;  %v4434_v41 = vld [vmem:[#allocation4 + $0xb4] sm:$0xf0] }
 0x16b   : > { %v1163_v47 = vmax.f32 %v1028_v44, 0.0  ;;  %2120 = vmatpush.bf16.msrb.mxu2 %v4190_v38 }
 0x16d   : > { %v1189_v49 = vpack.c.bf16 %v1163_v47, %v1161_v46  ;;  %v4424_v46 = vld [vmem:[#allocation4 + $0x64] sm:$0xf0]  ;;  %v4421_v47 = vld [vmem:[#allocation4 + $0x54] sm:$0xf] }
 0x16e   : > { %v1125_v50 = vpop.f32.mrf.mxu3  ;;  %v1079_v52 = vpop.f32.mrf.mxu2 }
 0x16f   : > { %v1126_v51 = vadd.f32 %v1125_v50, %v1076_v42  ;;  %1411 = vmatmul.bf16.gmra.mxu0 %v1189_v49  ;;  %1509 = vmatmul.bf16.gmra.mxu2 %v1189_v49  ;;  %v4441_v42 = vld [vmem:[#allocation4 + $0xf4] sm:$0xf]  ;;  %v4179_v50 = vld [vmem:[#allocation4 + $0x58] sm:$0xf0] }
 0x170   : > { %v1030_v53 = vpop.f32.mrf.mxu1  ;;  %v983_v56 = vpop.f32.mrf.mxu0  ;;  %v4262_v44 = vor.u32 %v4441_v42, %v4259_v43  ;;  %v4226_v43 = vor.u32 %v4434_v41, %v4225_v40 }
 0x171   : > { %v1164_v55 = vmax.f32 %v1126_v51, 0.0  ;;  %v1031_v59 = vadd.f32 %v1030_v53, %v981_v45  ;;  %v4185_v45 = vld [vmem:[#allocation4 + $0x60] sm:$0xf]  ;;  %v4182_v53 = vor.u32 %v4421_v47, %v4179_v50 }
 0x172   : > { %v4186_v49 = vor.u32 %v4424_v46, %v4185_v45  ;;  %2208 = vmatpush.bf16.msrb.mxu3 %v4262_v44  ;;  %v4433_v44 = vld [vmem:[#allocation4 + $0xb4] sm:$0xf]  ;;  %v4227_v45 = vld [vmem:[#allocation4 + $0xb8] sm:$0xf0]  ;;  %v4153_v47 = vld [vmem:[#allocation4 + $0x20] sm:$0xf] }
 0x173   : > { %v1190_v57 = vpack.c.bf16 %v1164_v55, %v1162_v54  ;;  %v1165_v0 = vmax.f32 %v1031_v59, 0.0  ;;  %v4249_v54 = vld [vmem:[#allocation4 + $0xe0] sm:$0xf]  ;;  %v4440_v55 = vld [vmem:[#allocation4 + $0xe4] sm:$0xf0]  ;;  %2121 = vmatpush.bf16.msrb.mxu2 %v4182_v53  ;;  %v4230_v46 = vor.u32 %v4433_v44, %v4227_v45 }
 0x174   : > { %1942 = vmatpush.bf16.msrb.mxu0 %v4186_v49  ;;  %v4251_v59 = vld [vmem:[#allocation4 + $0xe8] sm:$0xf0]  ;;  %v4413_v49 = vld [vmem:[#allocation4 + $0x14] sm:$0xf]  ;;  %v4217_v53 = vld [vmem:[#allocation4 + $0xa0] sm:$0xf] }
 0x175   : > { %1460 = vmatmul.bf16.gmra.mxu1 %v1190_v57  ;;  %1558 = vmatmul.bf16.gmra.mxu3 %v1190_v57 }
 0x176   : > { %v1128_v58 = vpop.f32.mrf.mxu3  ;;  %v1081_v60 = vpop.f32.mrf.mxu2 }
 0x177   : > { %v1129_v2 = vadd.f32 %v1128_v58, %v1079_v52  ;;  %v4250_v58 = vor.u32 %v4440_v55, %v4249_v54  ;;  %v4432_v54 = vld [vmem:[#allocation4 + $0xa4] sm:$0xf0] }
 0x178   : > { %v1032_v61 = vpop.f32.mrf.mxu1  ;;  %v986_v63 = vpop.f32.mrf.mxu0 }
 0x179   : > { %v1033_v62 = vadd.f32 %v1032_v61, %v983_v56  ;;  %v1166_v8 = vmax.f32 %v1129_v2, 0.0  ;;  %v4439_v56 = vld [vmem:[#allocation4 + $0xe4] sm:$0xf]  ;;  %2031 = vmatpush.bf16.msrb.mxu1 %v4250_v58 }
 0x17a   : > { %v4254_v61 = vor.u32 %v4439_v56, %v4251_v59  ;;  %v4419_v2 = vld [vmem:[#allocation4 + $0x44] sm:$0xf]  ;;  %v4219_v59 = vld [vmem:[#allocation4 + $0xa8] sm:$0xf0] }
 0x17b   : > { %v1167_v1 = vmax.f32 %v1033_v62, 0.0  ;;  %v4177_v62 = vld [vmem:[#allocation4 + $0x50] sm:$0xf]  ;;  %v4431_v58 = vld [vmem:[#allocation4 + $0xa4] sm:$0xf] }
 0x17c   : > { %2209 = vmatpush.bf16.msrb.mxu3 %v4254_v61  ;;  %v4222_v61 = vor.u32 %v4431_v58, %v4219_v59 }
 0x17d   : > { %v1191_v3 = vpack.c.bf16 %v1167_v1, %v1165_v0 }
 0x17e   : > { %v1130_v4 = vpop.f32.mrf.mxu3  ;;  %v1084_v6 = vpop.f32.mrf.mxu2 }
 0x17f   : > { %v1131_v5 = vadd.f32 %v1130_v4, %v1081_v60  ;;  %1416 = vmatmul.bf16.gmra.mxu0 %v1191_v3  ;;  %1514 = vmatmul.bf16.gmra.mxu2 %v1191_v3  ;;  %v4171_v3 = vld [vmem:[#allocation4 + $0x48] sm:$0xf0] }
 0x180   : > { %v1035_v7 = vpop.f32.mrf.mxu1  ;;  %v988_v10 = vpop.f32.mrf.mxu0 }
 0x181   : > { %v1168_v9 = vmax.f32 %v1131_v5, 0.0  ;;  %v1036_v13 = vadd.f32 %v1035_v7, %v986_v63  ;;  %v4422_v63 = vld [vmem:[#allocation4 + $0x54] sm:$0xf0]  ;;  %v4241_v7 = vld [vmem:[#allocation4 + $0xd0] sm:$0xf] }
 0x182   : > { %v4178_v1 = vor.u32 %v4422_v63, %v4177_v62  ;;  %v4145_v63 = vld [vmem:[#allocation4 + $0x10] sm:$0xf] }
 0x183   : > { %v1192_v11 = vpack.c.bf16 %v1168_v9, %v1166_v8  ;;  %v1169_v18 = vmax.f32 %v1036_v13, 0.0  ;;  %v4438_v8 = vld [vmem:[#allocation4 + $0xd4] sm:$0xf0] }
 0x184   : > { %1943 = vmatpush.bf16.msrb.mxu0 %v4178_v1  ;;  %v4242_v9 = vor.u32 %v4438_v8, %v4241_v7  ;;  %v4414_v1 = vld [vmem:[#allocation4 + $0x14] sm:$0xf0]  ;;  %v4209_v8 = vld [vmem:[#allocation4 + $0x90] sm:$0xf] }
 0x185   : > { %1465 = vmatmul.bf16.gmra.mxu1 %v1192_v11  ;;  %1563 = vmatmul.bf16.gmra.mxu3 %v1192_v11  ;;  %v4243_v11 = vld [vmem:[#allocation4 + $0xd8] sm:$0xf0] }
 0x186   : > { %v1133_v12 = vpop.f32.mrf.mxu3  ;;  %v1086_v14 = vpop.f32.mrf.mxu2  ;;  %2032 = vmatpush.bf16.msrb.mxu1 %v4242_v9  ;;  %v4430_v9 = vld [vmem:[#allocation4 + $0x94] sm:$0xf0] }
 0x187   : > { %v1134_v20 = vadd.f32 %v1133_v12, %v1084_v6  ;;  %v4174_v6 = vor.u32 %v4419_v2, %v4171_v3  ;;  %v4146_v3 = vor.u32 %v4414_v1, %v4145_v63 }
 0x188   : > { %v1037_v15 = vpop.f32.mrf.mxu1  ;;  %v991_v17 = vpop.f32.mrf.mxu0 }
 0x189   : > { %v1038_v16 = vadd.f32 %v1037_v15, %v988_v10  ;;  %v1170_v29 = vmax.f32 %v1134_v20, 0.0  ;;  %v4437_v10 = vld [vmem:[#allocation4 + $0xd4] sm:$0xf]  ;;  %v4169_v15 = vld [vmem:[#allocation4 + $0x40] sm:$0xf]  ;;  %2122 = vmatpush.bf16.msrb.mxu2 %v4174_v6 }
 0x18a   : > { %v4163_v20 = vld [vmem:[#allocation4 + $0x38] sm:$0xf0] }
 0x18b   : > { %v1171_v19 = vmax.f32 %v1038_v16, 0.0  ;;  %v4420_v16 = vld [vmem:[#allocation4 + $0x44] sm:$0xf0] }
 0x18d   : > { %v1193_v21 = vpack.c.bf16 %v1171_v19, %v1169_v18  ;;  %v4170_v19 = vor.u32 %v4420_v16, %v4169_v15  ;;  %v4137_v16 = vld [vmem:[#allocation4] sm:$0xf] }
 0x18e   : > { %v1135_v24 = vpop.f32.mrf.mxu3  ;;  %v1089_v27 = vpop.f32.mrf.mxu2 }
 0x18f   : > { %v1136_v26 = vadd.f32 %v1135_v24, %v1086_v14  ;;  %1421 = vmatmul.bf16.gmra.mxu0 %v1193_v21  ;;  %1519 = vmatmul.bf16.gmra.mxu2 %v1193_v21  ;;  %v4246_v14 = vor.u32 %v4437_v10, %v4243_v11  ;;  %v4436_v24 = vld [vmem:[#allocation4 + $0xc4] sm:$0xf0]  ;;  %v4210_v10 = vor.u32 %v4430_v9, %v4209_v8  ;;  %v4429_v11 = vld [vmem:[#allocation4 + $0x94] sm:$0xf] }
 0x190   : > { %v1040_v28 = vpop.f32.mrf.mxu1  ;;  %v993_v31 = vpop.f32.mrf.mxu0  ;;  %1944 = vmatpush.bf16.msrb.mxu0 %v4170_v19 }
 0x191   : > { %v1172_v30 = vmax.f32 %v1136_v26, 0.0  ;;  %v1041_v51 = vadd.f32 %v1040_v28, %v991_v17  ;;  %v4417_v17 = vld [vmem:[#allocation4 + $0x34] sm:$0xf]  ;;  %2210 = vmatpush.bf16.msrb.mxu3 %v4246_v14 }
 0x192   : > { %v4166_v22 = vor.u32 %v4417_v17, %v4163_v20  ;;  %v4412_v17 = vld [vmem:[#allocation4 + $0x4] sm:$0xf0] }
 0x193   : > { %v1194_v37 = vpack.c.bf16 %v1172_v30, %v1170_v29  ;;  %v1173_v4 = vmax.f32 %v1041_v51, 0.0  ;;  %v4235_v29 = vld [vmem:[#allocation4 + $0xc8] sm:$0xf0]  ;;  %v4138_v20 = vor.u32 %v4412_v17, %v4137_v16 }
 0x194   : > { %v4238_v32 = vor.u32 %v4435_v25, %v4235_v29  ;;  %2123 = vmatpush.bf16.msrb.mxu2 %v4166_v22  ;;  %1945 = vmatpush.bf16.msrb.mxu0 %v4162_v35  ;;  %v4201_v22 = vld [vmem:[#allocation4 + $0x80] sm:$0xf] }
 0x195   : > { %1470 = vmatmul.bf16.gmra.mxu1 %v1194_v37  ;;  %1568 = vmatmul.bf16.gmra.mxu3 %v1194_v37  ;;  %v4155_v37 = vld [vmem:[#allocation4 + $0x28] sm:$0xf0] }
 0x196   : > { %v1138_v48 = vpop.f32.mrf.mxu3  ;;  %v1091_v52 = vpop.f32.mrf.mxu2  ;;  %v4158_v39 = vor.u32 %v4415_v36, %v4155_v37  ;;  %2211 = vmatpush.bf16.msrb.mxu3 %v4238_v32 }
 0x197   : > { %v1139_v12 = vadd.f32 %v1138_v48, %v1089_v27  ;;  %v4234_v27 = vor.u32 %v4436_v24, %v4233_v23  ;;  %v4416_v48 = vld [vmem:[#allocation4 + $0x24] sm:$0xf0]  ;;  %v4427_v24 = vld [vmem:[#allocation4 + $0x84] sm:$0xf] }
 0x198   : > { %v1042_v57 = vpop.f32.mrf.mxu1  ;;  %v5271_v0 = vpop.f32.mrf.mxu0  ;;  %2124 = vmatpush.bf16.msrb.mxu2 %v4158_v39  ;;  %v4154_v51 = vor.u32 %v4416_v48, %v4153_v47  ;;  %v4428_v23 = vld [vmem:[#allocation4 + $0x84] sm:$0xf0]  ;;  %v4009_v48 = vld [vmem:[%s6796_s1] sm:$0xf] }
 0x199   : > { %v1043_v60 = vadd.f32 %v1042_v57, %v993_v31  ;;  %v1174_v30 = vmax.f32 %v1139_v12, 0.0  ;;  %2033 = vmatpush.bf16.msrb.mxu1 %v4234_v27  ;;  %v4218_v57 = vor.u32 %v4432_v54, %v4217_v53  ;;  %v4211_v12 = vld [vmem:[#allocation4 + $0x98] sm:$0xf0]  ;;  %v4011_v53 = vld [vmem:[%s6796_s1 + $0x8] sm:$0xf0] }
 0x19a   : > { %2212 = vmatpush.bf16.msrb.mxu3 %v4230_v46  ;;  %1946 = vmatpush.bf16.msrb.mxu0 %v4154_v51  ;;  %v4214_v15 = vor.u32 %v4429_v11, %v4211_v12 }
 0x19b   : > { %v1175_v5 = vmax.f32 %v1043_v60, 0.0 }
 0x19d   : > { %v1195_v13 = vpack.c.bf16 %v1175_v5, %v1173_v4  ;;  %2034 = vmatpush.bf16.msrb.mxu1 %v4226_v43  ;;  %v4411_v4 = vld [vmem:[#allocation4 + $0x4] sm:$0xf]  ;;  %v4139_v5 = vld [vmem:[#allocation4 + $0x8] sm:$0xf0] }
 0x19e   : > { %v1140_v18 = vpop.f32.mrf.mxu3  ;;  %v5273_v28 = vpop.f32.mrf.mxu2  ;;  %2213 = vmatpush.bf16.msrb.mxu3 %v4222_v61  ;;  %1947 = vmatpush.bf16.msrb.mxu0 %v4146_v3  ;;  %v4269_v61 = vld [vmem:[%s6796_s1 + $0x14] sm:$0xf0] }
 0x19f   : > { %v1141_v21 = vadd.f32 %v1140_v18, %v1091_v52  ;;  %1426 = vmatmul.bf16.gmra.mxu0 %v1195_v13  ;;  %1524 = vmatmul.bf16.gmra.mxu2 %v1195_v13  ;;  %v4147_v52 = vld [vmem:[#allocation4 + $0x18] sm:$0xf0] }
 0x1a0   : > { %v1045_v26 = vpop.f32.mrf.mxu1  ;;  %v998_v42 = vpop.f32.mrf.mxu0  ;;  %v4150_v56 = vor.u32 %v4413_v49, %v4147_v52  ;;  %v4267_v49 = vld [vmem:[%s6796_s1 + $0x4] sm:$0xf0]  ;;  %v4266_v52 = vld [vmem:[%s6796_s1 + $0x4] sm:$0xf] }
 0x1a1   : > { %v1176_v31 = vmax.f32 %v1141_v21, 0.0  ;;  %v1046_v55 = vadd.f32 %v1045_v26, %v5271_v0  ;;  %2035 = vmatpush.bf16.msrb.mxu1 %v4218_v57  ;;  %v4142_v0 = vor.u32 %v4411_v4, %v4139_v5  ;;  %v4202_v26 = vor.u32 %v4428_v23, %v4201_v22  ;;  %v4268_v5 = vld [vmem:[%s6796_s1 + $0x14] sm:$0xf]  ;;  %v4270_v22 = vld [vmem:[%s6796_s1 + $0x24] sm:$0xf] }
 0x1a2   : > { %2125 = vmatpush.bf16.msrb.mxu2 %v4150_v56  ;;  %2214 = vmatpush.bf16.msrb.mxu3 %v4214_v15  ;;  %v4014_v54 = vor.u32 %v4266_v52, %v4011_v53  ;;  %v4271_v15 = vld [vmem:[%s6796_s1 + $0x24] sm:$0xf0]  ;;  %v4027_v23 = vld [vmem:[%s6796_s1 + $0x28] sm:$0xf0] }
 0x1a3   : > { %v1196_v38 = vpack.c.bf16 %v1176_v31, %v1174_v30  ;;  %v1177_v6 = vmax.f32 %v1046_v55, 0.0  ;;  %1948 = vmatpush.bf16.msrb.mxu0 %v4138_v20 }
 0x1a5   : > { %1475 = vmatmul.bf16.gmra.mxu1 %v1196_v38  ;;  %1573 = vmatmul.bf16.gmra.mxu3 %v1196_v38 }
 0x1a6   : > { %v1143_v50 = vpop.f32.mrf.mxu3  ;;  %v1096_v2 = vpop.f32.mrf.mxu2  ;;  %2126 = vmatpush.bf16.msrb.mxu2 %v4142_v0  ;;  %2036 = vmatpush.bf16.msrb.mxu1 %v4210_v10 }
 0x1a7   : > { %v1144_v13 = vadd.f32 %v1143_v50, %v5273_v28  ;;  %v4203_v28 = vld [vmem:[#allocation4 + $0x88] sm:$0xf0]  ;;  %v4010_v50 = vor.u32 %v4267_v49, %v4009_v48 }
 0x1a8   : > { %v1047_v60 = vpop.f32.mrf.mxu1  ;;  %v1001_v18 = vpop.f32.mrf.mxu0  ;;  %v4206_v30 = vor.u32 %v4427_v24, %v4203_v28 }
 0x1a9   : > { %v1048_v62 = vadd.f32 %v1047_v60, %v998_v42  ;;  %v1178_v27 = vmax.f32 %v1144_v13, 0.0  ;;  %v4017_v60 = vld [vmem:[%s6796_s1 + $0x10] sm:$0xf] }
 0x1aa   : > { %2037 = vmatpush.bf16.msrb.mxu1 %v4202_v26  ;;  %2215 = vmatpush.bf16.msrb.mxu3 %v4206_v30  ;;  %v4018_v3 = vor.u32 %v4269_v61, %v4017_v60  ;;  %v4030_v26 = vor.u32 %v4270_v22, %v4027_v23  ;;  %v4043_v60 = vld [vmem:[%s6796_s1 + $0x48] sm:$0xf0] }
 0x1ab   : > { %v1179_v7 = vmax.f32 %v1048_v62, 0.0 }
 0x1ad   : > { %v1197_v14 = vpack.c.bf16 %v1179_v7, %v1177_v6  ;;  %v4019_v6 = vld [vmem:[%s6796_s1 + $0x18] sm:$0xf0] }
 0x1ae   : > { %v1145_v19 = vpop.f32.mrf.mxu3  ;;  %v1099_v32 = vpop.f32.mrf.mxu2  ;;  %v4022_v8 = vor.u32 %v4268_v5, %v4019_v6 }
 0x1af   : > { %v1146_v21 = vadd.f32 %v1145_v19, %v1096_v2  ;;  %1431 = vmatmul.bf16.gmra.mxu0 %v1197_v14  ;;  %1529 = vmatmul.bf16.gmra.mxu2 %v1197_v14  ;;  %v4025_v14 = vld [vmem:[%s6796_s1 + $0x20] sm:$0xf] }
 0x1b0   : > { %v1050_v25 = vpop.f32.mrf.mxu1  ;;  %v1003_v35 = vpop.f32.mrf.mxu0  ;;  %v4026_v20 = vor.u32 %v4271_v15, %v4025_v14 }
 0x1b1   : > { %v1180_v29 = vmax.f32 %v1146_v21, 0.0  ;;  %v1051_v34 = vadd.f32 %v1050_v25, %v1001_v18 }
 0x1b3   : > { %v1198_v31 = vpack.c.bf16 %v1180_v29, %v1178_v27  ;;  %v1181_v38 = vmax.f32 %v1051_v34, 0.0 }
 0x1b5   : > { %1480 = vmatmul.bf16.gmra.mxu1 %v1198_v31  ;;  %1578 = vmatmul.bf16.gmra.mxu3 %v1198_v31 }
 0x1b6   : > { %v1148_v33 = vpop.f32.mrf.mxu3  ;;  %v1101_v42 = vpop.f32.mrf.mxu2 }
 0x1b7   : > { %v1149_v40 = vadd.f32 %v1148_v33, %v1099_v32  ;;  %v4033_v32 = vld [vmem:[%s6796_s1 + $0x30] sm:$0xf]  ;;  %v4273_v33 = vld [vmem:[%s6796_s1 + $0x34] sm:$0xf0] }
 0x1b8   : > { %v1052_v36 = vpop.f32.mrf.mxu1 }
 0x1b9   : > { %v1053_v37 = vadd.f32 %v1052_v36, %v1003_v35  ;;  %v1182_v45 = vmax.f32 %v1149_v40, 0.0  ;;  %v4272_v40 = vld [vmem:[%s6796_s1 + $0x34] sm:$0xf] }
 0x1bb   : > { %v1183_v39 = vmax.f32 %v1053_v37, 0.0 }
 0x1bd   : > { %v1199_v41 = vpack.c.bf16 %v1183_v39, %v1181_v38  ;;  %v4034_v38 = vor.u32 %v4273_v33, %v4033_v32  ;;  %v4279_v32 = vld [vmem:[%s6796_s1 + $0x64] sm:$0xf0] }
 0x1be   : > { %v1150_v43 = vpop.f32.mrf.mxu3 }
 0x1bf   : > { %v1151_v44 = vadd.f32 %v1150_v43, %v1101_v42  ;;  %1436 = vmatmul.bf16.gmra.mxu0 %v1199_v41  ;;  %1534 = vmatmul.bf16.gmra.mxu2 %v1199_v41  ;;  %v4035_v41 = vld [vmem:[%s6796_s1 + $0x38] sm:$0xf0] }
 0x1c1   : > { %v1184_v46 = vmax.f32 %v1151_v44, 0.0  ;;  %v4038_v44 = vor.u32 %v4272_v40, %v4035_v41  ;;  %v4278_v41 = vld [vmem:[%s6796_s1 + $0x64] sm:$0xf] }
 0x1c3   : > { %v1200_v47 = vpack.c.bf16 %v1184_v46, %v1182_v45 }
 0x1c5   : > { %1485 = vmatmul.bf16.gmra.mxu1 %v1200_v47  ;;  %1583 = vmatmul.bf16.gmra.mxu3 %v1200_v47 }
 0x1cc   : > { %v1402_v51 = vpop.f32.mrf.mxu0 }
 0x1cf   : > { %2127 = vmatmul.bf16.vlgmr.msrb.gmra.mxu2 %v4010_v50  ;;  %1949 = vmatmul.bf16.vlgmr.msrb.gmra.mxu0 %v4010_v50  ;;  %v4041_v50 = vld [vmem:[%s6796_s1 + $0x40] sm:$0xf] }
 0x1d2   : > { %v1451_v55 = vpop.f32.mrf.mxu1  ;;  %v1500_v56 = vpop.f32.mrf.mxu2 }
 0x1d3   : > { %v5289_v57 = vadd.f32 %v1451_v55, %v1402_v51  ;;  %v4275_v51 = vld [vmem:[%s6796_s1 + $0x44] sm:$0xf0] }
 0x1d4   : > { %v1404_v58 = vpop.f32.mrf.mxu0 }
 0x1d5   : > { %6871 = vst [vmem:[#allocation7_spill] sm:$0xff] %v5289_v57  ;;  %2038 = vmatmul.bf16.vlgmr.msrb.gmra.mxu1 %v4014_v54  ;;  %2216 = vmatmul.bf16.vlgmr.msrb.gmra.mxu3 %v4014_v54 }
 0x1d8   : > { %v1549_v59 = vpop.f32.mrf.mxu3 }
 0x1d9   : > { %v5297_v62 = vadd.f32 %v1549_v59, %v1500_v56  ;;  %v4042_v56 = vor.u32 %v4275_v51, %v4041_v50  ;;  %v4274_v59 = vld [vmem:[%s6796_s1 + $0x44] sm:$0xf] }
 0x1da   : > { %v1453_v63 = vpop.f32.mrf.mxu1  ;;  %v1502_v1 = vpop.f32.mrf.mxu2 }
 0x1db   : > { %6872 = vst [vmem:[#allocation8_spill] sm:$0xff] %v5297_v62  ;;  %v5299_v2 = vadd.f32 %v1453_v63, %v1404_v58 }
 0x1dc   : > { %v1407_v4 = vpop.f32.mrf.mxu0 }
 0x1dd   : > { %6873 = vst [vmem:[#allocation9_spill] sm:$0xff] %v5299_v2 }
 0x1df   : > { %2132 = vmatmul.bf16.gmra.mxu2 %v4018_v3  ;;  %1954 = vmatmul.bf16.gmra.mxu0 %v4018_v3 }
 0x1e0   : > { %v1551_v7 = vpop.f32.mrf.mxu3 }
 0x1e1   : > { %v5307_v0 = vadd.f32 %v1551_v7, %v1502_v1  ;;  %v4046_v1 = vor.u32 %v4274_v59, %v4043_v60 }
 0x1e2   : > { %v1456_v9 = vpop.f32.mrf.mxu1  ;;  %v1505_v10 = vpop.f32.mrf.mxu2 }
 0x1e3   : > { %6874 = vst [vmem:[#allocation10_spill] sm:$0xff] %v5307_v0  ;;  %v5309_v11 = vadd.f32 %v1456_v9, %v1407_v4  ;;  %v4277_v9 = vld [vmem:[%s6796_s1 + $0x54] sm:$0xf0] }
 0x1e4   : > { %v1409_v12 = vpop.f32.mrf.mxu0 }
 0x1e5   : > { %6875 = vst [vmem:[#allocation11_spill] sm:$0xff] %v5309_v11  ;;  %2043 = vmatmul.bf16.gmra.mxu1 %v4022_v8  ;;  %2221 = vmatmul.bf16.gmra.mxu3 %v4022_v8  ;;  %v4049_v8 = vld [vmem:[%s6796_s1 + $0x50] sm:$0xf] }
 0x1e6   : > { %v4050_v15 = vor.u32 %v4277_v9, %v4049_v8 }
 0x1e8   : > { %v1554_v13 = vpop.f32.mrf.mxu3 }
 0x1e9   : > { %v5317_v16 = vadd.f32 %v1554_v13, %v1505_v10 }
 0x1ea   : > { %v1458_v17 = vpop.f32.mrf.mxu1  ;;  %v1507_v18 = vpop.f32.mrf.mxu2 }
 0x1eb   : > { %6876 = vst [vmem:[#allocation12_spill] sm:$0xff] %v5317_v16  ;;  %v5319_v19 = vadd.f32 %v1458_v17, %v1409_v12 }
 0x1ec   : > { %v1412_v21 = vpop.f32.mrf.mxu0 }
 0x1ed   : > { %6877 = vst [vmem:[#allocation13_spill] sm:$0xff] %v5319_v19 }
 0x1ef   : > { %2137 = vmatmul.bf16.gmra.mxu2 %v4026_v20  ;;  %1959 = vmatmul.bf16.gmra.mxu0 %v4026_v20  ;;  %v4051_v20 = vld [vmem:[%s6796_s1 + $0x58] sm:$0xf0] }
 0x1f0   : > { %v1556_v24 = vpop.f32.mrf.mxu3 }
 0x1f1   : > { %v5327_v25 = vadd.f32 %v1556_v24, %v1507_v18  ;;  %v4276_v18 = vld [vmem:[%s6796_s1 + $0x54] sm:$0xf] }
 0x1f2   : > { %v1461_v28 = vpop.f32.mrf.mxu1  ;;  %v1510_v27 = vpop.f32.mrf.mxu2  ;;  %v4054_v23 = vor.u32 %v4276_v18, %v4051_v20  ;;  %v4073_v20 = vld [vmem:[%s6796_s1 + $0x80] sm:$0xf] }
 0x1f3   : > { %6878 = vst [vmem:[#allocation14_spill] sm:$0xff] %v5327_v25  ;;  %v5329_v29 = vadd.f32 %v1461_v28, %v1412_v21 }
 0x1f4   : > { %v1414_v30 = vpop.f32.mrf.mxu0 }
 0x1f5   : > { %6879 = vst [vmem:[#allocation15_spill] sm:$0xff] %v5329_v29  ;;  %2048 = vmatmul.bf16.gmra.mxu1 %v4030_v26  ;;  %2226 = vmatmul.bf16.gmra.mxu3 %v4030_v26 }
 0x1f8   : > { %v1559_v31 = vpop.f32.mrf.mxu3 }
 0x1f9   : > { %v5337_v34 = vadd.f32 %v1559_v31, %v1510_v27  ;;  %v4057_v31 = vld [vmem:[%s6796_s1 + $0x60] sm:$0xf] }
 0x1fa   : > { %v1463_v35 = vpop.f32.mrf.mxu1  ;;  %v1512_v36 = vpop.f32.mrf.mxu2 }
 0x1fb   : > { %6880 = vst [vmem:[#allocation16_spill] sm:$0xff] %v5337_v34  ;;  %v5339_v37 = vadd.f32 %v1463_v35, %v1414_v30 }
 0x1fc   : > { %v1417_v39 = vpop.f32.mrf.mxu0 }
 0x1fd   : > { %6881 = vst [vmem:[#allocation17_spill] sm:$0xff] %v5339_v37 }
 0x1ff   : > { %2142 = vmatmul.bf16.gmra.mxu2 %v4034_v38  ;;  %1964 = vmatmul.bf16.gmra.mxu0 %v4034_v38 }
 0x200   : > { %v1561_v42 = vpop.f32.mrf.mxu3 }
 0x201   : > { %v5347_v43 = vadd.f32 %v1561_v42, %v1512_v36  ;;  %v4059_v42 = vld [vmem:[%s6796_s1 + $0x68] sm:$0xf0] }
 0x202   : > { %v1466_v45 = vpop.f32.mrf.mxu1  ;;  %v1515_v46 = vpop.f32.mrf.mxu2 }
 0x203   : > { %6882 = vst [vmem:[#allocation18_spill] sm:$0xff] %v5347_v43  ;;  %v5349_v47 = vadd.f32 %v1466_v45, %v1417_v39  ;;  %v4058_v39 = vor.u32 %v4279_v32, %v4057_v31  ;;  %v4282_v32 = vld [vmem:[%s6796_s1 + $0x84] sm:$0xf] }
 0x204   : > { %v1419_v48 = vpop.f32.mrf.mxu0 }
 0x205   : > { %6883 = vst [vmem:[#allocation19_spill] sm:$0xff] %v5349_v47  ;;  %2053 = vmatmul.bf16.gmra.mxu1 %v4038_v44  ;;  %2231 = vmatmul.bf16.gmra.mxu3 %v4038_v44 }
 0x208   : > { %v1564_v49 = vpop.f32.mrf.mxu3 }
 0x209   : > { %v5357_v52 = vadd.f32 %v1564_v49, %v1515_v46  ;;  %v4062_v46 = vor.u32 %v4278_v41, %v4059_v42 }
 0x20a   : > { %v1468_v53 = vpop.f32.mrf.mxu1  ;;  %v1517_v54 = vpop.f32.mrf.mxu2 }
 0x20b   : > { %6884 = vst [vmem:[#allocation20_spill] sm:$0xff] %v5357_v52  ;;  %v5359_v55 = vadd.f32 %v1468_v53, %v1419_v48 }
 0x20c   : > { %v1422_v58 = vpop.f32.mrf.mxu0 }
 0x20d   : > { %6885 = vst [vmem:[#allocation21_spill] sm:$0xff] %v5359_v55  ;;  %v4123_v55 = vld [vmem:[%s6796_s1 + $0xe8] sm:$0xf0] }
 0x20f   : > { %2147 = vmatmul.bf16.gmra.mxu2 %v4042_v56  ;;  %1969 = vmatmul.bf16.gmra.mxu0 %v4042_v56  ;;  %v4281_v56 = vld [vmem:[%s6796_s1 + $0x74] sm:$0xf0] }
 0x210   : > { %v1566_v61 = vpop.f32.mrf.mxu3 }
 0x211   : > { %v5367_v63 = vadd.f32 %v1566_v61, %v1517_v54  ;;  %v4065_v54 = vld [vmem:[%s6796_s1 + $0x70] sm:$0xf] }
 0x212   : > { %v1471_v3 = vpop.f32.mrf.mxu1  ;;  %v1520_v4 = vpop.f32.mrf.mxu2 }
 0x213   : > { %6886 = vst [vmem:[#allocation22_spill] sm:$0xff] %v5367_v63  ;;  %v5369_v5 = vadd.f32 %v1471_v3, %v1422_v58 }
 0x214   : > { %v1424_v6 = vpop.f32.mrf.mxu0 }
 0x215   : > { %6887 = vst [vmem:[#allocation23_spill] sm:$0xff] %v5369_v5  ;;  %2058 = vmatmul.bf16.gmra.mxu1 %v4046_v1  ;;  %2236 = vmatmul.bf16.gmra.mxu3 %v4046_v1  ;;  %v4066_v1 = vor.u32 %v4281_v56, %v4065_v54 }
 0x218   : > { %v1569_v7 = vpop.f32.mrf.mxu3 }
 0x219   : > { %v5377_v10 = vadd.f32 %v1569_v7, %v1520_v4  ;;  %v4280_v4 = vld [vmem:[%s6796_s1 + $0x74] sm:$0xf] }
 0x21a   : > { %v1473_v12 = vpop.f32.mrf.mxu1  ;;  %v1522_v13 = vpop.f32.mrf.mxu2 }
 0x21b   : > { %6888 = vst [vmem:[#allocation24_spill] sm:$0xff] %v5377_v10  ;;  %v5379_v14 = vadd.f32 %v1473_v12, %v1424_v6  ;;  %v4067_v6 = vld [vmem:[%s6796_s1 + $0x78] sm:$0xf0] }
 0x21c   : > { %v1427_v17 = vpop.f32.mrf.mxu0  ;;  %v4070_v9 = vor.u32 %v4280_v4, %v4067_v6  ;;  %v4083_v4 = vld [vmem:[%s6796_s1 + $0x98] sm:$0xf0] }
 0x21d   : > { %6889 = vst [vmem:[#allocation25_spill] sm:$0xff] %v5379_v14 }
 0x21f   : > { %2152 = vmatmul.bf16.gmra.mxu2 %v4050_v15  ;;  %1974 = vmatmul.bf16.gmra.mxu0 %v4050_v15 }
 0x220   : > { %v1571_v21 = vpop.f32.mrf.mxu3 }
 0x221   : > { %v5387_v22 = vadd.f32 %v1571_v21, %v1522_v13  ;;  %v4283_v21 = vld [vmem:[%s6796_s1 + $0x84] sm:$0xf0] }
 0x222   : > { %v1476_v24 = vpop.f32.mrf.mxu1  ;;  %v1525_v26 = vpop.f32.mrf.mxu2 }
 0x223   : > { %6890 = vst [vmem:[#allocation26_spill] sm:$0xff] %v5387_v22  ;;  %v5389_v28 = vadd.f32 %v1476_v24, %v1427_v17 }
 0x224   : > { %v1429_v27 = vpop.f32.mrf.mxu0 }
 0x225   : > { %6891 = vst [vmem:[#allocation27_spill] sm:$0xff] %v5389_v28  ;;  %2063 = vmatmul.bf16.gmra.mxu1 %v4054_v23  ;;  %2241 = vmatmul.bf16.gmra.mxu3 %v4054_v23 }
 0x228   : > { %v1574_v30 = vpop.f32.mrf.mxu3 }
 0x229   : > { %v5397_v33 = vadd.f32 %v1574_v30, %v1525_v26  ;;  %v4074_v30 = vor.u32 %v4283_v21, %v4073_v20  ;;  %v4089_v21 = vld [vmem:[%s6796_s1 + $0xa0] sm:$0xf] }
 0x22a   : > { %v1478_v35 = vpop.f32.mrf.mxu1  ;;  %v1527_v36 = vpop.f32.mrf.mxu2 }
 0x22b   : > { %6892 = vst [vmem:[#allocation28_spill] sm:$0xff] %v5397_v33  ;;  %v5399_v38 = vadd.f32 %v1478_v35, %v1429_v27  ;;  %v4075_v35 = vld [vmem:[%s6796_s1 + $0x88] sm:$0xf0] }
 0x22c   : > { %v1432_v40 = vpop.f32.mrf.mxu0 }
 0x22d   : > { %6893 = vst [vmem:[#allocation29_spill] sm:$0xff] %v5399_v38 }
 0x22f   : > { %2157 = vmatmul.bf16.gmra.mxu2 %v4058_v39  ;;  %1979 = vmatmul.bf16.gmra.mxu0 %v4058_v39 }
 0x230   : > { %v1576_v44 = vpop.f32.mrf.mxu3 }
 0x231   : > { %v5407_v45 = vadd.f32 %v1576_v44, %v1527_v36 }
 0x232   : > { %v1481_v48 = vpop.f32.mrf.mxu1  ;;  %v1530_v49 = vpop.f32.mrf.mxu2 }
 0x233   : > { %6894 = vst [vmem:[#allocation30_spill] sm:$0xff] %v5407_v45  ;;  %v5409_v50 = vadd.f32 %v1481_v48, %v1432_v40  ;;  %v4078_v40 = vor.u32 %v4282_v32, %v4075_v35 }
 0x234   : > { %v1434_v51 = vpop.f32.mrf.mxu0 }
 0x235   : > { %6895 = vst [vmem:[#allocation31_spill] sm:$0xff] %v5409_v50  ;;  %2068 = vmatmul.bf16.gmra.mxu1 %v4062_v46  ;;  %2246 = vmatmul.bf16.gmra.mxu3 %v4062_v46  ;;  %v4296_v50 = vld [vmem:[%s6796_s1 + $0xf4] sm:$0xf] }
 0x238   : > { %v1579_v53 = vpop.f32.mrf.mxu3 }
 0x239   : > { %v5417_v58 = vadd.f32 %v1579_v53, %v1530_v49  ;;  %v4081_v49 = vld [vmem:[%s6796_s1 + $0x90] sm:$0xf] }
 0x23a   : > { %v1483_v59 = vpop.f32.mrf.mxu1  ;;  %v1532_v60 = vpop.f32.mrf.mxu2 }
 0x23b   : > { %6896 = vst [vmem:[#allocation32_spill] sm:$0xff] %v5417_v58  ;;  %v5419_v61 = vadd.f32 %v1483_v59, %v1434_v51  ;;  %v4285_v51 = vld [vmem:[%s6796_s1 + $0x94] sm:$0xf0] }
 0x23c   : > { %v1437_v3 = vpop.f32.mrf.mxu0 }
 0x23d   : > { %6897 = vst [vmem:[#allocation33_spill] sm:$0xff] %v5419_v61 }
 0x23f   : > { %2162 = vmatmul.bf16.gmra.mxu2 %v4066_v1  ;;  %1984 = vmatmul.bf16.gmra.mxu0 %v4066_v1 }
 0x240   : > { %v1581_v7 = vpop.f32.mrf.mxu3 }
 0x241   : > { %v5427_v8 = vadd.f32 %v1581_v7, %v1532_v60  ;;  %v4082_v60 = vor.u32 %v4285_v51, %v4081_v49 }
 0x242   : > { %v1486_v12 = vpop.f32.mrf.mxu1  ;;  %v1535_v13 = vpop.f32.mrf.mxu2 }
 0x243   : > { %6898 = vst [vmem:[#allocation34_spill] sm:$0xff] %v5427_v8  ;;  %v5429_v15 = vadd.f32 %v1486_v12, %v1437_v3  ;;  %v4284_v3 = vld [vmem:[%s6796_s1 + $0x94] sm:$0xf]  ;;  %v4121_v8 = vld [vmem:[%s6796_s1 + $0xe0] sm:$0xf] }
 0x244   : > { %v1439_v17 = vpop.f32.mrf.mxu0 }
 0x245   : > { %6899 = vst [vmem:[#allocation35_spill] sm:$0xff] %v5429_v15  ;;  %2073 = vmatmul.bf16.gmra.mxu1 %v4070_v9  ;;  %2251 = vmatmul.bf16.gmra.mxu3 %v4070_v9  ;;  %v4086_v9 = vor.u32 %v4284_v3, %v4083_v4  ;;  %v4289_v3 = vld [vmem:[%s6796_s1 + $0xb4] sm:$0xf0] }
 0x248   : > { %v1584_v18 = vpop.f32.mrf.mxu3 }
 0x249   : > { %v5437_v23 = vadd.f32 %v1584_v18, %v1535_v13 }
 0x24a   : > { %v1488_v24 = vpop.f32.mrf.mxu1  ;;  %v1537_v26 = vpop.f32.mrf.mxu2 }
 0x24b   : > { %6900 = vst [vmem:[#allocation36_spill] sm:$0xff] %v5437_v23  ;;  %v5439_v27 = vadd.f32 %v1488_v24, %v1439_v17  ;;  %v4287_v24 = vld [vmem:[%s6796_s1 + $0xa4] sm:$0xf0] }
 0x24c   : > { %v1950_v31 = vpop.f32.mrf.mxu0  ;;  %v4090_v35 = vor.u32 %v4287_v24, %v4089_v21  ;;  %v4099_v21 = vld [vmem:[%s6796_s1 + $0xb8] sm:$0xf0] }
 0x24d   : > { %6901 = vst [vmem:[#allocation37_spill] sm:$0xff] %v5439_v27 }
 0x24f   : > { %2167 = vmatmul.bf16.gmra.mxu2 %v4074_v30  ;;  %1989 = vmatmul.bf16.gmra.mxu0 %v4074_v30 }
 0x250   : > { %v1586_v36 = vpop.f32.mrf.mxu3 }
 0x251   : > { %v5447_v39 = vadd.f32 %v1586_v36, %v1537_v26 }
 0x252   : > { %v2039_v41 = vpop.f32.mrf.mxu1  ;;  %v2128_v42 = vpop.f32.mrf.mxu2 }
 0x253   : > { %6902 = vst [vmem:[#allocation38_spill] sm:$0xff] %v5447_v39  ;;  %v5449_v44 = vadd.f32 %v2039_v41, %v1950_v31  ;;  %v4091_v41 = vld [vmem:[%s6796_s1 + $0xa8] sm:$0xf0]  ;;  %v4297_v39 = vld [vmem:[%s6796_s1 + $0xf4] sm:$0xf0] }
 0x254   : > { %v1952_v46 = vpop.f32.mrf.mxu0 }
 0x255   : > { %6903 = vst [vmem:[#allocation39_spill] sm:$0xff] %v5449_v44  ;;  %2078 = vmatmul.bf16.gmra.mxu1 %v4078_v40  ;;  %2256 = vmatmul.bf16.gmra.mxu3 %v4078_v40  ;;  %v4286_v40 = vld [vmem:[%s6796_s1 + $0xa4] sm:$0xf] }
 0x258   : > { %v2217_v48 = vpop.f32.mrf.mxu3 }
 0x259   : > { %v5457_v53 = vadd.f32 %v2217_v48, %v2128_v42  ;;  %v4094_v48 = vor.u32 %v4286_v40, %v4091_v41 }
 0x25a   : > { %v2041_v54 = vpop.f32.mrf.mxu1  ;;  %v2130_v56 = vpop.f32.mrf.mxu2 }
 0x25b   : > { %6904 = vst [vmem:[#allocation40_spill] sm:$0xff] %v5457_v53  ;;  %v5459_v59 = vadd.f32 %v2041_v54, %v1952_v46 }
 0x25c   : > { %v1955_v1 = vpop.f32.mrf.mxu0 }
 0x25d   : > { %6905 = vst [vmem:[#allocation41_spill] sm:$0xff] %v5459_v59 }
 0x25f   : > { %2172 = vmatmul.bf16.gmra.mxu2 %v4082_v60  ;;  %1994 = vmatmul.bf16.gmra.mxu0 %v4082_v60 }
 0x260   : > { %v2219_v6 = vpop.f32.mrf.mxu3 }
 0x261   : > { %v5467_v7 = vadd.f32 %v2219_v6, %v2130_v56 }
 0x262   : > { %v2044_v12 = vpop.f32.mrf.mxu1  ;;  %v2133_v13 = vpop.f32.mrf.mxu2 }
 0x263   : > { %6906 = vst [vmem:[#allocation42_spill] sm:$0xff] %v5467_v7  ;;  %v5469_v17 = vadd.f32 %v2044_v12, %v1955_v1  ;;  %v4097_v1 = vld [vmem:[%s6796_s1 + $0xb0] sm:$0xf] }
 0x264   : > { %v1957_v18 = vpop.f32.mrf.mxu0 }
 0x265   : > { %6907 = vst [vmem:[#allocation43_spill] sm:$0xff] %v5469_v17  ;;  %2083 = vmatmul.bf16.gmra.mxu1 %v4086_v9  ;;  %2261 = vmatmul.bf16.gmra.mxu3 %v4086_v9 }
 0x268   : > { %v2222_v20 = vpop.f32.mrf.mxu3 }
 0x269   : > { %v5477_v26 = vadd.f32 %v2222_v20, %v2133_v13  ;;  %v4098_v13 = vor.u32 %v4289_v3, %v4097_v1  ;;  %v4288_v20 = vld [vmem:[%s6796_s1 + $0xb4] sm:$0xf] }
 0x26a   : > { %v2046_v30 = vpop.f32.mrf.mxu1  ;;  %v2135_v31 = vpop.f32.mrf.mxu2 }
 0x26b   : > { %6908 = vst [vmem:[#allocation44_spill] sm:$0xff] %v5477_v26  ;;  %v5479_v32 = vadd.f32 %v2046_v30, %v1957_v18 }
 0x26c   : > { %v1960_v36 = vpop.f32.mrf.mxu0 }
 0x26d   : > { %6909 = vst [vmem:[#allocation45_spill] sm:$0xff] %v5479_v32 }
 0x26f   : > { %2177 = vmatmul.bf16.gmra.mxu2 %v4090_v35  ;;  %1999 = vmatmul.bf16.gmra.mxu0 %v4090_v35 }
 0x270   : > { %v2224_v42 = vpop.f32.mrf.mxu3 }
 0x271   : > { %v5487_v46 = vadd.f32 %v2224_v42, %v2135_v31  ;;  %v4102_v31 = vor.u32 %v4288_v20, %v4099_v21 }
 0x272   : > { %v2049_v49 = vpop.f32.mrf.mxu1  ;;  %v2138_v51 = vpop.f32.mrf.mxu2 }
 0x273   : > { %6910 = vst [vmem:[#allocation46_spill] sm:$0xff] %v5487_v46  ;;  %v5489_v54 = vadd.f32 %v2049_v49, %v1960_v36  ;;  %v4291_v49 = vld [vmem:[%s6796_s1 + $0xc4] sm:$0xf0] }
 0x274   : > { %v1962_v56 = vpop.f32.mrf.mxu0 }
 0x275   : > { %6911 = vst [vmem:[#allocation47_spill] sm:$0xff] %v5489_v54  ;;  %2088 = vmatmul.bf16.gmra.mxu1 %v4094_v48  ;;  %2266 = vmatmul.bf16.gmra.mxu3 %v4094_v48  ;;  %v4105_v48 = vld [vmem:[%s6796_s1 + $0xc0] sm:$0xf] }
 0x276   : > { %v4106_v3 = vor.u32 %v4291_v49, %v4105_v48 }
 0x278   : > { %v2227_v60 = vpop.f32.mrf.mxu3 }
 0x279   : > { %v5497_v4 = vadd.f32 %v2227_v60, %v2138_v51 }
 0x27a   : > { %v2051_v6 = vpop.f32.mrf.mxu1  ;;  %v2140_v9 = vpop.f32.mrf.mxu2 }
 0x27b   : > { %6912 = vst [vmem:[#allocation48_spill] sm:$0xff] %v5497_v4  ;;  %v5499_v12 = vadd.f32 %v2051_v6, %v1962_v56 }
 0x27c   : > { %v1965_v18 = vpop.f32.mrf.mxu0 }
 0x27d   : > { %6913 = vst [vmem:[#allocation49_spill] sm:$0xff] %v5499_v12 }
 0x27f   : > { %2182 = vmatmul.bf16.gmra.mxu2 %v4098_v13  ;;  %2004 = vmatmul.bf16.gmra.mxu0 %v4098_v13  ;;  %v4107_v13 = vld [vmem:[%s6796_s1 + $0xc8] sm:$0xf0] }
 0x280   : > { %v2229_v24 = vpop.f32.mrf.mxu3 }
 0x281   : > { %v5507_v30 = vadd.f32 %v2229_v24, %v2140_v9  ;;  %v4290_v9 = vld [vmem:[%s6796_s1 + $0xc4] sm:$0xf] }
 0x282   : > { %v2054_v35 = vpop.f32.mrf.mxu1  ;;  %v2143_v36 = vpop.f32.mrf.mxu2  ;;  %v4110_v21 = vor.u32 %v4290_v9, %v4107_v13  ;;  %v4115_v9 = vld [vmem:[%s6796_s1 + $0xd8] sm:$0xf0] }
 0x283   : > { %6914 = vst [vmem:[#allocation50_spill] sm:$0xff] %v5507_v30  ;;  %v5509_v40 = vadd.f32 %v2054_v35, %v1965_v18 }
 0x284   : > { %v1967_v41 = vpop.f32.mrf.mxu0 }
 0x285   : > { %2093 = vmatmul.bf16.gmra.mxu1 %v4102_v31  ;;  %2271 = vmatmul.bf16.gmra.mxu3 %v4102_v31 }
 0x288   : > { %v2232_v42 = vpop.f32.mrf.mxu3 }
 0x289   : > { %v5517_v51 = vadd.f32 %v2232_v42, %v2143_v36  ;;  %v4293_v42 = vld [vmem:[%s6796_s1 + $0xd4] sm:$0xf0] }
 0x28a   : > { %v2056_v56 = vpop.f32.mrf.mxu1  ;;  %v2145_v60 = vpop.f32.mrf.mxu2 }
 0x28b   : > { %v5519_v1 = vadd.f32 %v2056_v56, %v1967_v41  ;;  %v4113_v41 = vld [vmem:[%s6796_s1 + $0xd0] sm:$0xf] }
 0x28c   : > { %v5521_v6 = vpop.f32.mrf.mxu0  ;;  %v4114_v56 = vor.u32 %v4293_v42, %v4113_v41 }
 0x28d   : > { %6915 = vst [vmem:[#allocation51_spill] sm:$0xff] %v5519_v1 }
 0x28f   : > { %2187 = vmatmul.bf16.gmra.mxu2 %v4106_v3  ;;  %2009 = vmatmul.bf16.gmra.mxu0 %v4106_v3  ;;  %v4292_v3 = vld [vmem:[%s6796_s1 + $0xd4] sm:$0xf] }
 0x290   : > { %v2234_v18 = vpop.f32.mrf.mxu3 }
 0x291   : > { %v5529_v20 = vadd.f32 %v2234_v18, %v2145_v60  ;;  %v4118_v18 = vor.u32 %v4292_v3, %v4115_v9 }
 0x292   : > { %v5531_v24 = vpop.f32.mrf.mxu1  ;;  %v5533_v31 = vpop.f32.mrf.mxu2 }
 0x293   : > { %6916 = vst [vmem:[#allocation52_spill] sm:$0xff] %v5529_v20 }
 0x294   : > { %v5535_v35 = vpop.f32.mrf.mxu0 }
 0x295   : > { %2098 = vmatmul.bf16.gmra.mxu1 %v4110_v21  ;;  %2276 = vmatmul.bf16.gmra.mxu3 %v4110_v21 }
 0x298   : > { %v5537_v36 = vpop.f32.mrf.mxu3 }
 0x29a   : > { %v5545_v48 = vpop.f32.mrf.mxu1  ;;  %v5547_v49 = vpop.f32.mrf.mxu2 }
 0x29c   : > { %v5549_v60 = vpop.f32.mrf.mxu0 }
 0x29f   : > { %2192 = vmatmul.bf16.gmra.mxu2 %v4114_v56  ;;  %2014 = vmatmul.bf16.gmra.mxu0 %v4114_v56  ;;  %v4295_v56 = vld [vmem:[%s6796_s1 + $0xe4] sm:$0xf0] }
 0x2a0   : > { %v5557_v13 = vpop.f32.mrf.mxu3  ;;  %v4122_v9 = vor.u32 %v4295_v56, %v4121_v8  ;;  %v4129_v56 = vld [vmem:[%s6796_s1 + $0xf0] sm:$0xf] }
 0x2a2   : > { %v5559_v21 = vpop.f32.mrf.mxu1  ;;  %v5561_v61 = vpop.f32.mrf.mxu2 }
 0x2a4   : > { %v5563_v41 = vpop.f32.mrf.mxu0 }
 0x2a5   : > { %2103 = vmatmul.bf16.gmra.mxu1 %v4118_v18  ;;  %2281 = vmatmul.bf16.gmra.mxu3 %v4118_v18  ;;  %v4294_v18 = vld [vmem:[%s6796_s1 + $0xe4] sm:$0xf] }
 0x2a6   : > { %v4126_v63 = vor.u32 %v4294_v18, %v4123_v55 }
 0x2a8   : > { %v5565_v42 = vpop.f32.mrf.mxu3 }
 0x2aa   : > { %v5573_v28 = vpop.f32.mrf.mxu1  ;;  %v5575_v3 = vpop.f32.mrf.mxu2 }
 0x2ac   : > { %v1980_v33 = vpop.f32.mrf.mxu0 }
 0x2af   : > { %2197 = vmatmul.bf16.gmra.mxu2 %v4122_v9  ;;  %2019 = vmatmul.bf16.gmra.mxu0 %v4122_v9 }
 0x2b0   : > { %v5583_v15 = vpop.f32.mrf.mxu3 }
 0x2b2   : > { %v2069_v23 = vpop.f32.mrf.mxu1  ;;  %v2158_v27 = vpop.f32.mrf.mxu2 }
 0x2b3   : > { %v5585_v29 = vadd.f32 %v2069_v23, %v1980_v33  ;;  %v4130_v33 = vor.u32 %v4297_v39, %v4129_v56 }
 0x2b4   : > { %v1982_v38 = vpop.f32.mrf.mxu0 }
 0x2b5   : > { %6917 = vst [vmem:[#allocation53_spill] sm:$0xff] %v5585_v29  ;;  %2108 = vmatmul.bf16.gmra.mxu1 %v4126_v63  ;;  %2286 = vmatmul.bf16.gmra.mxu3 %v4126_v63  ;;  %v2609_v55 = vmul.f32 %v5585_v29, %v5585_v29 }
 0x2b8   : > { %v2247_v8 = vpop.f32.mrf.mxu3 }
 0x2b9   : > { %v5593_v9 = vadd.f32 %v2247_v8, %v2158_v27  ;;  %v4131_v27 = vld [vmem:[%s6796_s1 + $0xf8] sm:$0xf0] }
 0x2ba   : > { %v2071_v18 = vpop.f32.mrf.mxu1  ;;  %v2160_v45 = vpop.f32.mrf.mxu2  ;;  %v4134_v56 = vor.u32 %v4296_v50, %v4131_v27 }
 0x2bb   : > { %6918 = vst [vmem:[#allocation54_spill] sm:$0xff] %v5593_v9  ;;  %v2610_v63 = vmul.f32 %v5593_v9, %v5593_v9  ;;  %v5605_v8 = vadd.f32 %v2071_v18, %v1982_v38 }
 0x2bc   : > { %v1985_v23 = vpop.f32.mrf.mxu0 }
 0x2bd   : > { %v2685_v34 = vadd.f32 %v2610_v63, %v2609_v55  ;;  %6919 = vst [vmem:[#allocation55_spill] sm:$0xff] %v5605_v8  ;;  %v2611_v55 = vmul.f32 %v5605_v8, %v5605_v8 }
 0x2bf   : > { %2202 = vmatmul.bf16.gmra.mxu2 %v4130_v33  ;;  %2686 = vadd.xlane.f32.xlu2 %v2685_v34 }
 0x2c0   : > { %v2249_v2 = vpop.f32.mrf.mxu3  ;;  %2024 = vmatmul.bf16.gmra.mxu0 %v4130_v33 }
 0x2c1   : > { %v5607_v39 = vadd.f32 %v2249_v2, %v2160_v45 }
 0x2c2   : > { %v2074_v5 = vpop.f32.mrf.mxu1  ;;  %v2163_v58 = vpop.f32.mrf.mxu2 }
 0x2c3   : > { %6920 = vst [vmem:[#allocation56_spill] sm:$0xff] %v5607_v39  ;;  %v2612_v63 = vmul.f32 %v5607_v39, %v5607_v39  ;;  %v5613_v10 = vadd.f32 %v2074_v5, %v1985_v23 }
 0x2c4   : > { %v1987_v0 = vpop.f32.mrf.mxu0 }
 0x2c5   : > { %2113 = vmatmul.bf16.gmra.mxu1 %v4134_v56  ;;  %2291 = vmatmul.bf16.gmra.mxu3 %v4134_v56  ;;  %v2688_v38 = vadd.f32 %v2612_v63, %v2611_v55  ;;  %v2613_v2 = vmul.f32 %v5613_v10, %v5613_v10 }
 0x2c7   : > { %2689 = vadd.xlane.f32.xlu0 %v2688_v38 }
 0x2c8   : > { %v2252_v34 = vpop.f32.mrf.mxu3 }
 0x2c9   : > { %v5615_v18 = vadd.f32 %v2252_v34, %v2163_v58 }
 0x2ca   : > { %v2076_v45 = vpop.f32.mrf.mxu1  ;;  %v2165_v50 = vpop.f32.mrf.mxu2 }
 0x2cb   : > { %v2614_v33 = vmul.f32 %v5615_v18, %v5615_v18  ;;  %v5623_v5 = vadd.f32 %v2076_v45, %v1987_v0 }
 0x2cc   : > { %v5621_v27 = vpop.f32.mrf.mxu0 }
 0x2cd   : > { %6921 = vst [vmem:[#allocation57_spill] sm:$0xff] %v5621_v27  ;;  %v2691_v14 = vadd.f32 %v2614_v33, %v2613_v2  ;;  %v2615_v63 = vmul.f32 %v5623_v5, %v5623_v5 }
 0x2cf   : > { %2692 = vadd.xlane.f32.xlu2 %v2691_v14 }
 0x2d0   : > { %v2254_v23 = vpop.f32.mrf.mxu3 }
 0x2d1   : > { %v5625_v56 = vadd.f32 %v2254_v23, %v2165_v50 }
 0x2d2   : > { %v5627_v55 = vpop.f32.mrf.mxu1  ;;  %v5629_v58 = vpop.f32.mrf.mxu2 }
 0x2d3   : > { %6922 = vst [vmem:[#allocation58_spill] sm:$0xff] %v5627_v55  ;;  %v2616_v38 = vmul.f32 %v5625_v56, %v5625_v56 }
 0x2d4   : > { %6923 = vst [vmem:[#allocation59_spill] sm:$0xff] %v5629_v58  ;;  %v5635_v34 = vpop.f32.mrf.mxu0 }
 0x2d5   : > { %6924 = vst [vmem:[#allocation60_spill] sm:$0xff] %v5635_v34  ;;  %v2694_v37 = vadd.f32 %v2616_v38, %v2615_v63 }
 0x2d7   : > { %2695 = vadd.xlane.f32.xlu1 %v2694_v37 }
 0x2d8   : > { %v5637_v0 = vpop.f32.mrf.mxu3 }
 0x2d9   : > { %6925 = vst [vmem:[#allocation61_spill] sm:$0xff] %v5637_v0 }
 0x2da   : > { %v5639_v14 = vpop.f32.mrf.mxu1  ;;  %v5641_v2 = vpop.f32.mrf.mxu2 }
 0x2db   : > { %6926 = vst [vmem:[#allocation62_spill] sm:$0xff] %v5639_v14 }
 0x2dc   : > { %6927 = vst [vmem:[#allocation63_spill] sm:$0xff] %v5641_v2  ;;  %v5643_v45 = vpop.f32.mrf.mxu0 }
 0x2dd   : > { %6928 = vst [vmem:[#allocation64_spill] sm:$0xff] %v5643_v45 }
 0x2e0   : > { %v5645_v50 = vpop.f32.mrf.mxu3 }
 0x2e1   : > { %6929 = vst [vmem:[#allocation65_spill] sm:$0xff] %v5645_v50 }
 0x2e2   : > { %v5647_v33 = vpop.f32.mrf.mxu1  ;;  %v5649_v23 = vpop.f32.mrf.mxu2 }
 0x2e3   : > { %6930 = vst [vmem:[#allocation66_spill] sm:$0xff] %v5647_v33 }
 0x2e4   : > { %6931 = vst [vmem:[#allocation67_spill] sm:$0xff] %v5649_v23  ;;  %v5651_v57 = vpop.f32.mrf.mxu0 }
 0x2e8   : > { %v5653_v22 = vpop.f32.mrf.mxu3 }
 0x2e9   : > { %6932 = vst [vmem:[#allocation68_spill] sm:$0xff] %v5653_v22 }
 0x2ea   : > { %v5655_v63 = vpop.f32.mrf.mxu1  ;;  %v5657_v37 = vpop.f32.mrf.mxu2 }
 0x2ec   : > { %v5659_v38 = vpop.f32.mrf.mxu0 }
 0x2ed   : > { %6933 = vst [vmem:[#allocation69_spill] sm:$0xff] %v5659_v38 }
 0x2f0   : > { %v5661_v43 = vpop.f32.mrf.mxu3 }
 0x2f2   : > { %v5663_v62 = vpop.f32.mrf.mxu1  ;;  %v5665_v47 = vpop.f32.mrf.mxu2 }
 0x2f3   : > { %6934 = vst [vmem:[#allocation70_spill] sm:$0xff] %v5663_v62 }
 0x2f4   : > { %6935 = vst [vmem:[#allocation71_spill] sm:$0xff] %v5665_v47  ;;  %v5667_v11 = vpop.f32.mrf.mxu0 }
 0x2f8   : > { %v5669_v52 = vpop.f32.mrf.mxu3 }
 0x2f9   : > { %6936 = vst [vmem:[#allocation72_spill] sm:$0xff] %v5669_v52 }
 0x2fa   : > { %v5671_v16 = vpop.f32.mrf.mxu1  ;;  %v5673_v14 = vpop.f32.mrf.mxu2 }
 0x2fc   : > { %v5675_v34 = vpop.f32.mrf.mxu0 }
 0x300   : > { %v5677_v50 = vpop.f32.mrf.mxu3 }
 0x302   : > { %v5679_v2 = vpop.f32.mrf.mxu1  ;;  %v5681_v19 = vpop.f32.mrf.mxu2 }
 0x304   : > { %v5683_v59 = vpop.f32.mrf.mxu0 }
 0x305   : > { %6937 = vst [vmem:[#allocation73_spill] sm:$0xff] %v5683_v59 }
 0x308   : > { %v5685_v25 = vpop.f32.mrf.mxu3 }
 0x30a   : > { %v5687_v7 = vpop.f32.mrf.mxu1  ;;  %v5689_v4 = vpop.f32.mrf.mxu2 }
 0x30b   : > { %6938 = vst [vmem:[#allocation74_spill] sm:$0xff] %v5687_v7 }
 0x30c   : > { %v5691_v54 = vpop.f32.mrf.mxu0 }
 0x310   : > { %v5693_v53 = vpop.f32.mrf.mxu3 }
 0x311   : > { %6939 = vst [vmem:[#allocation75_spill] sm:$0xff] %v5693_v53 }
 0x312   : > { %v5695_v44 = vpop.f32.mrf.mxu1  ;;  %v5697_v26 = vpop.f32.mrf.mxu2 }
 0x314   : > { %v2012_v17 = vpop.f32.mrf.mxu0 }
 0x318   : > { %v5699_v52 = vpop.f32.mrf.mxu3 }
 0x31a   : > { %v2101_v47 = vpop.f32.mrf.mxu1  ;;  %v2190_v62 = vpop.f32.mrf.mxu2 }
 0x31c   : > { %v5701_v38 = vpop.f32.mrf.mxu0 }
 0x320   : > { %v2279_v1 = vpop.f32.mrf.mxu3 }
 0x321   : > { %v5725_v53 = vadd.f32 %v2279_v1, %v2190_v62 }
 0x322   : > { %v5703_v20 = vpop.f32.mrf.mxu1  ;;  %v5705_v0 = vpop.f32.mrf.mxu2 }
 0x323   : > { %6943 = vst [vmem:[#allocation79_spill] sm:$0xff] %v5725_v53 }
 0x324   : > { %v2017_v58 = vpop.f32.mrf.mxu0 }
 0x328   : > { %v5707_v55 = vpop.f32.mrf.mxu3 }
 0x32a   : > { %v2106_v27 = vpop.f32.mrf.mxu1  ;;  %v2195_v22 = vpop.f32.mrf.mxu2 }
 0x32b   : > { %v5709_v23 = vadd.f32 %v2106_v27, %v2017_v58 }
 0x32c   : > { %v2020_v33 = vpop.f32.mrf.mxu0 }
 0x32d   : > { %6940 = vst [vmem:[#allocation76_spill] sm:$0xff] %v5709_v23  ;;  %v2639_v12 = vmul.f32 %v5709_v23, %v5709_v23 }
 0x330   : > { %v2284_v45 = vpop.f32.mrf.mxu3 }
 0x331   : > { %v5711_v32 = vadd.f32 %v2284_v45, %v2195_v22 }
 0x332   : > { %v2109_v9 = vpop.f32.mrf.mxu1  ;;  %v2198_v29 = vpop.f32.mrf.mxu2 }
 0x333   : > { %6941 = vst [vmem:[#allocation77_spill] sm:$0xff] %v5711_v32  ;;  %v2640_v46 = vmul.f32 %v5711_v32, %v5711_v32  ;;  %v5717_v30 = vadd.f32 %v2109_v9, %v2020_v33  ;;  %v2687_v7 = vpop.xlane.xlu2 %2686  ;;  %v5727_v9 = vadd.f32 %v2101_v47, %v2012_v17 }
 0x334   : > { %v2022_v22 = vpop.f32.mrf.mxu0 }
 0x335   : > { %v2730_v39 = vadd.f32 %v2640_v46, %v2639_v12  ;;  %v2641_v27 = vmul.f32 %v5717_v30, %v5717_v30 }
 0x337   : > { %2731 = vadd.xlane.f32.xlu1 %v2730_v39 }
 0x338   : > { %v2287_v8 = vpop.f32.mrf.mxu3 }
 0x339   : > { %v5721_v58 = vadd.f32 %v2287_v8, %v2198_v29  ;;  %v2636_v29 = vmul.f32 %v5725_v53, %v5725_v53 }
 0x33a   : > { %v2111_v45 = vpop.f32.mrf.mxu1  ;;  %v2200_v23 = vpop.f32.mrf.mxu2 }
 0x33b   : > { %6942 = vst [vmem:[#allocation78_spill] sm:$0xff] %v5721_v58  ;;  %v2642_v59 = vmul.f32 %v5721_v58, %v5721_v58  ;;  %v5729_v46 = vadd.f32 %v2111_v45, %v2022_v22  ;;  %v2690_v12 = vpop.xlane.xlu0 %2689  ;;  %v2635_v58 = vmul.f32 %v5727_v9, %v5727_v9 }
 0x33d   : > { %v2733_v32 = vadd.f32 %v2642_v59, %v2641_v27  ;;  %v2643_v62 = vmul.f32 %v5729_v46, %v5729_v46  ;;  %v5739_v59 = vmax.f32 %v2690_v12, 1e-12  ;;  %v2025_v1 = vpop.f32.mrf.mxu0  ;;  %v2724_v45 = vadd.f32 %v2636_v29, %v2635_v58 }
 0x33e   : > { %v5757_v12 = vadd.f32 %v5573_v28, %v5563_v41 }
 0x33f   : > { %2734 = vadd.xlane.f32.xlu2 %v2733_v32  ;;  %v5745_v32 = vadd.f32 %v5583_v15, %v5575_v3  ;;  %v5760_v15 = vmax.f32 %v2687_v7, 1e-12  ;;  %v5765_v3 = vadd.f32 %v5545_v48, %v5535_v35  ;;  %vm2913_vm7 = vweird.f32 %v5739_v59 }
 0x340   : > { %v2289_v39 = vpop.f32.mrf.mxu3  ;;  %v2607_v7 = vmul.f32 %v5757_v12, %v5757_v12 }
 0x341   : > { %v5733_v8 = vadd.f32 %v2289_v39, %v2200_v23  ;;  %v5753_v39 = vadd.f32 %v5557_v13, %v5547_v49  ;;  %v2608_v49 = vmul.f32 %v5745_v32, %v5745_v32  ;;  %vm2903_vm10 = vweird.f32 %v5760_v15 }
 0x342   : > { %v2114_v33 = vpop.f32.mrf.mxu1  ;;  %v2693_v17 = vpop.xlane.xlu2 %2692 }
 0x343   : > { %v2644_v47 = vmul.f32 %v5733_v8, %v5733_v8  ;;  %v5747_v23 = vmax.f32 %v2693_v17, 1e-12  ;;  %v5749_v27 = vadd.f32 %v2114_v33, %v2025_v1  ;;  %v2203_v53 = vpop.f32.mrf.mxu2  ;;  %v2604_v41 = vmul.f32 %v5753_v39, %v5753_v39 }
 0x344   : > { %v5790_v1 = vadd.f32 %v5695_v44, %v5691_v54 }
 0x345   : > { %v2736_v22 = vadd.f32 %v2644_v47, %v2643_v62  ;;  %4464 = vrsqrt.f32 %v5747_v23  ;;  %v2645_v28 = vmul.f32 %v5749_v27, %v5749_v27  ;;  %v2682_v47 = vadd.f32 %v2608_v49, %v2607_v7 }
 0x346   : > { %4466 = vrsqrt.f32 %v5739_v59  ;;  %v5800_v49 = vadd.f32 %v5679_v2, %v5675_v34  ;;  %v5804_v7 = vadd.f32 %v5685_v25, %v5681_v19  ;;  %v2633_v19 = vmul.f32 %v5790_v1, %v5790_v1 }
 0x347   : > { %2737 = vadd.xlane.f32.xlu1 %v2736_v22  ;;  %2725 = vadd.xlane.f32.xlu2 %v2724_v45  ;;  %4468 = vrsqrt.f32 %v5760_v15  ;;  %v5794_v22 = vadd.f32 %v5699_v52, %v5697_v26  ;;  %vm2923_vm4 = vweird.f32 %v5747_v23 }
 0x348   : > { %v2292_v58 = vpop.f32.mrf.mxu3  ;;  %6945 = vst [vmem:[#allocation81_spill] sm:$0xff] %v5800_v49 }
 0x349   : > { %v5771_v13 = vadd.f32 %v2292_v58, %v2203_v53  ;;  %v2603_v53 = vmul.f32 %v5765_v3, %v5765_v3  ;;  %6944 = vst [vmem:[#allocation80_spill] sm:$0xff] %v5794_v22  ;;  %v2634_v25 = vmul.f32 %v5794_v22, %v5794_v22 }
 0x34a   : > { %v2696_v48 = vpop.xlane.xlu1 %2695  ;;  %v2116_v33 = vpop.f32.mrf.mxu1  ;;  %6946 = vst [vmem:[#allocation82_spill] sm:$0xff] %v5804_v7 }
 0x34b   : > { %v2646_v35 = vmul.f32 %v5771_v13, %v5771_v13  ;;  %v5780_v29 = vpop.eup %4464  ;;  %v5782_v62 = vmax.f32 %v2696_v48, 1e-12  ;;  %v2027_v48 = vpop.f32.mrf.mxu0  ;;  %v2676_v44 = vadd.f32 %v2604_v41, %v2603_v53  ;;  %v2630_v53 = vmul.f32 %v5804_v7, %v5804_v7 }
 0x34c   : > { %v5786_v17 = vpop.eup %4466  ;;  %v2918_v45 = vmul.f32 %v5780_v29, %v5747_v23  ;;  %v5807_v54 = vadd.f32 %v2116_v33, %v2027_v48  ;;  %v2205_v26 = vpop.f32.mrf.mxu2  ;;  %v5826_v33 = vadd.f32 %v5537_v36, %v5533_v31  ;;  %v2721_v7 = vadd.f32 %v2634_v25, %v2633_v19 }
 0x34d   : > { %v2739_v58 = vadd.f32 %v2646_v35, %v2645_v28  ;;  %4470 = vrsqrt.f32 %v5782_v62  ;;  %v2908_v52 = vmul.f32 %v5786_v17, %v5739_v59  ;;  %v5811_v34 = vpop.eup %4468  ;;  %v5822_v35 = vadd.f32 %v5531_v24, %v5521_v6 }
 0x34e   : > { %v2919_v2 = vmul.f32 %v5780_v29, %v2918_v45  ;;  %v5838_v6 = vadd.f32 %v5703_v20, %v5701_v38  ;;  %v5842_v24 = vadd.f32 %v5707_v55, %v5705_v0  ;;  %v2898_v31 = vmul.f32 %v5811_v34, %v5760_v15 }
 0x34f   : > { %2740 = vadd.xlane.f32.xlu0 %v2739_v58  ;;  %2683 = vadd.xlane.f32.xlu1 %v2682_v47  ;;  %v2629_v47 = vmul.f32 %v5800_v49, %v5800_v49  ;;  %v2647_v58 = vmul.f32 %v5807_v54, %v5807_v54  ;;  %v2909_v36 = vmul.f32 %v5786_v17, %v2908_v52  ;;  %vm2924_vm1 = vweird.f32 %v5780_v29 }
 0x350   : > { %2677 = vadd.xlane.f32.xlu2 %v2676_v44  ;;  %v2294_v28 = vpop.f32.mrf.mxu3  ;;  %v2920_v44 = vmul.f32 0.5, %v2919_v2  ;;  %v2601_v22 = vmul.f32 %v5822_v35, %v5822_v35  ;;  %v2602_v20 = vmul.f32 %v5826_v33, %v5826_v33  ;;  %v2637_v55 = vmul.f32 %v5838_v6, %v5838_v6  ;;  %vm2925_vm5 = vmor %vm2923_vm4, %vm2924_vm1 }
 0x351   : > { %v5818_v41 = vadd.f32 %v2294_v28, %v2205_v26  ;;  %v2715_v49 = vadd.f32 %v2630_v53, %v2629_v47  ;;  %v2638_v0 = vmul.f32 %v5842_v24, %v5842_v24  ;;  %v2899_v52 = vmul.f32 %v5811_v34, %v2898_v31 }
 0x352   : > { %v2910_v2 = vmul.f32 0.5, %v2909_v36  ;;  %v2921_v19 = vsub.f32 1.5, %v2920_v44  ;;  %v2597_v47 = vmul.f32 %v5509_v40, %v5509_v40  ;;  %v2598_v53 = vmul.f32 %v5517_v51, %v5517_v51 }
 0x353   : > { %v2648_v45 = vmul.f32 %v5818_v41, %v5818_v41  ;;  %v4471_v48 = vpop.eup %4470  ;;  %v2900_v36 = vmul.f32 0.5, %v2899_v52  ;;  %vm2933_vm2 = vweird.f32 %v5782_v62  ;;  %vm2914_vm6 = vweird.f32 %v5786_v17 }
 0x354   : > { %v2928_v26 = vmul.f32 %v4471_v48, %v5782_v62  ;;  %vm2934_vm0 = vweird.f32 %v4471_v48  ;;  %v2911_v44 = vsub.f32 1.5, %v2910_v2  ;;  %vm2915_vm8 = vmor %vm2913_vm7, %vm2914_vm6  ;;  %vm2904_vm9 = vweird.f32 %v5811_v34 }
 0x355   : > { %v2742_v28 = vadd.f32 %v2648_v45, %v2647_v58  ;;  %v2673_v58 = vadd.f32 %v2602_v20, %v2601_v22  ;;  %v5867_v45 = vadd.f32 %v5565_v42, %v5561_v61  ;;  %v5878_v61 = vadd.f32 %v5661_v43, %v5657_v37  ;;  %vm2935_vm3 = vmor %vm2933_vm2, %vm2934_vm0 }
 0x356   : > { %v2929_v38 = vmul.f32 %v4471_v48, %v2928_v26  ;;  %v2727_v26 = vadd.f32 %v2638_v0, %v2637_v55  ;;  %v2667_v42 = vadd.f32 %v2598_v53, %v2597_v47  ;;  %v5891_v43 = vadd.f32 %v5655_v63, %v5651_v57  ;;  %v6951_v55 = vld [vmem:[#allocation75_spill] sm:$0xff]  ;;  %vm2905_vm11 = vmor %vm2903_vm10, %vm2904_vm9  ;;  %v6955_v47 = vld [vmem:[#allocation56_spill] sm:$0xff] }
 0x357   : > { %2743 = vadd.xlane.f32.xlu0 %v2742_v28  ;;  %2722 = vadd.xlane.f32.xlu1 %v2721_v7  ;;  %v5863_v7 = vadd.f32 %v5559_v21, %v5549_v60  ;;  %v2922_v60 = vmul.f32 %v5780_v29, %v2921_v19  ;;  %6948 = vst [vmem:[#allocation84_spill] sm:$0xff] %v5878_v61  ;;  %v2901_v23 = vsub.f32 1.5, %v2900_v36  ;;  %v6953_v19 = vld [vmem:[#allocation74_spill] sm:$0xff] }
 0x358   : > { %2716 = vadd.xlane.f32.xlu2 %v2715_v49  ;;  %v2930_v25 = vmul.f32 0.5, %v2929_v38  ;;  %v5871_v49 = vadd.f32 %v5677_v50, %v5673_v14  ;;  %v5882_v21 = vadd.f32 %v5671_v16, %v5667_v11  ;;  %v2606_v62 = vmul.f32 %v5867_v45, %v5867_v45  ;;  %6950 = vst [vmem:[#allocation86_spill] sm:$0xff] %v5891_v43 }
 0x359   : > { %v2605_v50 = vmul.f32 %v5863_v7, %v5863_v7  ;;  %v2912_v28 = vmul.f32 %v5786_v17, %v2911_v44  ;;  %v5913_v0 = vadd.f32 %v6951_v55, %v5689_v4  ;;  %v2902_v59 = vmul.f32 %v5811_v34, %v2901_v23  ;;  %v6954_v4 = vld [vmem:[#allocation55_spill] sm:$0xff]  ;;  %v6957_v44 = vld [vmem:[#allocation46_spill] sm:$0xff]  ;;  %v6972_v55 = vld [vmem:[#allocation61_spill] sm:$0xff] }
 0x35a   : > { %v2931_v31 = vsub.f32 1.5, %v2930_v25  ;;  %6947 = vst [vmem:[#allocation83_spill] sm:$0xff] %v5871_v49  ;;  %v2628_v37 = vmul.f32 %v5871_v49, %v5871_v49  ;;  %v2627_v57 = vmul.f32 %v5882_v21, %v5882_v21  ;;  %v2592_v15 = vmul.f32 %v6957_v44, %v6957_v44 }
 0x35b   : > { %6949 = vst [vmem:[#allocation85_spill] sm:$0xff] %v5882_v21  ;;  %v2916_v52 = vsel %vm2915_vm8, %v5786_v17, %v2912_v28  ;;  %v2906_v17 = vsel %vm2905_vm11, %v5811_v34, %v2902_v59  ;;  %v6960_v34 = vld [vmem:[#allocation54_spill] sm:$0xff]  ;;  %v6966_v28 = vld [vmem:[#allocation68_spill] sm:$0xff] }
 0x35c   : > { %v2932_v22 = vmul.f32 %v4471_v48, %v2931_v31  ;;  %v2712_v38 = vadd.f32 %v2628_v37, %v2627_v57  ;;  %v3123_v25 = vmul.f32 %v2916_v52, %v6954_v4  ;;  %v3124_v53 = vmul.f32 %v2916_v52, %v6955_v47  ;;  %v6956_v31 = vld [vmem:[#allocation50_spill] sm:$0xff] }
 0x35d   : > { %v2596_v36 = vmul.f32 %v6956_v31, %v6956_v31  ;;  %v6963_v37 = vld [vmem:[#allocation66_spill] sm:$0xff] }
 0x35e   : > { %v2936_v14 = vsel %vm2935_vm3, %v4471_v48, %v2932_v22  ;;  %v2926_v48 = vsel %vm2925_vm5, %v5780_v29, %v2922_v60  ;;  %v2623_v29 = vmul.f32 %v5891_v43, %v5891_v43  ;;  %v6958_v22 = vld [vmem:[#allocation49_spill] sm:$0xff] }
 0x35f   : > { %2728 = vadd.xlane.f32.xlu0 %v2727_v26  ;;  %2674 = vadd.xlane.f32.xlu1 %v2673_v58  ;;  %v3127_v11 = vmul.f32 %v2936_v14, %v5623_v5  ;;  %v3128_v16 = vmul.f32 %v2936_v14, %v5625_v56  ;;  %v2624_v5 = vmul.f32 %v5878_v61, %v5878_v61 }
 0x360   : > { %2668 = vadd.xlane.f32.xlu2 %v2667_v42  ;;  %v2679_v56 = vadd.f32 %v2606_v62, %v2605_v50  ;;  %v3125_v63 = vmul.f32 %v2926_v48, %v5613_v10  ;;  %v3126_v20 = vmul.f32 %v2926_v48, %v5615_v18  ;;  %v6952_v10 = vld [vmem:[#allocation73_spill] sm:$0xff]  ;;  %v2632_v58 = vmul.f32 %v5913_v0, %v5913_v0  ;;  %v6965_v48 = vld [vmem:[#allocation67_spill] sm:$0xff] }
 0x361   : > { %3195 = vmatpush.xpose.msra.mxu0 %v3127_v11  ;;  %3260 = vmatpush.xpose.msra.mxu1 %v3128_v16  ;;  %v2706_v2 = vadd.f32 %v2624_v5, %v2623_v29  ;;  %v5920_v18 = vadd.f32 %v6953_v19, %v6952_v10  ;;  %v2595_v60 = vmul.f32 %v6958_v22, %v6958_v22  ;;  %v6959_v42 = vld [vmem:[#allocation53_spill] sm:$0xff]  ;;  %v6962_v16 = vld [vmem:[#allocation64_spill] sm:$0xff]  ;;  %v6971_v29 = vld [vmem:[#allocation59_spill] sm:$0xff] }
 0x362   : > { %v3121_v14 = vmul.f32 %v2906_v17, %v6959_v42  ;;  %v3122_v50 = vmul.f32 %v2906_v17, %v6960_v34  ;;  %v6961_v62 = vld [vmem:[#allocation45_spill] sm:$0xff]  ;;  %v5942_v23 = vadd.f32 %v6963_v37, %v6962_v16  ;;  %v5946_v57 = vadd.f32 %v6966_v28, %v6965_v48  ;;  %v6983_v37 = vld [vmem:[#allocation44_spill] sm:$0xff] }
 0x363   : > { %v2631_v26 = vmul.f32 %v5920_v18, %v5920_v18  ;;  %v2591_v11 = vmul.f32 %v6961_v62, %v6961_v62  ;;  %v5954_v52 = vadd.f32 %v6972_v55, %v6971_v29  ;;  %v2590_v48 = vmul.f32 %v6983_v37, %v6983_v37 }
 0x364   : > { %6964 = vst [vmem:[#allocation75_spill] sm:$0xff] %v5942_v23  ;;  %v2621_v19 = vmul.f32 %v5942_v23, %v5942_v23  ;;  %v2622_v4 = vmul.f32 %v5946_v57, %v5946_v57 }
 0x365   : > { %3196 = vmatpush.xpose.msra.mxu0 %v3125_v63  ;;  %3261 = vmatpush.xpose.msra.mxu1 %v3126_v20  ;;  %6967 = vst [vmem:[#allocation73_spill] sm:$0xff] %v5946_v57  ;;  %v2718_v5 = vadd.f32 %v2632_v58, %v2631_v26  ;;  %v6968_v63 = vld [vmem:[#allocation57_spill] sm:$0xff]  ;;  %v6969_v20 = vld [vmem:[#allocation58_spill] sm:$0xff]  ;;  %v2658_v59 = vadd.f32 %v2592_v15, %v2591_v11  ;;  %v6979_v26 = vld [vmem:[#allocation71_spill] sm:$0xff] }
 0x366   : > { %6973 = vst [vmem:[#allocation55_spill] sm:$0xff] %v5954_v52  ;;  %v2618_v47 = vmul.f32 %v5954_v52, %v5954_v52  ;;  %v6976_v58 = vld [vmem:[#allocation69_spill] sm:$0xff]  ;;  %v2703_v34 = vadd.f32 %v2622_v4, %v2621_v19  ;;  %v6982_v11 = vld [vmem:[#allocation43_spill] sm:$0xff] }
 0x367   : > { %2680 = vadd.xlane.f32.xlu0 %v2679_v56  ;;  %2713 = vadd.xlane.f32.xlu1 %v2712_v38  ;;  %v2664_v56 = vadd.f32 %v2596_v36, %v2595_v60  ;;  %v5950_v38 = vadd.f32 %v6969_v20, %v6968_v63  ;;  %v6977_v36 = vld [vmem:[#allocation70_spill] sm:$0xff]  ;;  %v6980_v60 = vld [vmem:[#allocation72_spill] sm:$0xff]  ;;  %v2589_v16 = vmul.f32 %v6982_v11, %v6982_v11  ;;  %v6986_v19 = vld [vmem:[#allocation47_spill] sm:$0xff] }
 0x368   : > { %2707 = vadd.xlane.f32.xlu2 %v2706_v2  ;;  %v6974_v2 = vld [vmem:[#allocation52_spill] sm:$0xff]  ;;  %v5970_v15 = vadd.f32 %v6977_v36, %v6976_v58  ;;  %v5974_v42 = vadd.f32 %v6980_v60, %v6979_v26  ;;  %v2593_v4 = vmul.f32 %v6986_v19, %v6986_v19  ;;  %v6989_v36 = vld [vmem:[#allocation14_spill] sm:$0xff]  ;;  %v6990_v60 = vld [vmem:[#allocation41_spill] sm:$0xff] }
 0x369   : > { %3197 = vmatpush.xpose.msra.mxu0 %v3123_v25  ;;  %3262 = vmatpush.xpose.msra.mxu1 %v3124_v53  ;;  %6970 = vst [vmem:[#allocation74_spill] sm:$0xff] %v5950_v38  ;;  %v2600_v10 = vmul.f32 %v6974_v2, %v6974_v2  ;;  %v2617_v25 = vmul.f32 %v5950_v38, %v5950_v38  ;;  %v6975_v53 = vld [vmem:[#allocation51_spill] sm:$0xff]  ;;  %v6985_v20 = vld [vmem:[#allocation40_spill] sm:$0xff]  ;;  %v7006_v38 = vld [vmem:[#allocation17_spill] sm:$0xff] }
 0x36a   : > { %v2599_v17 = vmul.f32 %v6975_v53, %v6975_v53  ;;  %6978 = vst [vmem:[#allocation56_spill] sm:$0xff] %v5970_v15  ;;  %v2625_v28 = vmul.f32 %v5970_v15, %v5970_v15  ;;  %v2586_v29 = vmul.f32 %v6985_v20, %v6985_v20  ;;  %v2304_v26 = vmul.f32 %v6989_v36, %v6989_v36  ;;  %v6998_v36 = vld [vmem:[#allocation12_spill] sm:$0xff] }
 0x36b   : > { %6981 = vst [vmem:[#allocation49_spill] sm:$0xff] %v5974_v42  ;;  %v2302_v20 = vmul.f32 %v6998_v36, %v6998_v36 }
 0x36d   : > { %3198 = vmatpush.xpose.msra.mxu0 %v3121_v14  ;;  %3263 = vmatpush.xpose.msra.mxu1 %v3122_v50  ;;  %v2670_v14 = vadd.f32 %v2600_v10, %v2599_v17  ;;  %v2697_v50 = vadd.f32 %v2618_v47, %v2617_v25  ;;  %v6987_v25 = vld [vmem:[#allocation48_spill] sm:$0xff]  ;;  %v6988_v17 = vld [vmem:[#allocation42_spill] sm:$0xff] }
 0x36e   : > { %v2594_v47 = vmul.f32 %v6987_v25, %v6987_v25  ;;  %v2588_v58 = vmul.f32 %v6988_v17, %v6988_v17  ;;  %v7011_v17 = vld [vmem:[#allocation23_spill] sm:$0xff] }
 0x36f   : > { %2719 = vadd.xlane.f32.xlu0 %v2718_v5  ;;  %2665 = vadd.xlane.f32.xlu1 %v2664_v56  ;;  %v2626_v5 = vmul.f32 %v5974_v42, %v5974_v42  ;;  %v6984_v56 = vld [vmem:[#allocation39_spill] sm:$0xff] }
 0x370   : > { %2659 = vadd.xlane.f32.xlu2 %v2658_v59  ;;  %v2585_v63 = vmul.f32 %v6984_v56, %v6984_v56  ;;  %v2655_v59 = vadd.f32 %v2590_v48, %v2589_v16  ;;  %v6992_v16 = vld [vmem:[#allocation63_spill] sm:$0xff]  ;;  %v6993_v48 = vld [vmem:[#allocation65_spill] sm:$0xff]  ;;  %v6999_v56 = vld [vmem:[#allocation20_spill] sm:$0xff] }
 0x371   : > { %v2709_v55 = vadd.f32 %v2626_v5, %v2625_v28  ;;  %v6002_v28 = vadd.f32 %v6993_v48, %v6992_v16  ;;  %v2661_v5 = vadd.f32 %v2594_v47, %v2593_v4  ;;  %v2310_v16 = vmul.f32 %v6999_v56, %v6999_v56  ;;  %v7000_v48 = vld [vmem:[#allocation11_spill] sm:$0xff]  ;;  %v7004_v56 = vld [vmem:[#allocation26_spill] sm:$0xff] }
 0x372   : > { %v2649_v10 = vadd.f32 %v2586_v29, %v2585_v63  ;;  %v2301_v4 = vmul.f32 %v7000_v48, %v7000_v48  ;;  %v2316_v36 = vmul.f32 %v7004_v56, %v7004_v56  ;;  %v7005_v48 = vld [vmem:[#allocation7_spill] sm:$0xff] }
 0x373   : > { %6994 = vst [vmem:[#allocation53_spill] sm:$0xff] %v6002_v28  ;;  %v2297_v52 = vmul.f32 %v7005_v48, %v7005_v48 }
 0x377   : > { %2671 = vadd.xlane.f32.xlu0 %v2670_v14  ;;  %2704 = vadd.xlane.f32.xlu1 %v2703_v34  ;;  %v2587_v14 = vmul.f32 %v6990_v60, %v6990_v60  ;;  %v6991_v34 = vld [vmem:[#allocation13_spill] sm:$0xff] }
 0x378   : > { %2698 = vadd.xlane.f32.xlu2 %v2697_v50  ;;  %v2303_v50 = vmul.f32 %v6991_v34, %v6991_v34  ;;  %v2620_v34 = vmul.f32 %v6002_v28, %v6002_v28  ;;  %v7012_v60 = vld [vmem:[#allocation9_spill] sm:$0xff] }
 0x379   : > { %v2652_v63 = vadd.f32 %v2588_v58, %v2587_v14  ;;  %v7001_v58 = vld [vmem:[#allocation19_spill] sm:$0xff] }
 0x37a   : > { %v2338_v29 = vadd.f32 %v2304_v26, %v2303_v50  ;;  %v2309_v26 = vmul.f32 %v7001_v58, %v7001_v58  ;;  %v2335_v50 = vadd.f32 %v2302_v20, %v2301_v4  ;;  %v7007_v20 = vld [vmem:[#allocation25_spill] sm:$0xff]  ;;  %v7010_v58 = vld [vmem:[#allocation32_spill] sm:$0xff] }
 0x37f   : > { %2710 = vadd.xlane.f32.xlu0 %v2709_v55  ;;  %2656 = vadd.xlane.f32.xlu1 %v2655_v59  ;;  %v6995_v55 = vld [vmem:[#allocation60_spill] sm:$0xff]  ;;  %v6996_v59 = vld [vmem:[#allocation62_spill] sm:$0xff] }
 0x380   : > { %2650 = vadd.xlane.f32.xlu2 %v2649_v10  ;;  %v6006_v10 = vadd.f32 %v6996_v59, %v6995_v55  ;;  %v7003_v55 = vld [vmem:[#allocation18_spill] sm:$0xff] }
 0x381   : > { %v2308_v59 = vmul.f32 %v7003_v55, %v7003_v55  ;;  %v2322_v55 = vmul.f32 %v7010_v58, %v7010_v58 }
 0x382   : > { %6997 = vst [vmem:[#allocation54_spill] sm:$0xff] %v6006_v10  ;;  %v2619_v47 = vmul.f32 %v6006_v10, %v6006_v10 }
 0x384   : > { %v2700_v14 = vadd.f32 %v2620_v34, %v2619_v47  ;;  %v2307_v34 = vmul.f32 %v7006_v38, %v7006_v38  ;;  %v2313_v38 = vmul.f32 %v7011_v17, %v7011_v17  ;;  %v7017_v17 = vld [vmem:[#allocation15_spill] sm:$0xff] }
 0x386   : > { %v2344_v47 = vadd.f32 %v2308_v59, %v2307_v34 }
 0x387   : > { %2662 = vadd.xlane.f32.xlu0 %v2661_v5  ;;  %2653 = vadd.xlane.f32.xlu1 %v2652_v63  ;;  %v2347_v5 = vadd.f32 %v2310_v16, %v2309_v26  ;;  %v7002_v63 = vld [vmem:[#allocation8_spill] sm:$0xff]  ;;  %v2315_v16 = vmul.f32 %v7007_v20, %v7007_v20  ;;  %v7016_v20 = vld [vmem:[#allocation38_spill] sm:$0xff] }
 0x388   : > { %2339 = vadd.xlane.f32.xlu2 %v2338_v29  ;;  %v2298_v29 = vmul.f32 %v7002_v63, %v7002_v63 }
 0x389   : > { %v2356_v26 = vadd.f32 %v2316_v36, %v2315_v16 }
 0x38a   : > { %v2329_v4 = vadd.f32 %v2298_v29, %v2297_v52  ;;  %v2299_v52 = vmul.f32 %v7012_v60, %v7012_v60  ;;  %v7013_v29 = vld [vmem:[#allocation31_spill] sm:$0xff]  ;;  %v7018_v60 = vld [vmem:[#allocation29_spill] sm:$0xff] }
 0x38b   : > { %v2321_v36 = vmul.f32 %v7013_v29, %v7013_v29  ;;  %v7022_v29 = vld [vmem:[#allocation35_spill] sm:$0xff] }
 0x38d   : > { %v2365_v16 = vadd.f32 %v2322_v55, %v2321_v36 }
 0x38f   : > { %2701 = vadd.xlane.f32.xlu0 %v2700_v14  ;;  %2336 = vadd.xlane.f32.xlu1 %v2335_v50  ;;  %v7008_v14 = vld [vmem:[#allocation24_spill] sm:$0xff] }
 0x390   : > { %2348 = vadd.xlane.f32.xlu2 %v2347_v5  ;;  %v2314_v50 = vmul.f32 %v7008_v14, %v7008_v14  ;;  %v7009_v5 = vld [vmem:[#allocation10_spill] sm:$0xff]  ;;  %v2328_v14 = vmul.f32 %v7016_v20, %v7016_v20 }
 0x391   : > { %v2300_v56 = vmul.f32 %v7009_v5, %v7009_v5  ;;  %v2305_v5 = vmul.f32 %v7017_v17, %v7017_v17 }
 0x392   : > { %v2353_v34 = vadd.f32 %v2314_v50, %v2313_v38  ;;  %v7019_v38 = vld [vmem:[#allocation37_spill] sm:$0xff] }
 0x393   : > { %v2332_v59 = vadd.f32 %v2300_v56, %v2299_v52  ;;  %v2319_v56 = vmul.f32 %v7018_v60, %v7018_v60  ;;  %v2327_v55 = vmul.f32 %v7019_v38, %v7019_v38 }
 0x395   : > { %v2374_v36 = vadd.f32 %v2328_v14, %v2327_v55 }
 0x397   : > { %2330 = vadd.xlane.f32.xlu0 %v2329_v4  ;;  %2345 = vadd.xlane.f32.xlu1 %v2344_v47  ;;  %v7014_v4 = vld [vmem:[#allocation16_spill] sm:$0xff] }
 0x398   : > { %2357 = vadd.xlane.f32.xlu2 %v2356_v26  ;;  %v2306_v47 = vmul.f32 %v7014_v4, %v7014_v4  ;;  %v7015_v26 = vld [vmem:[#allocation30_spill] sm:$0xff]  ;;  %v7023_v4 = vld [vmem:[#allocation21_spill] sm:$0xff] }
 0x399   : > { %v2320_v58 = vmul.f32 %v7015_v26, %v7015_v26  ;;  %v2325_v26 = vmul.f32 %v7022_v29, %v7022_v29  ;;  %v2311_v60 = vmul.f32 %v7023_v4, %v7023_v4  ;;  %v7027_v29 = vld [vmem:[#allocation33_spill] sm:$0xff] }
 0x39a   : > { %v2341_v50 = vadd.f32 %v2306_v47, %v2305_v5  ;;  %v7025_v47 = vld [vmem:[#allocation27_spill] sm:$0xff] }
 0x39b   : > { %v2362_v52 = vadd.f32 %v2320_v58, %v2319_v56  ;;  %v7024_v58 = vld [vmem:[#allocation28_spill] sm:$0xff]  ;;  %v2317_v56 = vmul.f32 %v7025_v47, %v7025_v47 }
 0x39c   : > { %v2318_v14 = vmul.f32 %v7024_v58, %v7024_v58 }
 0x39f   : > { %2333 = vadd.xlane.f32.xlu0 %v2332_v59  ;;  %2354 = vadd.xlane.f32.xlu1 %v2353_v34  ;;  %v7020_v59 = vld [vmem:[#allocation36_spill] sm:$0xff] }
 0x3a0   : > { %2366 = vadd.xlane.f32.xlu2 %v2365_v16  ;;  %v2326_v34 = vmul.f32 %v7020_v59, %v7020_v59  ;;  %v7021_v16 = vld [vmem:[#allocation22_spill] sm:$0xff] }
 0x3a1   : > { %v2312_v20 = vmul.f32 %v7021_v16, %v7021_v16 }
 0x3a2   : > { %v2371_v38 = vadd.f32 %v2326_v34, %v2325_v26 }
 0x3a3   : > { %v2350_v17 = vadd.f32 %v2312_v20, %v2311_v60  ;;  %v2323_v60 = vmul.f32 %v7027_v29, %v7027_v29 }
 0x3a7   : > { %2342 = vadd.xlane.f32.xlu0 %v2341_v50  ;;  %2363 = vadd.xlane.f32.xlu1 %v2362_v52  ;;  %v2359_v50 = vadd.f32 %v2318_v14, %v2317_v56  ;;  %v7026_v52 = vld [vmem:[#allocation34_spill] sm:$0xff] }
 0x3a8   : > { %2375 = vadd.xlane.f32.xlu2 %v2374_v36  ;;  %v2324_v36 = vmul.f32 %v7026_v52, %v7026_v52 }
 0x3aa   : > { %v2732_v5 = vpop.xlane.xlu1 %2731 }
 0x3ab   : > { %v6072_v26 = vmax.f32 %v2732_v5, 1e-12 }
 0x3ad   : > { %4472 = vrsqrt.f32 %v6072_v26  ;;  %vm3053_vm1 = vweird.f32 %v6072_v26 }
 0x3af   : > { %2351 = vadd.xlane.f32.xlu0 %v2350_v17  ;;  %2372 = vadd.xlane.f32.xlu1 %v2371_v38  ;;  %v2368_v17 = vadd.f32 %v2324_v36, %v2323_v60 }
 0x3b2   : > { %v2735_v55 = vpop.xlane.xlu2 %2734 }
 0x3b7   : > { %2360 = vadd.xlane.f32.xlu0 %v2359_v50  ;;  %v6079_v50 = vmax.f32 %v2735_v55, 1e-12 }
 0x3b9   : > { %vm3063_vm8 = vweird.f32 %v6079_v50 }
 0x3ba   : > { %v2738_v59 = vpop.xlane.xlu1 %2737  ;;  %v2726_v20 = vpop.xlane.xlu2 %2725 }
 0x3bb   : > { %v6074_v38 = vmax.f32 %v2738_v59, 1e-12  ;;  %v6084_v5 = vmax.f32 %v2726_v20, 1e-12  ;;  %v6086_v59 = vpop.eup %4472 }
 0x3bc   : > { %v3048_v4 = vmul.f32 %v6086_v59, %v6072_v26  ;;  %vm3054_vm5 = vweird.f32 %v6086_v59 }
 0x3bd   : > { %4474 = vrsqrt.f32 %v6074_v38  ;;  %vm3073_vm10 = vweird.f32 %v6074_v38 }
 0x3be   : > { %v3049_v61 = vmul.f32 %v6086_v59, %v3048_v4 }
 0x3bf   : > { %2369 = vadd.xlane.f32.xlu0 %v2368_v17 }
 0x3c2   : > { %v2741_v34 = vpop.xlane.xlu0 %2740  ;;  %v2684_v58 = vpop.xlane.xlu1 %2683 }
 0x3c3   : > { %v6077_v14 = vmax.f32 %v2741_v34, 1e-12  ;;  %v2756_v56 = vmax.f32 %v2684_v58, 1e-12  ;;  %v2678_v36 = vpop.xlane.xlu2 %2677  ;;  %v6088_v60 = vpop.eup %4474 }
 0x3c4   : > { %v3068_v20 = vmul.f32 %v6088_v60, %v6074_v38  ;;  %v6105_v48 = vmax.f32 %v2678_v36, 1e-12  ;;  %vm3074_vm6 = vweird.f32 %v6088_v60 }
 0x3c5   : > { %4476 = vrsqrt.f32 %v6077_v14  ;;  %vm2893_vm13 = vweird.f32 %v2756_v56  ;;  %vm3083_vm3 = vweird.f32 %v6077_v14  ;;  %vm3075_vm11 = vmor %vm3073_vm10, %vm3074_vm6 }
 0x3c6   : > { %4478 = vrsqrt.f32 %v2756_v56  ;;  %v3069_v10 = vmul.f32 %v6088_v60, %v3068_v20 }
 0x3c7   : > { %4480 = vrsqrt.f32 %v6079_v50 }
 0x3c8   : > { %4482 = vrsqrt.f32 %v6084_v5  ;;  %v3070_v20 = vmul.f32 0.5, %v3069_v10 }
 0x3ca   : > { %v2744_v17 = vpop.xlane.xlu0 %2743  ;;  %v2723_v34 = vpop.xlane.xlu1 %2722  ;;  %v3071_v21 = vsub.f32 1.5, %v3070_v20 }
 0x3cb   : > { %v6090_v52 = vpop.eup %4476  ;;  %v6092_v58 = vmax.f32 %v2744_v17, 1e-12  ;;  %v2717_v11 = vpop.xlane.xlu2 %2716  ;;  %v6121_v42 = vmax.f32 %v2723_v34, 1e-12 }
 0x3cc   : > { %v4479_v55 = vpop.eup %4478  ;;  %v3078_v29 = vmul.f32 %v6090_v52, %v6077_v14  ;;  %vm3084_vm14 = vweird.f32 %v6090_v52  ;;  %v3072_v14 = vmul.f32 %v6088_v60, %v3071_v21 }
 0x3cd   : > { %v2888_v47 = vmul.f32 %v4479_v55, %v2756_v56  ;;  %4484 = vrsqrt.f32 %v6092_v58  ;;  %v6100_v16 = vpop.eup %4480  ;;  %vm2894_vm12 = vweird.f32 %v4479_v55  ;;  %vm3093_vm2 = vweird.f32 %v6092_v58  ;;  %vm3085_vm7 = vmor %vm3083_vm3, %vm3084_vm14 }
 0x3ce   : > { %v3079_v17 = vmul.f32 %v6090_v52, %v3078_v29  ;;  %v3058_v28 = vmul.f32 %v6100_v16, %v6079_v50  ;;  %v6110_v57 = vpop.eup %4482  ;;  %4486 = vrsqrt.f32 %v6105_v48  ;;  %vm2895_vm15 = vmor %vm2893_vm13, %vm2894_vm12  ;;  %vm3064_vm9 = vweird.f32 %v6100_v16 }
 0x3cf   : > { %v2889_v63 = vmul.f32 %v4479_v55, %v2888_v47  ;;  %vm3055_vm12 = vmor %vm3053_vm1, %vm3054_vm5  ;;  %vm3033_vm14 = vweird.f32 %v6084_v5  ;;  %vm3023_vm5 = vweird.f32 %v6121_v42 }
 0x3d0   : > { %v3080_v47 = vmul.f32 0.5, %v3079_v17  ;;  %v3059_v25 = vmul.f32 %v6100_v16, %v3058_v28  ;;  %vm3065_vm13 = vmor %vm3063_vm8, %vm3064_vm9 }
 0x3d1   : > { %v2890_v37 = vmul.f32 0.5, %v2889_v63  ;;  %v3028_v63 = vmul.f32 %v6110_v57, %v6084_v5 }
 0x3d2   : > { %v2729_v23 = vpop.xlane.xlu0 %2728  ;;  %v2675_v44 = vpop.xlane.xlu1 %2674  ;;  %v3081_v4 = vsub.f32 1.5, %v3080_v47  ;;  %v3060_v49 = vmul.f32 0.5, %v3059_v25 }
 0x3d3   : > { %v4485_v62 = vpop.eup %4484  ;;  %v6113_v43 = vmax.f32 %v2729_v23, 1e-12  ;;  %v2891_v29 = vsub.f32 1.5, %v2890_v37  ;;  %v3050_v23 = vmul.f32 0.5, %v3049_v61  ;;  %v6123_v17 = vmax.f32 %v2675_v44, 1e-12 }
 0x3d4   : > { %v3088_v36 = vmul.f32 %v4485_v62, %v6092_v58  ;;  %v3029_v28 = vmul.f32 %v6110_v57, %v3028_v63  ;;  %v6127_v10 = vpop.eup %4486  ;;  %vm3094_vm0 = vweird.f32 %v4485_v62  ;;  %v3061_v63 = vsub.f32 1.5, %v3060_v49 }
 0x3d5   : > { %4488 = vrsqrt.f32 %v6113_v43  ;;  %v2892_v15 = vmul.f32 %v4479_v55, %v2891_v29  ;;  %v3051_v20 = vsub.f32 1.5, %v3050_v23  ;;  %vm3095_vm4 = vmor %vm3093_vm2, %vm3094_vm0  ;;  %v6149_v58 = vmax.f32 %v2717_v11, 1e-12 }
 0x3d6   : > { %v3089_v19 = vmul.f32 %v4485_v62, %v3088_v36  ;;  %4490 = vrsqrt.f32 %v6121_v42  ;;  %vm2874_vm1 = vweird.f32 %v6127_v10  ;;  %vm3043_vm2 = vweird.f32 %v6113_v43 }
 0x3d7   : > { %v2896_v61 = vsel %vm2895_vm15, %v4479_v55, %v2892_v15  ;;  %4492 = vrsqrt.f32 %v6123_v17  ;;  %v2669_v15 = vpop.xlane.xlu2 %2668  ;;  %v3082_v55 = vmul.f32 %v6090_v52, %v3081_v4  ;;  %vm3034_vm15 = vweird.f32 %v6110_v57 }
 0x3d8   : > { %v3090_v37 = vmul.f32 0.5, %v3089_v19  ;;  %v3119_v44 = vmul.f32 %v2896_v61, %v5757_v12  ;;  %v3120_v19 = vmul.f32 %v2896_v61, %v5745_v32  ;;  %v3030_v32 = vmul.f32 0.5, %v3029_v28  ;;  %vm3035_vm0 = vmor %vm3033_vm14, %vm3034_vm15 }
 0x3d9   : > { %v2868_v12 = vmul.f32 %v6127_v10, %v6105_v48  ;;  %v3086_v11 = vsel %vm3085_vm7, %v6090_v52, %v3082_v55  ;;  %v3062_v52 = vmul.f32 %v6100_v16, %v3061_v63 }
 0x3da   : > { %v3091_v31 = vsub.f32 1.5, %v3090_v37  ;;  %v2681_v56 = vpop.xlane.xlu0 %2680  ;;  %v6138_v47 = vpop.xlane.xlu1 %2713  ;;  %3199 = vmatpush.xpose.msra.mxu0 %v3119_v44  ;;  %3264 = vmatpush.xpose.msra.mxu1 %v3120_v19  ;;  %v6160_v37 = vmax.f32 %v2669_v15, 1e-12  ;;  %v3031_v28 = vsub.f32 1.5, %v3030_v32  ;;  %v3157_v19 = vmul.f32 %v3086_v11, %v5749_v27 }
 0x3db   : > { %v6130_v34 = vpop.eup %4488  ;;  %v6136_v25 = vmax.f32 %v2681_v56, 1e-12  ;;  %v2869_v61 = vmul.f32 %v6127_v10, %v2868_v12  ;;  %v3158_v55 = vmul.f32 %v3086_v11, %v5771_v13  ;;  %v3066_v32 = vsel %vm3065_vm13, %v6100_v16, %v3062_v52 }
 0x3dc   : > { %v3092_v29 = vmul.f32 %v4485_v62, %v3091_v31  ;;  %v3038_v36 = vmul.f32 %v6130_v34, %v6113_v43  ;;  %v6157_v23 = vpop.eup %4490  ;;  %vm3044_vm3 = vweird.f32 %v6130_v34  ;;  %vm2863_vm13 = vweird.f32 %v6123_v17 }
 0x3dd   : > { %4494 = vrsqrt.f32 %v6136_v25  ;;  %v6168_v21 = vpop.eup %4492  ;;  %v3018_v38 = vmul.f32 %v6157_v23, %v6121_v42  ;;  %vm3045_vm6 = vmor %vm3043_vm2, %vm3044_vm3  ;;  %vm3024_vm8 = vweird.f32 %v6157_v23  ;;  %vm2883_vm10 = vweird.f32 %v6136_v25 }
 0x3de   : > { %v3096_v31 = vsel %vm3095_vm4, %v4485_v62, %v3092_v29  ;;  %v3039_v4 = vmul.f32 %v6130_v34, %v3038_v36  ;;  %4496 = vrsqrt.f32 %v6149_v58  ;;  %v3076_v29 = vsel %vm3075_vm11, %v6088_v60, %v3072_v14  ;;  %vm3025_vm14 = vmor %vm3023_vm5, %vm3024_vm8 }
 0x3df   : > { %v3159_v49 = vmul.f32 %v3096_v31, %v5807_v54  ;;  %v3160_v62 = vmul.f32 %v3096_v31, %v5818_v41  ;;  %v3052_v54 = vmul.f32 %v6086_v59, %v3051_v20  ;;  %4498 = vrsqrt.f32 %v6160_v37  ;;  %v2708_v13 = vpop.xlane.xlu2 %2707 }
 0x3e0   : > { %v3040_v36 = vmul.f32 0.5, %v3039_v4  ;;  %v2858_v27 = vmul.f32 %v6168_v21, %v6123_v17  ;;  %v2870_v20 = vmul.f32 0.5, %v2869_v61  ;;  %v3019_v50 = vmul.f32 %v6157_v23, %v3018_v38 }
 0x3e1   : > { %3325 = vmatpush.xpose.msra.mxu2 %v3159_v49  ;;  %3390 = vmatpush.xpose.msra.mxu3 %v3160_v62  ;;  %v3056_v60 = vsel %vm3055_vm12, %v6086_v59, %v3052_v54  ;;  %v3155_v12 = vmul.f32 %v3076_v29, %v5729_v46  ;;  %v3032_v31 = vmul.f32 %v6110_v57, %v3031_v28  ;;  %v7028_v62 = vld [vmem:[#allocation76_spill] sm:$0xff]  ;;  %vm2873_vm4 = vweird.f32 %v6105_v48 }
 0x3e2   : > { %v2720_v41 = vpop.xlane.xlu0 %2719  ;;  %v2666_v26 = vpop.xlane.xlu1 %2665  ;;  %v3041_v59 = vsub.f32 1.5, %v3040_v36  ;;  %v3156_v4 = vmul.f32 %v3076_v29, %v5733_v8  ;;  %v3151_v11 = vmul.f32 %v3056_v60, %v7028_v62  ;;  %v2859_v54 = vmul.f32 %v6168_v21, %v2858_v27  ;;  %vm2875_vm9 = vmor %vm2873_vm4, %vm2874_vm1 }
 0x3e3   : > { %v6175_v56 = vpop.eup %4494  ;;  %v6179_v44 = vmax.f32 %v2720_v41, 1e-12  ;;  %v6208_v14 = vmax.f32 %v2666_v26, 1e-12  ;;  %v3153_v61 = vmul.f32 %v3066_v32, %v5717_v30  ;;  %v7029_v41 = vld [vmem:[#allocation77_spill] sm:$0xff]  ;;  %v2871_v28 = vsub.f32 1.5, %v2870_v20 }
 0x3e4   : > { %v2878_v15 = vmul.f32 %v6175_v56, %v6136_v25  ;;  %v6206_v49 = vpop.eup %4496  ;;  %v3152_v52 = vmul.f32 %v3056_v60, %v7029_v41  ;;  %v6223_v8 = vmax.f32 %v6138_v47, 1e-12  ;;  %v3020_v36 = vmul.f32 0.5, %v3019_v50 }
 0x3e5   : > { %4500 = vrsqrt.f32 %v6179_v44  ;;  %3326 = vmatpush.xpose.msra.mxu2 %v3157_v19  ;;  %3391 = vmatpush.xpose.msra.mxu3 %v3158_v55  ;;  %v6215_v46 = vpop.eup %4498  ;;  %v7030_v19 = vld [vmem:[#allocation78_spill] sm:$0xff]  ;;  %v3036_v5 = vsel %vm3035_vm0, %v6110_v57, %v3032_v31  ;;  %v3042_v47 = vmul.f32 %v6130_v34, %v3041_v59  ;;  %v2998_v27 = vmul.f32 %v6206_v49, %v6149_v58 }
 0x3e6   : > { %v2879_v63 = vmul.f32 %v6175_v56, %v2878_v15  ;;  %v3154_v29 = vmul.f32 %v3066_v32, %v7030_v19  ;;  %4502 = vrsqrt.f32 %v6208_v14  ;;  %v2860_v26 = vmul.f32 0.5, %v2859_v54 }
 0x3e7   : > { %v2838_v57 = vmul.f32 %v6215_v46, %v6160_v37  ;;  %v3021_v32 = vsub.f32 1.5, %v3020_v36  ;;  %vm2884_vm7 = vweird.f32 %v6175_v56  ;;  %v3046_v31 = vsel %vm3045_vm6, %v6130_v34, %v3042_v47 }
 0x3e8   : > { %v2880_v16 = vmul.f32 0.5, %v2879_v63  ;;  %v2872_v63 = vmul.f32 %v6127_v10, %v2871_v28  ;;  %v3147_v59 = vmul.f32 %v3036_v5, %v5727_v9  ;;  %v2861_v48 = vsub.f32 1.5, %v2860_v26  ;;  %vm2885_vm12 = vmor %vm2883_vm10, %vm2884_vm7 }
 0x3e9   : > { %3327 = vmatpush.xpose.msra.mxu2 %v3155_v12  ;;  %3392 = vmatpush.xpose.msra.mxu3 %v3156_v4  ;;  %v2660_v12 = vpop.xlane.xlu2 %2659  ;;  %v6258_v4 = vmax.f32 %v2708_v13, 1e-12  ;;  %vm2864_vm11 = vweird.f32 %v6168_v21  ;;  %v2839_v9 = vmul.f32 %v6215_v46, %v2838_v57  ;;  %v3149_v41 = vmul.f32 %v3046_v31, %v5838_v6 }
 0x3ea   : > { %v2672_v38 = vpop.xlane.xlu0 %2671  ;;  %v2881_v60 = vsub.f32 1.5, %v2880_v16  ;;  %v6260_v43 = vpop.xlane.xlu1 %2704  ;;  %v2999_v16 = vmul.f32 %v6206_v49, %v2998_v27  ;;  %v2876_v25 = vsel %vm2875_vm9, %v6127_v10, %v2872_v63  ;;  %v3022_v28 = vmul.f32 %v6157_v23, %v3021_v32  ;;  %vm2865_vm15 = vmor %vm2863_vm13, %vm2864_vm11 }
 0x3eb   : > { %v6226_v30 = vpop.eup %4500  ;;  %v6229_v15 = vmax.f32 %v2672_v38, 1e-12  ;;  %v3150_v10 = vmul.f32 %v3046_v31, %v5842_v24  ;;  %v2862_v6 = vmul.f32 %v6168_v21, %v2861_v48  ;;  %v3115_v17 = vmul.f32 %v2876_v25, %v5765_v3 }
 0x3ec   : > { %v3008_v55 = vmul.f32 %v6226_v30, %v6179_v44  ;;  %v2882_v62 = vmul.f32 %v6175_v56, %v2881_v60  ;;  %v6263_v54 = vpop.eup %4502  ;;  %v3000_v24 = vmul.f32 0.5, %v2999_v16  ;;  %vm3014_vm0 = vweird.f32 %v6226_v30 }
 0x3ed   : > { %4504 = vrsqrt.f32 %v6229_v15  ;;  %3328 = vmatpush.xpose.msra.mxu2 %v3153_v61  ;;  %3393 = vmatpush.xpose.msra.mxu3 %v3154_v29  ;;  %v3026_v26 = vsel %vm3025_vm14, %v6157_v23, %v3022_v28  ;;  %v3116_v57 = vmul.f32 %v2876_v25, %v5753_v39  ;;  %vm3004_vm1 = vweird.f32 %v6206_v49 }
 0x3ee   : > { %4506 = vrsqrt.f32 %v6223_v8  ;;  %v3009_v20 = vmul.f32 %v6226_v30, %v3008_v55  ;;  %v2886_v61 = vsel %vm2885_vm12, %v6175_v56, %v2882_v62  ;;  %v2828_v56 = vmul.f32 %v6263_v54, %v6208_v14  ;;  %v7032_v62 = vld [vmem:[#allocation80_spill] sm:$0xff] }
 0x3ef   : > { %4508 = vrsqrt.f32 %v6258_v4  ;;  %v3118_v36 = vmul.f32 %v2886_v61, %v5867_v45  ;;  %v2840_v55 = vmul.f32 0.5, %v2839_v9  ;;  %vm3013_vm2 = vweird.f32 %v6179_v44 }
 0x3f0   : > { %v3010_v50 = vmul.f32 0.5, %v3009_v20  ;;  %v2829_v60 = vmul.f32 %v6263_v54, %v2828_v56  ;;  %v2866_v20 = vsel %vm2865_vm15, %v6168_v21, %v2862_v6  ;;  %v6310_v63 = vmax.f32 %v2660_v12, 1e-12  ;;  %vm3015_vm3 = vmor %vm3013_vm2, %vm3014_vm0 }
 0x3f1   : > { %3329 = vmatpush.xpose.msra.mxu2 %v3151_v11  ;;  %3394 = vmatpush.xpose.msra.mxu3 %v3152_v52  ;;  %v3117_v52 = vmul.f32 %v2886_v61, %v5863_v7  ;;  %v7031_v7 = vld [vmem:[#allocation79_spill] sm:$0xff]  ;;  %v2841_v3 = vsub.f32 1.5, %v2840_v55  ;;  %v2699_v32 = vpop.xlane.xlu2 %2698  ;;  %v3001_v31 = vsub.f32 1.5, %v3000_v24  ;;  %v3145_v48 = vmul.f32 %v3026_v26, %v5790_v1 }
 0x3f2   : > { %v2711_v34 = vpop.xlane.xlu0 %2710  ;;  %v3011_v19 = vsub.f32 1.5, %v3010_v50  ;;  %v3148_v27 = vmul.f32 %v3036_v5, %v7031_v7  ;;  %3265 = vmatpush.xpose.msra.mxu1 %v3118_v36  ;;  %v2657_v21 = vpop.xlane.xlu1 %2656  ;;  %v3113_v12 = vmul.f32 %v2866_v20, %v5822_v35  ;;  %v3146_v16 = vmul.f32 %v3026_v26, %v7032_v62 }
 0x3f3   : > { %v6271_v13 = vpop.eup %4504  ;;  %v6274_v11 = vmax.f32 %v2711_v34, 1e-12  ;;  %3200 = vmatpush.xpose.msra.mxu0 %v3117_v52  ;;  %v2830_v25 = vmul.f32 0.5, %v2829_v60  ;;  %v3114_v61 = vmul.f32 %v2866_v20, %v5826_v33  ;;  %vm2844_vm5 = vweird.f32 %v6215_v46 }
 0x3f4   : > { %v6278_v38 = vpop.eup %4506  ;;  %v2848_v29 = vmul.f32 %v6271_v13, %v6229_v15  ;;  %v3012_v42 = vmul.f32 %v6226_v30, %v3011_v19  ;;  %vm2854_vm4 = vweird.f32 %v6271_v13  ;;  %v2842_v35 = vmul.f32 %v6215_v46, %v2841_v3 }
 0x3f5   : > { %3330 = vmatpush.xpose.msra.mxu2 %v3149_v41  ;;  %3395 = vmatpush.xpose.msra.mxu3 %v3150_v10  ;;  %v2988_v45 = vmul.f32 %v6278_v38, %v6223_v8  ;;  %4510 = vrsqrt.f32 %v6274_v11  ;;  %v6312_v50 = vpop.eup %4508  ;;  %vm2853_vm6 = vweird.f32 %v6229_v15  ;;  %vm2843_vm7 = vweird.f32 %v6160_v37 }
 0x3f6   : > { %v2849_v47 = vmul.f32 %v6271_v13, %v2848_v29  ;;  %3266 = vmatpush.xpose.msra.mxu1 %v3116_v57  ;;  %v3016_v9 = vsel %vm3015_vm3, %v6226_v30, %v3012_v42  ;;  %v2968_v1 = vmul.f32 %v6312_v50, %v6258_v4  ;;  %v6335_v30 = vmax.f32 %v6260_v43, 1e-12  ;;  %vm2855_vm8 = vmor %vm2853_vm6, %vm2854_vm4 }
 0x3f7   : > { %3201 = vmatpush.xpose.msra.mxu0 %v3115_v17  ;;  %v2989_v44 = vmul.f32 %v6278_v38, %v2988_v45  ;;  %v3143_v41 = vmul.f32 %v3016_v9, %v5920_v18  ;;  %v3144_v29 = vmul.f32 %v3016_v9, %v5913_v0  ;;  %v2831_v15 = vsub.f32 1.5, %v2830_v25  ;;  %vm2845_vm10 = vmor %vm2843_vm7, %vm2844_vm5  ;;  %v7036_v25 = vld [vmem:[#allocation85_spill] sm:$0xff] }
 0x3f8   : > { %v2850_v5 = vmul.f32 0.5, %v2849_v47  ;;  %v6345_v52 = vmax.f32 %v2657_v21, 1e-12  ;;  %v3002_v10 = vmul.f32 %v6206_v49, %v3001_v31  ;;  %vm3003_vm9 = vweird.f32 %v6149_v58  ;;  %v7035_v21 = vld [vmem:[#allocation50_spill] sm:$0xff] }
 0x3f9   : > { %3331 = vmatpush.xpose.msra.mxu2 %v3147_v59  ;;  %3396 = vmatpush.xpose.msra.mxu3 %v3148_v27  ;;  %v2990_v28 = vmul.f32 0.5, %v2989_v44  ;;  %vm2993_vm11 = vweird.f32 %v6223_v8  ;;  %v2846_v58 = vsel %vm2845_vm10, %v6215_v46, %v2842_v35  ;;  %vm3005_vm12 = vmor %vm3003_vm9, %vm3004_vm1  ;;  %vm2834_vm13 = vweird.f32 %v6263_v54  ;;  %v2651_v55 = vpop.xlane.xlu2 %2650 }
 0x3fa   : > { %v2663_v23 = vpop.xlane.xlu0 %2662  ;;  %v2851_v39 = vsub.f32 1.5, %v2850_v5  ;;  %3267 = vmatpush.xpose.msra.mxu1 %v3114_v61  ;;  %v2654_v46 = vpop.xlane.xlu1 %2653  ;;  %v3006_v27 = vsel %vm3005_vm12, %v6206_v49, %v3002_v10  ;;  %v2832_v24 = vmul.f32 %v6263_v54, %v2831_v15  ;;  %v3109_v17 = vmul.f32 %v2846_v58, %v5509_v40  ;;  %v7033_v40 = vld [vmem:[#allocation81_spill] sm:$0xff] }
 0x3fb   : > { %v6316_v59 = vmax.f32 %v2663_v23, 1e-12  ;;  %v6323_v34 = vpop.eup %4510  ;;  %3202 = vmatpush.xpose.msra.mxu0 %v3113_v12  ;;  %v2991_v7 = vsub.f32 1.5, %v2990_v28  ;;  %v3110_v5 = vmul.f32 %v2846_v58, %v5517_v51  ;;  %vm2994_vm14 = vweird.f32 %v6278_v38 }
 0x3fc   : > { %v2852_v33 = vmul.f32 %v6271_v13, %v2851_v39  ;;  %v2978_v19 = vmul.f32 %v6323_v34, %v6274_v11  ;;  %vm2833_vm15 = vweird.f32 %v6208_v14  ;;  %v6383_v42 = vmax.f32 %v2651_v55, 1e-12  ;;  %v7034_v14 = vld [vmem:[#allocation82_spill] sm:$0xff]  ;;  %vm2995_vm1 = vmor %vm2993_vm11, %vm2994_vm14 }
 0x3fd   : > { %4512 = vrsqrt.f32 %v6316_v59  ;;  %3332 = vmatpush.xpose.msra.mxu2 %v3145_v48  ;;  %3397 = vmatpush.xpose.msra.mxu3 %v3146_v16  ;;  %vm2835_vm0 = vmor %vm2833_vm15, %vm2834_vm13  ;;  %v6387_v57 = vmax.f32 %v2654_v46, 1e-12  ;;  %v3141_v51 = vmul.f32 %v3006_v27, %v7033_v40  ;;  %v2992_v31 = vmul.f32 %v6278_v38, %v2991_v7 }
 0x3fe   : > { %4514 = vrsqrt.f32 %v6310_v63  ;;  %v2856_v43 = vsel %vm2855_vm8, %v6271_v13, %v2852_v33  ;;  %v2969_v13 = vmul.f32 %v6312_v50, %v2968_v1  ;;  %v2836_v23 = vsel %vm2835_vm0, %v6263_v54, %v2832_v24  ;;  %v7037_v33 = vld [vmem:[#allocation83_spill] sm:$0xff] }
 0x3ff   : > { %v3111_v18 = vmul.f32 %v2856_v43, %v6975_v53  ;;  %v3112_v37 = vmul.f32 %v2856_v43, %v6974_v2  ;;  %4516 = vrsqrt.f32 %v6335_v30  ;;  %v6367_v2 = vmax.f32 %v2699_v32, 1e-12 }
 0x400   : > { %v2979_v53 = vmul.f32 %v6323_v34, %v2978_v19  ;;  %4518 = vrsqrt.f32 %v6345_v52  ;;  %v2970_v49 = vmul.f32 0.5, %v2969_v13  ;;  %v3142_v32 = vmul.f32 %v3006_v27, %v7034_v14  ;;  %v7038_v27 = vld [vmem:[#allocation56_spill] sm:$0xff] }
 0x401   : > { %3333 = vmatpush.xpose.msra.mxu2 %v3143_v41  ;;  %3398 = vmatpush.xpose.msra.mxu3 %v3144_v29  ;;  %v3107_v39 = vmul.f32 %v2836_v23, %v6958_v22  ;;  %v3108_v48 = vmul.f32 %v2836_v23, %v7035_v21  ;;  %v2996_v54 = vsel %vm2995_vm1, %v6278_v38, %v2992_v31  ;;  %vm2984_vm2 = vweird.f32 %v6323_v34 }
 0x402   : > { %v2702_v0 = vpop.xlane.xlu0 %2701  ;;  %3203 = vmatpush.xpose.msra.mxu0 %v3111_v18  ;;  %3268 = vmatpush.xpose.msra.mxu1 %v3112_v37  ;;  %v2980_v60 = vmul.f32 0.5, %v2979_v53  ;;  %v3139_v61 = vmul.f32 %v2996_v54, %v7036_v25  ;;  %v2971_v1 = vsub.f32 1.5, %v2970_v49  ;;  %v3140_v41 = vmul.f32 %v2996_v54, %v7037_v33  ;;  %v2337_v7 = vpop.xlane.xlu1 %2336  ;;  %v7041_v49 = vld [vmem:[#allocation48_spill] sm:$0xff] }
 0x403   : > { %v6355_v56 = vpop.eup %4512  ;;  %v6359_v36 = vmax.f32 %v2702_v0, 1e-12  ;;  %vm2983_vm4 = vweird.f32 %v6274_v11  ;;  %vm2974_vm5 = vweird.f32 %v6312_v50  ;;  %vm2823_vm7 = vweird.f32 %v6316_v59  ;;  %v7043_v54 = vld [vmem:[#allocation84_spill] sm:$0xff] }
 0x404   : > { %v6362_v6 = vpop.eup %4514  ;;  %v2818_v47 = vmul.f32 %v6355_v56, %v6316_v59  ;;  %v2981_v22 = vsub.f32 1.5, %v2980_v60  ;;  %vm2824_vm3 = vweird.f32 %v6355_v56  ;;  %vm2985_vm6 = vmor %vm2983_vm4, %vm2984_vm2  ;;  %v2972_v37 = vmul.f32 %v6312_v50, %v2971_v1 }
 0x405   : > { %4520 = vrsqrt.f32 %v6359_v36  ;;  %v2808_v26 = vmul.f32 %v6362_v6, %v6310_v63  ;;  %v6390_v20 = vpop.eup %4516  ;;  %3334 = vmatpush.xpose.msra.mxu2 %v3141_v51  ;;  %3399 = vmatpush.xpose.msra.mxu3 %v3142_v32  ;;  %vm2973_vm8 = vweird.f32 %v6258_v4  ;;  %vm2814_vm9 = vweird.f32 %v6362_v6  ;;  %vm2825_vm10 = vmor %vm2823_vm7, %vm2824_vm3 }
 0x406   : > { %v2819_v45 = vmul.f32 %v6355_v56, %v2818_v47  ;;  %3204 = vmatpush.xpose.msra.mxu0 %v3109_v17  ;;  %3269 = vmatpush.xpose.msra.mxu1 %v3110_v5  ;;  %4522 = vrsqrt.f32 %v6367_v2  ;;  %v6402_v12 = vpop.eup %4518  ;;  %v2958_v9 = vmul.f32 %v6390_v20, %v6335_v30  ;;  %v2982_v43 = vmul.f32 %v6323_v34, %v2981_v22  ;;  %vm2975_vm11 = vmor %vm2973_vm8, %vm2974_vm5  ;;  %v7039_v17 = vld [vmem:[#allocation49_spill] sm:$0xff] }
 0x407   : > { %v2809_v62 = vmul.f32 %v6362_v6, %v2808_v26  ;;  %4524 = vrsqrt.f32 %v6383_v42  ;;  %v2798_v38 = vmul.f32 %v6402_v12, %v6345_v52  ;;  %v7040_v26 = vld [vmem:[#allocation47_spill] sm:$0xff]  ;;  %v2976_v60 = vsel %vm2975_vm11, %v6312_v50, %v2972_v37  ;;  %v7042_v50 = vld [vmem:[#allocation86_spill] sm:$0xff] }
 0x408   : > { %v2820_v3 = vmul.f32 0.5, %v2819_v45  ;;  %4526 = vrsqrt.f32 %v6387_v57  ;;  %v2959_v15 = vmul.f32 %v6390_v20, %v2958_v9  ;;  %v2986_v53 = vsel %vm2985_vm6, %v6323_v34, %v2982_v43 }
 0x409   : > { %3335 = vmatpush.xpose.msra.mxu2 %v3139_v61  ;;  %v2810_v28 = vmul.f32 0.5, %v2809_v62  ;;  %3400 = vmatpush.xpose.msra.mxu3 %v3140_v41  ;;  %v2799_v11 = vmul.f32 %v6402_v12, %v2798_v38  ;;  %v3137_v24 = vmul.f32 %v2986_v53, %v7038_v27  ;;  %v3138_v5 = vmul.f32 %v2986_v53, %v7039_v17  ;;  %v2340_v62 = vpop.xlane.xlu2 %2339  ;;  %v7044_v41 = vld [vmem:[#allocation45_spill] sm:$0xff] }
 0x40a   : > { %v2331_v44 = vpop.xlane.xlu0 %2330  ;;  %3205 = vmatpush.xpose.msra.mxu0 %v3107_v39  ;;  %3270 = vmatpush.xpose.msra.mxu1 %v3108_v48  ;;  %v2821_v35 = vsub.f32 1.5, %v2820_v3  ;;  %v2960_v4 = vmul.f32 0.5, %v2959_v15  ;;  %v6462_v23 = vmax.f32 %v2337_v7, 1e-12  ;;  %vm2813_vm12 = vweird.f32 %v6310_v63 }
 0x40b   : > { %v6407_v16 = vmax.f32 %v2331_v44, 1e-12  ;;  %v6409_v8 = vpop.eup %4520  ;;  %v2811_v58 = vsub.f32 1.5, %v2810_v28  ;;  %v2800_v40 = vmul.f32 0.5, %v2799_v11  ;;  %v3135_v21 = vmul.f32 %v2976_v60, %v7042_v50  ;;  %vm2815_vm13 = vmor %vm2813_vm12, %vm2814_vm9  ;;  %v7045_v28 = vld [vmem:[#allocation46_spill] sm:$0xff] }
 0x40c   : > { %v2948_v19 = vmul.f32 %v6409_v8, %v6359_v36  ;;  %v6423_v29 = vpop.eup %4522  ;;  %v2822_v18 = vmul.f32 %v6355_v56, %v2821_v35  ;;  %v2961_v48 = vsub.f32 1.5, %v2960_v4  ;;  %v3136_v9 = vmul.f32 %v2976_v60, %v7043_v54 }
 0x40d   : > { %4528 = vrsqrt.f32 %v6407_v16  ;;  %v6428_v10 = vpop.eup %4524  ;;  %v2938_v47 = vmul.f32 %v6423_v29, %v6367_v2  ;;  %3336 = vmatpush.xpose.msra.mxu2 %v3137_v24  ;;  %3401 = vmatpush.xpose.msra.mxu3 %v3138_v5  ;;  %v2812_v39 = vmul.f32 %v6362_v6, %v2811_v58  ;;  %vm2964_vm14 = vweird.f32 %v6390_v20 }
 0x40e   : > { %v6434_v0 = vpop.eup %4526  ;;  %v2949_v59 = vmul.f32 %v6409_v8, %v2948_v19  ;;  %v2826_v55 = vsel %vm2825_vm10, %v6355_v56, %v2822_v18  ;;  %v2778_v51 = vmul.f32 %v6428_v10, %v6383_v42  ;;  %v2801_v61 = vsub.f32 1.5, %v2800_v40 }
 0x40f   : > { %v3105_v34 = vmul.f32 %v2826_v55, %v7040_v26  ;;  %v3106_v56 = vmul.f32 %v2826_v55, %v7041_v49  ;;  %v2788_v3 = vmul.f32 %v6434_v0, %v6387_v57  ;;  %v2939_v44 = vmul.f32 %v6423_v29, %v2938_v47  ;;  %v7046_v55 = vld [vmem:[#allocation75_spill] sm:$0xff]  ;;  %v7047_v47 = vld [vmem:[#allocation73_spill] sm:$0xff] }
 0x410   : > { %v2950_v32 = vmul.f32 0.5, %v2949_v59  ;;  %v2779_v22 = vmul.f32 %v6428_v10, %v2778_v51  ;;  %v2816_v35 = vsel %vm2815_vm13, %v6362_v6, %v2812_v39  ;;  %v6479_v33 = vmax.f32 %v2340_v62, 1e-12  ;;  %v7050_v51 = vld [vmem:[#allocation54_spill] sm:$0xff]  ;;  %v7052_v62 = vld [vmem:[#allocation7_spill] sm:$0xff] }
 0x411   : > { %3206 = vmatpush.xpose.msra.mxu0 %v3105_v34  ;;  %3271 = vmatpush.xpose.msra.mxu1 %v3106_v56  ;;  %v2789_v63 = vmul.f32 %v6434_v0, %v2788_v3  ;;  %v3103_v38 = vmul.f32 %v2816_v35, %v7044_v41  ;;  %v3104_v19 = vmul.f32 %v2816_v35, %v7045_v28  ;;  %vm2963_vm15 = vweird.f32 %v6335_v30  ;;  %v7048_v34 = vld [vmem:[#allocation43_spill] sm:$0xff]  ;;  %v7049_v56 = vld [vmem:[#allocation44_spill] sm:$0xff]  ;;  %v7056_v28 = vld [vmem:[#allocation74_spill] sm:$0xff] }
 0x412   : > { %v2334_v45 = vpop.xlane.xlu0 %2333  ;;  %3337 = vmatpush.xpose.msra.mxu2 %v3135_v21  ;;  %v2951_v1 = vsub.f32 1.5, %v2950_v32  ;;  %3402 = vmatpush.xpose.msra.mxu3 %v3136_v9  ;;  %v2940_v15 = vmul.f32 0.5, %v2939_v44  ;;  %vm2803_vm0 = vweird.f32 %v6345_v52  ;;  %v2962_v43 = vmul.f32 %v6390_v20, %v2961_v48  ;;  %vm2965_vm1 = vmor %vm2963_vm15, %vm2964_vm14 }
 0x413   : > { %v6441_v13 = vpop.eup %4528  ;;  %v6464_v31 = vmax.f32 %v2334_v45, 1e-12  ;;  %vm2804_vm2 = vweird.f32 %v6402_v12  ;;  %v2780_v18 = vmul.f32 0.5, %v2779_v22  ;;  %v2790_v6 = vmul.f32 0.5, %v2789_v63  ;;  %v7054_v63 = vld [vmem:[#allocation41_spill] sm:$0xff] }
 0x414   : > { %v2394_v46 = vmul.f32 %v6441_v13, %v6407_v16  ;;  %vm2954_vm3 = vweird.f32 %v6409_v8  ;;  %v2966_v30 = vsel %vm2965_vm1, %v6390_v20, %v2962_v43  ;;  %v2802_v58 = vmul.f32 %v6402_v12, %v2801_v61  ;;  %vm2805_vm4 = vmor %vm2803_vm0, %vm2804_vm2  ;;  %v7055_v61 = vld [vmem:[#allocation42_spill] sm:$0xff] }
 0x415   : > { %4530 = vrsqrt.f32 %v6464_v31  ;;  %3207 = vmatpush.xpose.msra.mxu0 %v3103_v38  ;;  %3272 = vmatpush.xpose.msra.mxu1 %v3104_v19  ;;  %v2952_v59 = vmul.f32 %v6409_v8, %v2951_v1  ;;  %v3133_v4 = vmul.f32 %v2966_v30, %v7046_v55  ;;  %v3134_v7 = vmul.f32 %v2966_v30, %v7047_v47  ;;  %v2346_v38 = vpop.xlane.xlu1 %2345 }
 0x416   : > { %v2395_v14 = vmul.f32 %v6441_v13, %v2394_v46  ;;  %4532 = vrsqrt.f32 %v6462_v23  ;;  %v2941_v27 = vsub.f32 1.5, %v2940_v15  ;;  %vm2953_vm5 = vweird.f32 %v6359_v36  ;;  %v7057_v15 = vld [vmem:[#allocation55_spill] sm:$0xff] }
 0x417   : > { %4534 = vrsqrt.f32 %v6479_v33  ;;  %v2781_v20 = vsub.f32 1.5, %v2780_v18  ;;  %vm2955_vm6 = vmor %vm2953_vm5, %vm2954_vm3  ;;  %vm2400_vm7 = vweird.f32 %v6441_v13  ;;  %3338 = vmatpush.xpose.msra.mxu2 %v3133_v4  ;;  %3403 = vmatpush.xpose.msra.mxu3 %v3134_v7  ;;  %v2791_v17 = vsub.f32 1.5, %v2790_v6  ;;  %v7060_v4 = vld [vmem:[#allocation9_spill] sm:$0xff]  ;;  %v7061_v7 = vld [vmem:[#allocation10_spill] sm:$0xff] }
 0x418   : > { %v2396_v25 = vmul.f32 0.5, %v2395_v14  ;;  %vm2399_vm8 = vweird.f32 %v6407_v16  ;;  %v2806_v52 = vsel %vm2805_vm4, %v6402_v12, %v2802_v58  ;;  %v2956_v5 = vsel %vm2955_vm6, %v6409_v8, %v2952_v59  ;;  %v7051_v14 = vld [vmem:[#allocation53_spill] sm:$0xff] }
 0x419   : > { %v3101_v49 = vmul.f32 %v2806_v52, %v7048_v34  ;;  %v3102_v60 = vmul.f32 %v2806_v52, %v7049_v56  ;;  %vm2794_vm9 = vweird.f32 %v6434_v0  ;;  %vm2401_vm10 = vmor %vm2399_vm8, %vm2400_vm7  ;;  %v3131_v3 = vmul.f32 %v2956_v5, %v7050_v51 }
 0x41a   : > { %v2397_v37 = vsub.f32 1.5, %v2396_v25  ;;  %v2343_v40 = vpop.xlane.xlu0 %2342  ;;  %v3132_v16 = vmul.f32 %v2956_v5, %v7051_v14  ;;  %vm2944_vm11 = vweird.f32 %v6423_v29  ;;  %vm2793_vm12 = vweird.f32 %v6387_v57 }
 0x41b   : > { %v6489_v11 = vpop.eup %4530  ;;  %3208 = vmatpush.xpose.msra.mxu0 %v3101_v49  ;;  %3273 = vmatpush.xpose.msra.mxu1 %v3102_v60  ;;  %vm2784_vm13 = vweird.f32 %v6428_v10  ;;  %v6528_v39 = vmax.f32 %v2343_v40, 1e-12  ;;  %v2792_v50 = vmul.f32 %v6434_v0, %v2791_v17  ;;  %v2942_v21 = vmul.f32 %v6423_v29, %v2941_v27  ;;  %vm2795_vm0 = vmor %vm2793_vm12, %vm2794_vm9 }
 0x41c   : > { %v2404_v53 = vmul.f32 %v6489_v11, %v6464_v31  ;;  %v6500_v46 = vpop.eup %4532  ;;  %v2398_v24 = vmul.f32 %v6441_v13, %v2397_v37  ;;  %3339 = vmatpush.xpose.msra.mxu2 %v3131_v3  ;;  %3404 = vmatpush.xpose.msra.mxu3 %v3132_v16  ;;  %vm2943_vm14 = vweird.f32 %v6367_v2  ;;  %vm2783_vm15 = vweird.f32 %v6383_v42  ;;  %v7053_v42 = vld [vmem:[#allocation8_spill] sm:$0xff] }
 0x41d   : > { %v2414_v36 = vmul.f32 %v6500_v46, %v6462_v23  ;;  %v6522_v32 = vpop.eup %4534  ;;  %vm2945_vm1 = vmor %vm2943_vm14, %vm2944_vm11  ;;  %v6543_v44 = vstv %s6507_s22  ;;  %v2796_v2 = vsel %vm2795_vm0, %v6434_v0, %v2792_v50  ;;  %vm2410_vm3 = vweird.f32 %v6489_v11 }
 0x41e   : > { %v2405_v45 = vmul.f32 %v6489_v11, %v2404_v53  ;;  %v2402_v12 = vsel %vm2401_vm10, %v6441_v13, %v2398_v24  ;;  %v2782_v13 = vmul.f32 %v6428_v10, %v2781_v20  ;;  %v2424_v48 = vmul.f32 %v6522_v32, %v6479_v33  ;;  %vm2785_vm2 = vmor %vm2783_vm15, %vm2784_vm13  ;;  %v2349_v20 = vpop.xlane.xlu2 %2348 }
 0x41f   : > { %v2415_v57 = vmul.f32 %v6500_v46, %v2414_v36  ;;  %v2553_v54 = vmul.f32 %v2402_v12, %v7052_v62  ;;  %v2554_v9 = vmul.f32 %v2402_v12, %v7053_v42  ;;  %v3099_v25 = vmul.f32 %v2796_v2, %v7054_v63 }
 0x420   : > { %v2406_v26 = vmul.f32 0.5, %v2405_v45  ;;  %4536 = vrsqrt.f32 %v6528_v39  ;;  %v3100_v1 = vmul.f32 %v2796_v2, %v7055_v61  ;;  %v2946_v35 = vsel %vm2945_vm1, %v6423_v29, %v2942_v21  ;;  %v7058_v29 = vld [vmem:[#allocation39_spill] sm:$0xff]  ;;  %v2355_v2 = vpop.xlane.xlu1 %2354 }
 0x421   : > { %v2786_v41 = vsel %vm2785_vm2, %v6428_v10, %v2782_v13  ;;  %v2416_v0 = vmul.f32 0.5, %v2415_v57  ;;  %vm2409_vm4 = vweird.f32 %v6464_v31  ;;  %3209 = vmatpush.xpose.msra.mxu0 %v3099_v25  ;;  %v3129_v19 = vmul.f32 %v2946_v35, %v7056_v28  ;;  %v7059_v31 = vld [vmem:[#allocation40_spill] sm:$0xff] }
 0x422   : > { %v2407_v8 = vsub.f32 1.5, %v2406_v26  ;;  %v3130_v43 = vmul.f32 %v2946_v35, %v7057_v15  ;;  %v3163_v18 = vmul.f32 %v6543_v44, %v2553_v54  ;;  %vm2411_vm5 = vmor %vm2409_vm4, %vm2410_vm3  ;;  %3274 = vmatpush.xpose.msra.mxu1 %v3100_v1  ;;  %v3164_v6 = vmul.f32 %v6543_v44, %v2554_v9  ;;  %v2352_v3 = vpop.xlane.xlu0 %2351  ;;  %v7065_v9 = vld [vmem:[#allocation14_spill] sm:$0xff] }
 0x423   : > { %3340 = vmatpush.xpose.msra.mxu2 %v3129_v19  ;;  %v3097_v37 = vmul.f32 %v2786_v41, %v7058_v29  ;;  %v6564_v30 = vmax.f32 %v2346_v38, 1e-12  ;;  %v3098_v58 = vmul.f32 %v2786_v41, %v7059_v31  ;;  %v2425_v59 = vmul.f32 %v6522_v32, %v2424_v48 }
 0x424   : > { %v2408_v22 = vmul.f32 %v6489_v11, %v2407_v8  ;;  %3405 = vmatpush.xpose.msra.mxu3 %v3130_v43  ;;  %v2417_v53 = vsub.f32 1.5, %v2416_v0  ;;  %vm2420_vm6 = vweird.f32 %v6500_v46  ;;  %vm2419_vm7 = vweird.f32 %v6462_v23  ;;  %v7062_v23 = vld [vmem:[#allocation11_spill] sm:$0xff]  ;;  %v7067_v43 = vld [vmem:[#allocation16_spill] sm:$0xff] }
 0x425   : > { %3210 = vmatpush.xpose.msra.mxu0 %v3097_v37  ;;  %4538 = vrsqrt.f32 %v6564_v30  ;;  %v6579_v52 = vmax.f32 %v2349_v20, 1e-12  ;;  %vm2421_vm8 = vmor %vm2419_vm7, %vm2420_vm6  ;;  %vm2430_vm9 = vweird.f32 %v6522_v32  ;;  %vm2429_vm10 = vweird.f32 %v6479_v33  ;;  %v7064_v33 = vld [vmem:[#allocation13_spill] sm:$0xff] }
 0x426   : > { %v2412_v10 = vsel %vm2411_vm5, %v6489_v11, %v2408_v22  ;;  %v6568_v55 = vpop.eup %4536  ;;  %3275 = vmatpush.xpose.msra.mxu1 %v3098_v58  ;;  %3341 = vmatmul.f32.vlgmr.msra.gmra.mxu2 %v3163_v18  ;;  %v2426_v11 = vmul.f32 0.5, %v2425_v59  ;;  %v2418_v24 = vmul.f32 %v6500_v46, %v2417_v53  ;;  %vm2431_vm11 = vmor %vm2429_vm10, %vm2430_vm9  ;;  %v6594_v16 = vmax.f32 %v2352_v3, 1e-12  ;;  %v2358_v38 = vpop.xlane.xlu2 %2357 }
 0x427   : > { %v2555_v47 = vmul.f32 %v2412_v10, %v7060_v4  ;;  %3406 = vmatmul.f32.vlgmr.msra.gmra.mxu3 %v3164_v6  ;;  %v2556_v27 = vmul.f32 %v2412_v10, %v7061_v7  ;;  %v2434_v45 = vmul.f32 %v6568_v55, %v6528_v39  ;;  %4540 = vrsqrt.f32 %v6579_v52 }
 0x428   : > { %3211 = vmatmul.f32.vlgmr.msra.gmra.mxu0 %v3163_v18  ;;  %v2427_v36 = vsub.f32 1.5, %v2426_v11  ;;  %v2422_v34 = vsel %vm2421_vm8, %v6500_v46, %v2418_v24  ;;  %v7063_v46 = vld [vmem:[#allocation12_spill] sm:$0xff]  ;;  %4542 = vrsqrt.f32 %v6594_v16  ;;  %vm2440_vm12 = vweird.f32 %v6568_v55 }
 0x429   : > { %3276 = vmatmul.f32.vlgmr.msra.gmra.mxu1 %v3164_v6  ;;  %v3165_v17 = vmul.f32 %v6543_v44, %v2555_v47  ;;  %v3166_v5 = vmul.f32 %v6543_v44, %v2556_v27  ;;  %v2435_v26 = vmul.f32 %v6568_v55, %v2434_v45  ;;  %v2557_v56 = vmul.f32 %v2422_v34, %v7062_v23  ;;  %v7069_v27 = vld [vmem:[#allocation18_spill] sm:$0xff] }
 0x42a   : > { %v2428_v60 = vmul.f32 %v6522_v32, %v2427_v36  ;;  %v2558_v14 = vmul.f32 %v2422_v34, %v7063_v46  ;;  %vm2439_vm13 = vweird.f32 %v6528_v39  ;;  %v6611_v63 = vmax.f32 %v2355_v2, 1e-12  ;;  %v7066_v39 = vld [vmem:[#allocation15_spill] sm:$0xff]  ;;  %v2361_v7 = vpop.xlane.xlu0 %2360 }
 0x42b   : > { %v6584_v49 = vpop.eup %4538  ;;  %v2436_v51 = vmul.f32 0.5, %v2435_v26  ;;  %v3167_v12 = vmul.f32 %v6543_v44, %v2557_v56  ;;  %vm2441_vm14 = vmor %vm2439_vm13, %vm2440_vm12  ;;  %vm2449_vm0 = vweird.f32 %v6564_v30  ;;  %v6626_v6 = vmax.f32 %v2358_v38, 1e-12  ;;  %v2364_v56 = vpop.xlane.xlu1 %2363 }
 0x42c   : > { %v2444_v40 = vmul.f32 %v6584_v49, %v6564_v30  ;;  %v3168_v57 = vmul.f32 %v6543_v44, %v2558_v14  ;;  %v2432_v13 = vsel %vm2431_vm11, %v6522_v32, %v2428_v60  ;;  %4544 = vrsqrt.f32 %v6611_v63  ;;  %v7068_v30 = vld [vmem:[#allocation17_spill] sm:$0xff] }
 0x42d   : > { %v6597_v8 = vpop.eup %4540  ;;  %v2437_v21 = vsub.f32 1.5, %v2436_v51  ;;  %v2559_v62 = vmul.f32 %v2432_v13, %v7064_v33  ;;  %v2560_v22 = vmul.f32 %v2432_v13, %v7065_v9  ;;  %vm2450_vm15 = vweird.f32 %v6584_v49 }
 0x42e   : > { %3344 = vmatmul.f32.gmra.mxu2 %v3165_v17  ;;  %v2445_v50 = vmul.f32 %v6584_v49, %v2444_v40  ;;  %v2454_v48 = vmul.f32 %v6597_v8, %v6579_v52  ;;  %v6616_v41 = vpop.eup %4542  ;;  %vm2451_vm1 = vmor %vm2449_vm0, %vm2450_vm15  ;;  %4546 = vrsqrt.f32 %v6626_v6  ;;  %vm2460_vm2 = vweird.f32 %v6597_v8  ;;  %v7071_v40 = vld [vmem:[#allocation20_spill] sm:$0xff]  ;;  %v2367_v13 = vpop.xlane.xlu2 %2366 }
 0x42f   : > { %3409 = vmatmul.f32.gmra.mxu3 %v3166_v5  ;;  %v2438_v42 = vmul.f32 %v6568_v55, %v2437_v21  ;;  %v3169_v25 = vmul.f32 %v6543_v44, %v2559_v62  ;;  %v3170_v1 = vmul.f32 %v6543_v44, %v2560_v22  ;;  %v2464_v15 = vmul.f32 %v6616_v41, %v6594_v16 }
 0x430   : > { %3214 = vmatmul.f32.gmra.mxu0 %v3165_v17  ;;  %v2446_v54 = vmul.f32 0.5, %v2445_v50  ;;  %v2455_v32 = vmul.f32 %v6597_v8, %v2454_v48  ;;  %vm2459_vm3 = vweird.f32 %v6579_v52  ;;  %v6642_v11 = vmax.f32 %v2361_v7, 1e-12  ;;  %v7070_v52 = vld [vmem:[#allocation19_spill] sm:$0xff] }
 0x431   : > { %3279 = vmatmul.f32.gmra.mxu1 %v3166_v5  ;;  %v2442_v35 = vsel %vm2441_vm14, %v6568_v55, %v2438_v42  ;;  %v2465_v10 = vmul.f32 %v6616_v41, %v2464_v15  ;;  %vm2461_vm4 = vmor %vm2459_vm3, %vm2460_vm2  ;;  %vm2470_vm5 = vweird.f32 %v6616_v41  ;;  %vm2469_vm6 = vweird.f32 %v6594_v16  ;;  %v7072_v16 = vld [vmem:[#allocation21_spill] sm:$0xff] }
 0x432   : > { %v2447_v61 = vsub.f32 1.5, %v2446_v54  ;;  %v2456_v0 = vmul.f32 0.5, %v2455_v32  ;;  %v2561_v28 = vmul.f32 %v2442_v35, %v7066_v39  ;;  %v2562_v18 = vmul.f32 %v2442_v35, %v7067_v43  ;;  %v6632_v59 = vpop.eup %4544  ;;  %vm2471_vm7 = vmor %vm2469_vm6, %vm2470_vm5  ;;  %v7073_v54 = vld [vmem:[#allocation22_spill] sm:$0xff]  ;;  %v2370_v39 = vpop.xlane.xlu0 %2369 }
 0x433   : > { %v2474_v4 = vmul.f32 %v6632_v59, %v6611_v63  ;;  %v2466_v47 = vmul.f32 0.5, %v2465_v10  ;;  %4548 = vrsqrt.f32 %v6642_v11  ;;  %v6659_v46 = vmax.f32 %v2364_v56, 1e-12 }
 0x434   : > { %v2448_v19 = vmul.f32 %v6584_v49, %v2447_v61  ;;  %v3171_v29 = vmul.f32 %v6543_v44, %v2561_v28  ;;  %v2457_v37 = vsub.f32 1.5, %v2456_v0  ;;  %v3172_v31 = vmul.f32 %v6543_v44, %v2562_v18  ;;  %v6645_v45 = vpop.eup %4546  ;;  %v7075_v28 = vld [vmem:[#allocation24_spill] sm:$0xff] }
 0x435   : > { %v2475_v17 = vmul.f32 %v6632_v59, %v2474_v4  ;;  %v2467_v5 = vsub.f32 1.5, %v2466_v47  ;;  %v2484_v34 = vmul.f32 %v6645_v45, %v6626_v6  ;;  %4550 = vrsqrt.f32 %v6659_v46  ;;  %v7077_v4 = vld [vmem:[#allocation26_spill] sm:$0xff] }
 0x436   : > { %3347 = vmatmul.f32.gmra.mxu2 %v3167_v12  ;;  %v2452_v58 = vsel %vm2451_vm1, %v6584_v49, %v2448_v19  ;;  %v2458_v55 = vmul.f32 %v6597_v8, %v2457_v37  ;;  %vm2480_vm8 = vweird.f32 %v6632_v59  ;;  %vm2479_vm9 = vweird.f32 %v6611_v63  ;;  %v7074_v63 = vld [vmem:[#allocation23_spill] sm:$0xff] }
 0x437   : > { %3412 = vmatmul.f32.gmra.mxu3 %v3168_v57  ;;  %v2563_v53 = vmul.f32 %v2452_v58, %v7068_v30  ;;  %v2564_v20 = vmul.f32 %v2452_v58, %v7069_v27  ;;  %v2476_v23 = vmul.f32 0.5, %v2475_v17  ;;  %v2468_v60 = vmul.f32 %v6616_v41, %v2467_v5  ;;  %vm2481_vm10 = vmor %vm2479_vm9, %vm2480_vm8 }
 0x438   : > { %3217 = vmatmul.f32.gmra.mxu0 %v3167_v12  ;;  %v2462_v26 = vsel %vm2461_vm4, %v6597_v8, %v2458_v55  ;;  %v2485_v3 = vmul.f32 %v6645_v45, %v2484_v34  ;;  %v6674_v42 = vmax.f32 %v2367_v13, 1e-12  ;;  %vm2490_vm11 = vweird.f32 %v6645_v45 }
 0x439   : > { %3282 = vmatmul.f32.gmra.mxu1 %v3168_v57  ;;  %v3173_v24 = vmul.f32 %v6543_v44, %v2563_v53  ;;  %v3174_v36 = vmul.f32 %v6543_v44, %v2564_v20  ;;  %v2565_v49 = vmul.f32 %v2462_v26, %v7070_v52  ;;  %v2566_v51 = vmul.f32 %v2462_v26, %v7071_v40  ;;  %v6664_v21 = vpop.eup %4548  ;;  %v2373_v53 = vpop.xlane.xlu1 %2372 }
 0x43a   : > { %v2477_v12 = vsub.f32 1.5, %v2476_v23  ;;  %v2472_v50 = vsel %vm2471_vm7, %v6616_v41, %v2468_v60  ;;  %v2486_v57 = vmul.f32 0.5, %v2485_v3  ;;  %v2494_v62 = vmul.f32 %v6664_v21, %v6642_v11  ;;  %v2376_v26 = vpop.xlane.xlu2 %2375  ;;  %v7079_v23 = vld [vmem:[#allocation28_spill] sm:$0xff] }
 0x43b   : > { %v3175_v14 = vmul.f32 %v6543_v44, %v2565_v49  ;;  %v3176_v8 = vmul.f32 %v6543_v44, %v2566_v51  ;;  %v2567_v48 = vmul.f32 %v2472_v50, %v7072_v16  ;;  %v2568_v2 = vmul.f32 %v2472_v50, %v7073_v54  ;;  %v7081_v16 = vld [vmem:[#allocation30_spill] sm:$0xff] }
 0x43c   : > { %v2478_v33 = vmul.f32 %v6632_v59, %v2477_v12  ;;  %v2487_v22 = vsub.f32 1.5, %v2486_v57  ;;  %v2495_v32 = vmul.f32 %v6664_v21, %v2494_v62  ;;  %4552 = vrsqrt.f32 %v6674_v42 }
 0x43d   : > { %v3177_v9 = vmul.f32 %v6543_v44, %v2567_v48  ;;  %vm2489_vm12 = vweird.f32 %v6626_v6  ;;  %v6690_v15 = vmax.f32 %v2370_v39, 1e-12  ;;  %v7076_v6 = vld [vmem:[#allocation25_spill] sm:$0xff]  ;;  %vm2500_vm14 = vweird.f32 %v6664_v21 }
 0x43e   : > { %3350 = vmatmul.f32.gmra.mxu2 %v3169_v25  ;;  %v2482_v61 = vsel %vm2481_vm10, %v6632_v59, %v2478_v33  ;;  %v2488_v41 = vmul.f32 %v6645_v45, %v2487_v22  ;;  %v2496_v38 = vmul.f32 0.5, %v2495_v32  ;;  %vm2491_vm13 = vmor %vm2489_vm12, %vm2490_vm11  ;;  %vm2499_vm15 = vweird.f32 %v6642_v11  ;;  %v7078_v11 = vld [vmem:[#allocation27_spill] sm:$0xff] }
 0x43f   : > { %3415 = vmatmul.f32.gmra.mxu3 %v3170_v1  ;;  %v2569_v35 = vmul.f32 %v2482_v61, %v7074_v63  ;;  %v2570_v19 = vmul.f32 %v2482_v61, %v7075_v28  ;;  %4554 = vrsqrt.f32 %v6690_v15  ;;  %v6707_v27 = vmax.f32 %v2373_v53, 1e-12  ;;  %vm2501_vm0 = vmor %vm2499_vm15, %vm2500_vm14 }
 0x440   : > { %3220 = vmatmul.f32.gmra.mxu0 %v3169_v25  ;;  %v3178_v25 = vmul.f32 %v6543_v44, %v2568_v2  ;;  %v2497_v37 = vsub.f32 1.5, %v2496_v38  ;;  %vm2509_vm2 = vweird.f32 %v6659_v46  ;;  %v6719_v60 = vmax.f32 %v2376_v26, 1e-12 }
 0x441   : > { %3285 = vmatmul.f32.gmra.mxu1 %v3170_v1  ;;  %v6680_v1 = vpop.eup %4550  ;;  %v3179_v43 = vmul.f32 %v6543_v44, %v2569_v35  ;;  %v3180_v10 = vmul.f32 %v6543_v44, %v2570_v19  ;;  %4556 = vrsqrt.f32 %v6707_v27  ;;  %vm2519_vm5 = vweird.f32 %v6674_v42  ;;  %v7084_v19 = vld [vmem:[#allocation33_spill] sm:$0xff] }
 0x442   : > { %v2504_v0 = vmul.f32 %v6680_v1, %v6659_v46  ;;  %v6693_v18 = vpop.eup %4552  ;;  %v2498_v55 = vmul.f32 %v6664_v21, %v2497_v37  ;;  %vm2510_vm1 = vweird.f32 %v6680_v1  ;;  %4558 = vrsqrt.f32 %v6719_v60  ;;  %v7080_v46 = vld [vmem:[#allocation29_spill] sm:$0xff]  ;;  %v7085_v37 = vld [vmem:[#allocation34_spill] sm:$0xff] }
 0x443   : > { %v2514_v58 = vmul.f32 %v6693_v18, %v6674_v42  ;;  %vm2511_vm3 = vmor %vm2509_vm2, %vm2510_vm1  ;;  %vm2520_vm4 = vweird.f32 %v6693_v18  ;;  %v7083_v42 = vld [vmem:[#allocation32_spill] sm:$0xff]  ;;  %vm2529_vm8 = vweird.f32 %v6690_v15  ;;  %vm2539_vm11 = vweird.f32 %v6707_v27 }
 0x444   : > { %v2502_v17 = vsel %vm2501_vm0, %v6664_v21, %v2498_v55  ;;  %vm2521_vm6 = vmor %vm2519_vm5, %vm2520_vm4  ;;  %v7087_v55 = vld [vmem:[#allocation36_spill] sm:$0xff]  ;;  %vm2549_vm14 = vweird.f32 %v6719_v60 }
 0x445   : > { %v2515_v7 = vmul.f32 %v6693_v18, %v2514_v58  ;;  %v4555_v5 = vpop.eup %4554  ;;  %v2573_v34 = vmul.f32 %v2502_v17, %v7078_v11  ;;  %v2574_v56 = vmul.f32 %v2502_v17, %v7079_v23 }
 0x446   : > { %3353 = vmatmul.f32.gmra.mxu2 %v3171_v29  ;;  %v2524_v49 = vmul.f32 %v4555_v5, %v6690_v15  ;;  %vm2530_vm7 = vweird.f32 %v4555_v5 }
 0x447   : > { %3418 = vmatmul.f32.gmra.mxu3 %v3172_v31  ;;  %v3183_v40 = vmul.f32 %v6543_v44, %v2573_v34  ;;  %vm2531_vm9 = vmor %vm2529_vm8, %vm2530_vm7 }
 0x448   : > { %3223 = vmatmul.f32.gmra.mxu0 %v3171_v29  ;;  %v2505_v29 = vmul.f32 %v6680_v1, %v2504_v0  ;;  %v2525_v3 = vmul.f32 %v4555_v5, %v2524_v49 }
 0x449   : > { %3288 = vmatmul.f32.gmra.mxu1 %v3172_v31  ;;  %v2492_v31 = vsel %vm2491_vm13, %v6645_v45, %v2488_v41 }
 0x44a   : > { %v2571_v59 = vmul.f32 %v2492_v31, %v7076_v6  ;;  %v2506_v30 = vmul.f32 0.5, %v2505_v29  ;;  %v2572_v47 = vmul.f32 %v2492_v31, %v7077_v4  ;;  %v2526_v13 = vmul.f32 0.5, %v2525_v3 }
 0x44c   : > { %v3181_v20 = vmul.f32 %v6543_v44, %v2571_v59  ;;  %v3182_v45 = vmul.f32 %v6543_v44, %v2572_v47  ;;  %v2527_v2 = vsub.f32 1.5, %v2526_v13  ;;  %v7086_v59 = vld [vmem:[#allocation35_spill] sm:$0xff] }
 0x44e   : > { %3356 = vmatmul.f32.gmra.mxu2 %v3173_v24  ;;  %v2528_v63 = vmul.f32 %v4555_v5, %v2527_v2 }
 0x44f   : > { %3421 = vmatmul.f32.gmra.mxu3 %v3174_v36 }
 0x450   : > { %3226 = vmatmul.f32.gmra.mxu0 %v3173_v24  ;;  %v2507_v24 = vsub.f32 1.5, %v2506_v30  ;;  %v2532_v28 = vsel %vm2531_vm9, %v4555_v5, %v2528_v63 }
 0x451   : > { %3291 = vmatmul.f32.gmra.mxu1 %v3174_v36  ;;  %v2516_v36 = vmul.f32 0.5, %v2515_v7 }
 0x452   : > { %v2508_v52 = vmul.f32 %v6680_v1, %v2507_v24 }
 0x453   : > { %v2517_v51 = vsub.f32 1.5, %v2516_v36 }
 0x454   : > { %v2512_v12 = vsel %vm2511_vm3, %v6680_v1, %v2508_v52 }
 0x455   : > { %v2575_v50 = vmul.f32 %v2512_v12, %v7080_v46  ;;  %v2518_v21 = vmul.f32 %v6693_v18, %v2517_v51  ;;  %v2576_v48 = vmul.f32 %v2512_v12, %v7081_v16 }
 0x456   : > { %3359 = vmatmul.f32.gmra.mxu2 %v3175_v14 }
 0x457   : > { %3424 = vmatmul.f32.gmra.mxu3 %v3176_v8  ;;  %v3185_v33 = vmul.f32 %v6543_v44, %v2575_v50  ;;  %v2522_v22 = vsel %vm2521_vm6, %v6693_v18, %v2518_v21 }
 0x458   : > { %3229 = vmatmul.f32.gmra.mxu0 %v3175_v14  ;;  %v3184_v14 = vmul.f32 %v6543_v44, %v2574_v56  ;;  %v2578_v35 = vmul.f32 %v2522_v22, %v7083_v42 }
 0x459   : > { %3294 = vmatmul.f32.gmra.mxu1 %v3176_v8  ;;  %v4557_v8 = vpop.eup %4556 }
 0x45a   : > { %v2534_v57 = vmul.f32 %v4557_v8, %v6707_v27  ;;  %v4559_v62 = vpop.eup %4558  ;;  %v3188_v39 = vmul.f32 %v6543_v44, %v2578_v35  ;;  %vm2540_vm10 = vweird.f32 %v4557_v8 }
 0x45b   : > { %v2544_v32 = vmul.f32 %v4559_v62, %v6719_v60  ;;  %vm2541_vm12 = vmor %vm2539_vm11, %vm2540_vm10  ;;  %vm2550_vm13 = vweird.f32 %v4559_v62 }
 0x45c   : > { %v2535_v54 = vmul.f32 %v4557_v8, %v2534_v57  ;;  %vm2551_vm15 = vmor %vm2549_vm14, %vm2550_vm13 }
 0x45d   : > { %v2545_v0 = vmul.f32 %v4559_v62, %v2544_v32 }
 0x45e   : > { %3362 = vmatmul.f32.gmra.mxu2 %v3177_v9  ;;  %v2536_v1 = vmul.f32 0.5, %v2535_v54 }
 0x45f   : > { %3427 = vmatmul.f32.gmra.mxu3 %v3178_v25  ;;  %v2546_v18 = vmul.f32 0.5, %v2545_v0 }
 0x460   : > { %3232 = vmatmul.f32.gmra.mxu0 %v3177_v9  ;;  %v3186_v9 = vmul.f32 %v6543_v44, %v2576_v48  ;;  %v2537_v38 = vsub.f32 1.5, %v2536_v1 }
 0x461   : > { %3297 = vmatmul.f32.gmra.mxu1 %v3178_v25  ;;  %v7082_v25 = vld [vmem:[#allocation31_spill] sm:$0xff]  ;;  %v2547_v31 = vsub.f32 1.5, %v2546_v18 }
 0x462   : > { %v2577_v61 = vmul.f32 %v2522_v22, %v7082_v25  ;;  %v2538_v29 = vmul.f32 %v4557_v8, %v2537_v38 }
 0x463   : > { %v2548_v53 = vmul.f32 %v4559_v62, %v2547_v31 }
 0x464   : > { %v3187_v41 = vmul.f32 %v6543_v44, %v2577_v61  ;;  %v2542_v6 = vsel %vm2541_vm12, %v4557_v8, %v2538_v29 }
 0x465   : > { %v2581_v30 = vmul.f32 %v2542_v6, %v7086_v59  ;;  %v2582_v4 = vmul.f32 %v2542_v6, %v7087_v55  ;;  %v2552_v27 = vsel %vm2551_vm15, %v4559_v62, %v2548_v53 }
 0x466   : > { %3365 = vmatmul.f32.gmra.mxu2 %v3179_v43 }
 0x467   : > { %3430 = vmatmul.f32.gmra.mxu3 %v3180_v10  ;;  %v3191_v47 = vmul.f32 %v6543_v44, %v2581_v30  ;;  %v3192_v7 = vmul.f32 %v6543_v44, %v2582_v4 }
 0x468   : > { %3235 = vmatmul.f32.gmra.mxu0 %v3179_v43  ;;  %v2579_v43 = vmul.f32 %v2532_v28, %v7084_v19 }
 0x469   : > { %3300 = vmatmul.f32.gmra.mxu1 %v3180_v10  ;;  %v2580_v10 = vmul.f32 %v2532_v28, %v7085_v37 }
 0x46a   : > { %v3189_v15 = vmul.f32 %v6543_v44, %v2579_v43 }
 0x46b   : > { %v3190_v58 = vmul.f32 %v6543_v44, %v2580_v10 }
 0x46e   : > { %3368 = vmatmul.f32.gmra.mxu2 %v3181_v20 }
 0x46f   : > { %3433 = vmatmul.f32.gmra.mxu3 %v3182_v45 }
 0x470   : > { %3238 = vmatmul.f32.gmra.mxu0 %v3181_v20  ;;  %v7088_v20 = vld [vmem:[#allocation37_spill] sm:$0xff] }
 0x471   : > { %3303 = vmatmul.f32.gmra.mxu1 %v3182_v45  ;;  %v2583_v24 = vmul.f32 %v2552_v27, %v7088_v20  ;;  %v7089_v45 = vld [vmem:[#allocation38_spill] sm:$0xff] }
 0x472   : > { %v2584_v17 = vmul.f32 %v2552_v27, %v7089_v45 }
 0x473   : > { %v3193_v5 = vmul.f32 %v6543_v44, %v2583_v24 }
 0x474   : > { %v3194_v36 = vmul.f32 %v6543_v44, %v2584_v17 }
 0x476   : > { %3371 = vmatmul.f32.gmra.mxu2 %v3183_v40 }
 0x477   : > { %3436 = vmatmul.f32.gmra.mxu3 %v3184_v14 }
 0x478   : > { %3241 = vmatmul.f32.gmra.mxu0 %v3183_v40 }
 0x479   : > { %3306 = vmatmul.f32.gmra.mxu1 %v3184_v14 }
 0x47e   : > { %3374 = vmatmul.f32.gmra.mxu2 %v3185_v33 }
 0x47f   : > { %3439 = vmatmul.f32.gmra.mxu3 %v3186_v9 }
 0x480   : > { %3244 = vmatmul.f32.gmra.mxu0 %v3185_v33 }
 0x481   : > { %3309 = vmatmul.f32.gmra.mxu1 %v3186_v9 }
 0x486   : > { %3377 = vmatmul.f32.gmra.mxu2 %v3187_v41 }
 0x487   : > { %3442 = vmatmul.f32.gmra.mxu3 %v3188_v39 }
 0x488   : > { %3247 = vmatmul.f32.gmra.mxu0 %v3187_v41 }
 0x489   : > { %3312 = vmatmul.f32.gmra.mxu1 %v3188_v39 }
 0x48e   : > { %3380 = vmatmul.f32.gmra.mxu2 %v3189_v15 }
 0x48f   : > { %3445 = vmatmul.f32.gmra.mxu3 %v3190_v58 }
 0x490   : > { %3250 = vmatmul.f32.gmra.mxu0 %v3189_v15 }
 0x491   : > { %3315 = vmatmul.f32.gmra.mxu1 %v3190_v58 }
 0x496   : > { %3383 = vmatmul.f32.gmra.mxu2 %v3191_v47 }
 0x497   : > { %3448 = vmatmul.f32.gmra.mxu3 %v3192_v7 }
 0x498   : > { %3253 = vmatmul.f32.gmra.mxu0 %v3191_v47 }
 0x499   : > { %3318 = vmatmul.f32.gmra.mxu1 %v3192_v7 }
 0x49e   : > { %3386 = vmatmul.f32.gmra.mxu2 %v3193_v5 }
 0x49f   : > { %3451 = vmatmul.f32.gmra.mxu3 %v3194_v36 }
 0x4a0   : > { %3256 = vmatmul.f32.gmra.mxu0 %v3193_v5 }
 0x4a1   : > { %3321 = vmatmul.f32.gmra.mxu1 %v3194_v36 }
 0x4a5   : > { %v3212_v26 = vpop.f32.mrf.mxu0 }
 0x4a6   : > { %v3277_v11 = vpop.f32.mrf.mxu1 }
 0x4a7   : > { %v3278_v34 = vadd.f32 %v3277_v11, %v3212_v26 }
 0x4a9   : > { %3455 = vst [vmem:[%s6758_s28] sm:$0xff] %v3278_v34  ;;  %v3342_v44 = vpop.f32.mrf.mxu2 }
 0x4aa   : > { %v3407_v52 = vpop.f32.mrf.mxu3 }
 0x4ab   : > { %v3408_v49 = vadd.f32 %v3407_v52, %v3342_v44 }
 0x4ad   : > { %3456 = vst [vmem:[%s6758_s28 + $0x8] sm:$0xff] %v3408_v49  ;;  %v3215_v23 = vpop.f32.mrf.mxu0 }
 0x4ae   : > { %v3280_v56 = vpop.f32.mrf.mxu1 }
 0x4af   : > { %v3281_v60 = vadd.f32 %v3280_v56, %v3215_v23 }
 0x4b1   : > { %3457 = vst [vmem:[%s6758_s28 + $0x10] sm:$0xff] %v3281_v60  ;;  %v3345_v40 = vpop.f32.mrf.mxu2 }
 0x4b2   : > { %v3410_v51 = vpop.f32.mrf.mxu3 }
 0x4b3   : > { %v3411_v3 = vadd.f32 %v3410_v51, %v3345_v40 }
 0x4b5   : > { %3458 = vst [vmem:[%s6758_s28 + $0x18] sm:$0xff] %v3411_v3  ;;  %v3218_v14 = vpop.f32.mrf.mxu0 }
 0x4b6   : > { %v3283_v12 = vpop.f32.mrf.mxu1 }
 0x4b7   : > { %v3284_v8 = vadd.f32 %v3283_v12, %v3218_v14 }
 0x4b9   : > { %3459 = vst [vmem:[%s6758_s28 + $0x20] sm:$0xff] %v3284_v8  ;;  %v3348_v46 = vpop.f32.mrf.mxu2 }
 0x4ba   : > { %v3413_v50 = vpop.f32.mrf.mxu3 }
 0x4bb   : > { %v3414_v21 = vadd.f32 %v3413_v50, %v3348_v46 }
 0x4bd   : > { %3460 = vst [vmem:[%s6758_s28 + $0x28] sm:$0xff] %v3414_v21  ;;  %v3221_v57 = vpop.f32.mrf.mxu0 }
 0x4be   : > { %v3286_v13 = vpop.f32.mrf.mxu1 }
 0x4bf   : > { %v3287_v16 = vadd.f32 %v3286_v13, %v3221_v57 }
 0x4c1   : > { %3461 = vst [vmem:[%s6758_s28 + $0x30] sm:$0xff] %v3287_v16  ;;  %v3351_v48 = vpop.f32.mrf.mxu2 }
 0x4c2   : > { %v3416_v33 = vpop.f32.mrf.mxu3 }
 0x4c3   : > { %v3417_v62 = vadd.f32 %v3416_v33, %v3351_v48 }
 0x4c5   : > { %3462 = vst [vmem:[%s6758_s28 + $0x38] sm:$0xff] %v3417_v62  ;;  %v3224_v54 = vpop.f32.mrf.mxu0 }
 0x4c6   : > { %v3289_v2 = vpop.f32.mrf.mxu1 }
 0x4c7   : > { %v3290_v9 = vadd.f32 %v3289_v2, %v3224_v54 }
 0x4c9   : > { %3463 = vst [vmem:[%s6758_s28 + $0x40] sm:$0xff] %v3290_v9  ;;  %v3354_v22 = vpop.f32.mrf.mxu2 }
 0x4ca   : > { %v3419_v32 = vpop.f32.mrf.mxu3 }
 0x4cb   : > { %v3420_v25 = vadd.f32 %v3419_v32, %v3354_v22 }
 0x4cd   : > { %3464 = vst [vmem:[%s6758_s28 + $0x48] sm:$0xff] %v3420_v25  ;;  %v3227_v61 = vpop.f32.mrf.mxu0 }
 0x4ce   : > { %v3292_v1 = vpop.f32.mrf.mxu1 }
 0x4cf   : > { %v3293_v63 = vadd.f32 %v3292_v1, %v3227_v61 }
 0x4d1   : > { %3465 = vst [vmem:[%s6758_s28 + $0x50] sm:$0xff] %v3293_v63  ;;  %v3357_v42 = vpop.f32.mrf.mxu2 }
 0x4d2   : > { %v3422_v35 = vpop.f32.mrf.mxu3 }
 0x4d3   : > { %v3423_v41 = vadd.f32 %v3422_v35, %v3357_v42 }
 0x4d5   : > { %3466 = vst [vmem:[%s6758_s28 + $0x58] sm:$0xff] %v3423_v41  ;;  %v3230_v0 = vpop.f32.mrf.mxu0 }
 0x4d6   : > { %v3295_v38 = vpop.f32.mrf.mxu1 }
 0x4d7   : > { %v3296_v39 = vadd.f32 %v3295_v38, %v3230_v0 }
 0x4d9   : > { %3467 = vst [vmem:[%s6758_s28 + $0x60] sm:$0xff] %v3296_v39  ;;  %v3360_v28 = vpop.f32.mrf.mxu2 }
 0x4da   : > { %v3425_v19 = vpop.f32.mrf.mxu3 }
 0x4db   : > { %v3426_v43 = vadd.f32 %v3425_v19, %v3360_v28 }
 0x4dd   : > { %3468 = vst [vmem:[%s6758_s28 + $0x68] sm:$0xff] %v3426_v43  ;;  %v3233_v18 = vpop.f32.mrf.mxu0 }
 0x4de   : > { %v3298_v29 = vpop.f32.mrf.mxu1 }
 0x4df   : > { %v3299_v37 = vadd.f32 %v3298_v29, %v3233_v18 }
 0x4e1   : > { %3469 = vst [vmem:[%s6758_s28 + $0x70] sm:$0xff] %v3299_v37  ;;  %v3363_v10 = vpop.f32.mrf.mxu2 }
 0x4e2   : > { %v3428_v15 = vpop.f32.mrf.mxu3 }
 0x4e3   : > { %v3429_v31 = vadd.f32 %v3428_v15, %v3363_v10 }
 0x4e5   : > { %3470 = vst [vmem:[%s6758_s28 + $0x78] sm:$0xff] %v3429_v31  ;;  %v3236_v58 = vpop.f32.mrf.mxu0 }
 0x4e6   : > { %v3301_v6 = vpop.f32.mrf.mxu1 }
 0x4e7   : > { %v3302_v59 = vadd.f32 %v3301_v6, %v3236_v58 }
 0x4e9   : > { %3471 = vst [vmem:[%s6758_s28 + $0x80] sm:$0xff] %v3302_v59  ;;  %v3366_v30 = vpop.f32.mrf.mxu2 }
 0x4ea   : > { %v3431_v53 = vpop.f32.mrf.mxu3 }
 0x4eb   : > { %v3432_v55 = vadd.f32 %v3431_v53, %v3366_v30 }
 0x4ed   : > { %3472 = vst [vmem:[%s6758_s28 + $0x88] sm:$0xff] %v3432_v55  ;;  %v3239_v4 = vpop.f32.mrf.mxu0 }
 0x4ee   : > { %v3304_v47 = vpop.f32.mrf.mxu1 }
 0x4ef   : > { %v3305_v7 = vadd.f32 %v3304_v47, %v3239_v4 }
 0x4f1   : > { %3473 = vst [vmem:[%s6758_s28 + $0x90] sm:$0xff] %v3305_v7  ;;  %v3369_v27 = vpop.f32.mrf.mxu2 }
 0x4f2   : > { %v3434_v20 = vpop.f32.mrf.mxu3 }
 0x4f3   : > { %v3435_v24 = vadd.f32 %v3434_v20, %v3369_v27 }
 0x4f5   : > { %3474 = vst [vmem:[%s6758_s28 + $0x98] sm:$0xff] %v3435_v24  ;;  %v3242_v45 = vpop.f32.mrf.mxu0 }
 0x4f6   : > { %v3307_v17 = vpop.f32.mrf.mxu1 }
 0x4f7   : > { %v3308_v5 = vadd.f32 %v3307_v17, %v3242_v45 }
 0x4f9   : > { %3475 = vst [vmem:[%s6758_s28 + $0xa0] sm:$0xff] %v3308_v5  ;;  %v3372_v36 = vpop.f32.mrf.mxu2 }
 0x4fa   : > { %v3437_v26 = vpop.f32.mrf.mxu3 }
 0x4fb   : > { %v3438_v11 = vadd.f32 %v3437_v26, %v3372_v36 }
 0x4fd   : > { %3476 = vst [vmem:[%s6758_s28 + $0xa8] sm:$0xff] %v3438_v11  ;;  %v3245_v34 = vpop.f32.mrf.mxu0 }
 0x4fe   : > { %v3310_v44 = vpop.f32.mrf.mxu1 }
 0x4ff   : > { %v3311_v52 = vadd.f32 %v3310_v44, %v3245_v34 }
 0x501   : > { %3477 = vst [vmem:[%s6758_s28 + $0xb0] sm:$0xff] %v3311_v52  ;;  %v3375_v49 = vpop.f32.mrf.mxu2 }
 0x502   : > { %v3440_v23 = vpop.f32.mrf.mxu3 }
 0x503   : > { %v3441_v56 = vadd.f32 %v3440_v23, %v3375_v49 }
 0x505   : > { %3478 = vst [vmem:[%s6758_s28 + $0xb8] sm:$0xff] %v3441_v56  ;;  %v3248_v60 = vpop.f32.mrf.mxu0 }
 0x506   : > { %v3313_v40 = vpop.f32.mrf.mxu1 }
 0x507   : > { %v3314_v51 = vadd.f32 %v3313_v40, %v3248_v60 }
 0x509   : > { %3479 = vst [vmem:[%s6758_s28 + $0xc0] sm:$0xff] %v3314_v51  ;;  %v3378_v3 = vpop.f32.mrf.mxu2 }
 0x50a   : > { %v3443_v14 = vpop.f32.mrf.mxu3 }
 0x50b   : > { %v3444_v12 = vadd.f32 %v3443_v14, %v3378_v3 }
 0x50d   : > { %3480 = vst [vmem:[%s6758_s28 + $0xc8] sm:$0xff] %v3444_v12  ;;  %v3251_v8 = vpop.f32.mrf.mxu0 }
 0x50e   : > { %v3316_v46 = vpop.f32.mrf.mxu1 }
 0x50f   : > { %v3317_v50 = vadd.f32 %v3316_v46, %v3251_v8 }
 0x511   : > { %3481 = vst [vmem:[%s6758_s28 + $0xd0] sm:$0xff] %v3317_v50  ;;  %v3381_v21 = vpop.f32.mrf.mxu2 }
 0x512   : > { %v3446_v57 = vpop.f32.mrf.mxu3 }
 0x513   : > { %v3447_v13 = vadd.f32 %v3446_v57, %v3381_v21 }
 0x515   : > { %3482 = vst [vmem:[%s6758_s28 + $0xd8] sm:$0xff] %v3447_v13  ;;  %v3254_v16 = vpop.f32.mrf.mxu0 }
 0x516   : > { %v3319_v48 = vpop.f32.mrf.mxu1 }
 0x517   : > { %v3320_v33 = vadd.f32 %v3319_v48, %v3254_v16 }
 0x519   : > { %3483 = vst [vmem:[%s6758_s28 + $0xe0] sm:$0xff] %v3320_v33  ;;  %v3384_v62 = vpop.f32.mrf.mxu2 }
 0x51a   : > { %v3449_v54 = vpop.f32.mrf.mxu3 }
 0x51b   : > { %v3450_v2 = vadd.f32 %v3449_v54, %v3384_v62 }
 0x51d   : > { %3484 = vst [vmem:[%s6758_s28 + $0xe8] sm:$0xff] %v3450_v2  ;;  %v3257_v9 = vpop.f32.mrf.mxu0 }
 0x51e   : > { %v3322_v22 = vpop.f32.mrf.mxu1 }
 0x51f   : > { %v3323_v32 = vadd.f32 %v3322_v22, %v3257_v9 }
 0x521   : > { %3485 = vst [vmem:[%s6758_s28 + $0xf0] sm:$0xff] %v3323_v32  ;;  %v3387_v25 = vpop.f32.mrf.mxu2 }
 0x522   : > { %v3452_v61 = vpop.f32.mrf.mxu3 }
 0x523   : > { %v3453_v1 = vadd.f32 %v3452_v61, %v3387_v25 }
 0x525   : > { %3486 = vst [vmem:[%s6758_s28 + $0xf8] sm:$0xff] %v3453_v1 }
 0x526 PF: > { %s18_s23 = sadd.s32 1, %s4600_s23  }
 0x527   : > { %p15_p7 = scmp.ge.s32.totalorder %s18_s23, 4  }
 0x529   :  { %17 = sbr.rel (!%p15_p7) target bundleno = 3 (0x3), region = 73 }
 0x52e   :  { %3511 = vsyncpa [#allocation5], 1 }
 0x52f   :  { %3513 = vsyncpa [#allocation5 + $0x1], 1 }

</bundles_post_ra>
